<compile_context>
chip_gen: v7x
topology: tpu7x:2x2x1
jax: 0.10.0
libtpu: 0.0.40
codegen_flags: <defaults>
</compile_context>

<pallas_src>
import jax
import jax.numpy as jnp
from jax import lax
from jax.experimental import pallas as pl
from jax.experimental.pallas import tpu as pltpu


# ------------------------------- helpers ----------------------------------- #

def _round_up(x, m):
    return -(-x // m) * m


def _pick_batch_block(n, per_elem_bytes, budget_bytes):
    """Largest divisor of n whose VMEM residency fits the budget (<= 32)."""
    cap = int(max(1, min(n, budget_bytes // max(per_elem_bytes, 1), 32)))
    for nb in range(cap, 0, -1):
        if n % nb == 0:
            return nb
    return 1


# --------------------------- plan / weight packing -------------------------- #

def _build_plan_and_slabs(params, cfg, t0):
    """Static per-conv plan + packed bf16 weight slab / f32 bias slab.

    Weight block for a conv with kernel K: rows ordered (tap k, channel c) ->
    row k*width + c, columns = Cout (zero-padded to cout_max).  Input channels
    are zero-padded to `width` so every layer is uniform.
    """
    width = cfg["width"]
    ks = cfg["kernel_size"]
    st = cfg["stride_t"]
    pad_k = (ks - 1) // 2
    pad_t = st // 2
    cout_max = max(width, cfg["output_emb_width"])

    plan, wblocks, brows = [], [], []
    t_cur = [t0]

    def add(w, b, *, stride=1, pad=0, dilation=1, pre_relu=False,
            post_relu=False, save_res=False, add_res=False):
        cout, cin, k_sz = w.shape
        wp = jnp.zeros((cout_max, width, k_sz), jnp.float32)
        wp = wp.at[:cout, :cin, :].set(w.astype(jnp.float32))
        wk = jnp.transpose(wp, (2, 1, 0)).reshape(k_sz * width, cout_max)
        rows = k_sz * width
        rows_pad = _round_up(rows, 16)            # bf16 sublane-pair alignment
        if rows_pad > rows:
            wk = jnp.concatenate(
                [wk, jnp.zeros((rows_pad - rows, cout_max), jnp.float32)], axis=0)
        w_off = sum(int(blk.shape[0]) for blk in wblocks)
        wblocks.append(wk)
        brows.append(jnp.zeros((cout_max,), jnp.float32).at[:cout].set(b))

        t_in = t_cur[0]
        t_out = (t_in + 2 * pad - dilation * (k_sz - 1) - 1) // stride + 1
        plan.append(dict(K=k_sz, cout=cout, stride=stride, pad=pad,
                         dilation=dilation, T_in=t_in, T_out=t_out,
                         w_off=w_off, b_idx=len(brows) - 1,
                         pre_relu=pre_relu, post_relu=post_relu,
                         save_res=save_res, add_res=add_res))
        t_cur[0] = t_out

    w, b = params["conv_in"]
    add(w, b, pad=pad_k, post_relu=True)
    for d in params["downs"]:
        w, b = d["down"]
        add(w, b, stride=st, pad=pad_t)
        for blk in d["res"]:
            dil = blk["dilation"]
            add(blk["w1"], blk["b1"], pad=dil, dilation=dil,
                pre_relu=True, post_relu=True, save_res=True)
            add(blk["w2"], blk["b2"], add_res=True)
    w, b = params["conv_out"]
    add(w, b, pad=pad_k)

    w_slab = jnp.concatenate(wblocks, axis=0).astype(jnp.bfloat16)
    b_slab = jnp.stack(brows, axis=0)
    return plan, w_slab, b_slab


# --------------------------------- kernel ----------------------------------- #

def _make_encoder_kernel(plan, *, nb, t0, cin0, width, off):
    """Kernel refs: (x, w_slab, b_slab, out, hpad_scratch)."""

    def kernel(x_ref, w_ref, b_ref, o_ref, hp_ref):
        # -- input: native (NB, Cin, T); channel-pad then go time-major ------ #
        x = x_ref[...]                                          # (NB, Cin0, T0) f32
        if cin0 < width:
            x = jnp.concatenate(
                [x, jnp.zeros((nb, width - cin0, t0), x.dtype)], axis=1)
        h = jnp.transpose(x, (0, 2, 1))                         # (NB, T0, width)

        res = None
        for cv in plan:
            if cv["save_res"]:
                res = h                                         # pre-activation skip
            hin = jnp.maximum(h, 0.0) if cv["pre_relu"] else h

            k_sz, pad, dil = cv["K"], cv["pad"], cv["dilation"]
            stride, t_in, t_out, cout = cv["stride"], cv["T_in"], cv["T_out"], cv["cout"]

            if k_sz == 1 and pad == 0 and stride == 1:
                xcat = hin                                      # 1x1 conv: no shifts
            else:
                # zero-padded scratch + static / strided slices per tap
                hp_ref[...] = jnp.zeros(hp_ref.shape, hp_ref.dtype)
                hp_ref[:, off:off + t_in, :] = hin
                taps = []
                for k in range(k_sz):
                    s = off - pad + k * dil
                    if stride == 1:
                        taps.append(hp_ref[:, s:s + t_out, :])
                    else:                                       # stride-2 downsample
                        taps.append(hp_ref[:, pl.ds(s, t_out, stride=stride), :])
                xcat = jnp.concatenate(taps, axis=-1)           # (NB, T_out, K*width)

            kc = k_sz * width
            w = w_ref[cv["w_off"]:cv["w_off"] + kc, 0:cout]     # (K*width, Cout) bf16
            b = b_ref[cv["b_idx"]:cv["b_idx"] + 1, 0:cout]      # (1, Cout) f32

            # single fused-tap MXU matmul, f32 accumulation
            lhs = xcat.reshape(nb * t_out, kc).astype(jnp.bfloat16)
            y = jnp.dot(lhs, w, preferred_element_type=jnp.float32) + b
            y = y.reshape(nb, t_out, cout)

            if cv["post_relu"]:
                y = jnp.maximum(y, 0.0)
            if cv["add_res"]:
                y = y + res
            h = y

        # -- output: back to native (NB, Cout, T_out) ------------------------ #
        o_ref[...] = jnp.transpose(h, (0, 2, 1)).astype(o_ref.dtype)

    return kernel


# ------------------------------- host wrapper ------------------------------- #

def encoder_forward(x, params, cfg):
    """x: (N, C_in, T) f32  ->  (N, output_emb_width, T // stride_t**down_t) f32."""
    n, cin0, t0 = x.shape
    width = cfg["width"]
    cout_f = cfg["output_emb_width"]

    plan, w_slab, b_slab = _build_plan_and_slabs(params, cfg, t0)
    t_f = plan[-1]["T_out"]

    for cv in plan:
        if cv["T_out"] % 8 != 0:
            raise ValueError(
                f"T={t0}: every layer's output length must be a multiple of 8 "
                f"(got T_out={cv['T_out']}); pick T divisible by "
                f"{8 * cfg['stride_t'] ** cfg['down_t']}.")

    max_pad = max(cv["pad"] for cv in plan)
    off = _round_up(max(max_pad, 1), 8)                 # aligned data offset in scratch
    tp_rows = _round_up(off + max(cv["T_in"] + cv["pad"] for cv in plan), 8)

    # VMEM budgeting: v7x has 64 MiB physical VMEM, v5e/v6e 128 MiB.
    try:
        phys_vmem = int(pltpu.get_tpu_info().vmem_capacity_bytes)
    except Exception:
        phys_vmem = 64 * 1024 * 1024
    vmem_limit = min(phys_vmem // 2, 64 * 1024 * 1024)

    # Rough per-batch-element residency: padded scratch + a handful of live
    # f32 activations / tap-concat values of size ~T0 x width.
    per_elem = (tp_rows * width + 8 * t0 * width) * 4
    nb = _pick_batch_block(n, per_elem, vmem_limit // 4)
    grid = (n // nb,)

    kernel = _make_encoder_kernel(plan, nb=nb, t0=t0, cin0=cin0,
                                  width=width, off=off)

    out = pl.pallas_call(
        kernel,
        out_shape=jax.ShapeDtypeStruct((n, cout_f, t_f), jnp.float32),
        grid=grid,
        in_specs=[
            pl.BlockSpec((nb, cin0, t0), lambda i: (i, 0, 0)),   # batch block
            pl.BlockSpec(w_slab.shape, lambda i: (0, 0)),        # weight slab (resident)
            pl.BlockSpec(b_slab.shape, lambda i: (0, 0)),        # bias slab (resident)
        ],
        out_specs=pl.BlockSpec((nb, cout_f, t_f), lambda i: (i, 0, 0)),
        scratch_shapes=[pltpu.VMEM((nb, tp_rows, width), jnp.float32)],
        compiler_params=pltpu.CompilerParams(
            dimension_semantics=("parallel",),
            vmem_limit_bytes=int(vmem_limit)),
    )(x.astype(jnp.float32), w_slab, b_slab)

    return out


# --------------------------- parameter creation ---------------------------- #

def _conv_params(key, cout, cin, k):
    """PyTorch Conv1d default init: U(-1/sqrt(fan_in), 1/sqrt(fan_in))."""
    kw, kb = jax.random.split(key)
    bound = 1.0 / (cin * k) ** 0.5
    w = jax.random.uniform(kw, (cout, cin, k), jnp.float32, -bound, bound)
    b = jax.random.uniform(kb, (cout,), jnp.float32, -bound, bound)
    return w, b


def init_encoder_params(key, *, input_emb_width, output_emb_width, down_t,
                        stride_t, width, depth, dilation_growth_rate,
                        kernel_size):
    filter_t = stride_t * 2
    n_keys = 2 + down_t * (1 + 2 * depth)
    keys = iter(jax.random.split(key, n_keys))
    params = {}
    params["conv_in"] = _conv_params(next(keys), width, input_emb_width,
                                     kernel_size)
    downs = []
    dilations = [dilation_growth_rate ** j for j in range(depth)][::-1]
    for _ in range(down_t):
        d = {"down": _conv_params(next(keys), width, width, filter_t)}
        res = []
        for dil in dilations:
            w1, b1 = _conv_params(next(keys), width, width, kernel_size)
            w2, b2 = _conv_params(next(keys), width, width, 1)
            res.append(dict(dilation=dil, w1=w1, b1=b1, w2=w2, b2=b2))
        d["res"] = res
        downs.append(d)
    params["downs"] = downs
    params["conv_out"] = _conv_params(next(keys), output_emb_width, width,
                                      kernel_size)
    return params


# ---------------------------- pure-JAX reference ---------------------------- #

def _conv1d_ref(x, w, b, stride=1, pad=0, dilation=1):
    y = lax.conv_general_dilated(
        x, w, window_strides=(stride,), padding=[(pad, pad)],
        rhs_dilation=(dilation,), dimension_numbers=("NCH", "OIH", "NCH"))
    return y + b[None, :, None]


def encoder_forward_ref(x, params, cfg):
    stride_t = cfg["stride_t"]
    kernel_size = cfg["kernel_size"]
    pad_k = (kernel_size - 1) // 2
    pad_t = stride_t // 2

    w, b = params["conv_in"]
    h = jnp.maximum(_conv1d_ref(x, w, b, stride=1, pad=pad_k), 0.0)
    for d in params["downs"]:
        w, b = d["down"]
        h = _conv1d_ref(h, w, b, stride=stride_t, pad=pad_t)
        for blk in d["res"]:
            dil = blk["dilation"]
            t = jnp.maximum(h, 0.0)
            t = _conv1d_ref(t, blk["w1"], blk["b1"], stride=1, pad=dil,
                            dilation=dil)
            t = jnp.maximum(t, 0.0)
            t = _conv1d_ref(t, blk["w2"], blk["b2"], stride=1, pad=0)
            h = h + t
    w, b = params["conv_out"]
    return _conv1d_ref(h, w, b, stride=1, pad=pad_k)


# ----------------------------------- main ----------------------------------- #

if __name__ == "__main__":
    cfg = dict(input_emb_width=4, output_emb_width=32, down_t=2, stride_t=2,
               width=32, depth=2, dilation_growth_rate=3, kernel_size=3)

    key = jax.random.PRNGKey(0)
    kx, kp = jax.random.split(key)
    N, T = 2, 64
    x = jax.random.normal(kx, (N, cfg["input_emb_width"], T), jnp.float32)

    params = init_encoder_params(kp, **cfg)

    out = jax.block_until_ready(encoder_forward(x, params, cfg))

    expected_T = T // (cfg["stride_t"] ** cfg["down_t"])
    assert out.shape == (N, cfg["output_emb_width"], expected_T), out.shape

    ref = encoder_forward_ref(x, params, cfg)
    err = float(jnp.max(jnp.abs(out - ref)))
    # bf16 MXU operands with f32 accumulation -> small numerical drift vs f32.
    if not jnp.allclose(out, ref, atol=5e-2, rtol=5e-2):
        raise AssertionError(f"Pallas output mismatch vs reference, max err={err}")

    print("KERNEL_OK")
</pallas_src>

<mosaic_0001>
module attributes {stable_mosaic.version = 11 : i64} {
  func.func @kernel(%arg0: i32, %arg1: memref<2x4x64xf32, #tpu.memory_space<vmem>>, %arg2: memref<960x32xbf16, #tpu.memory_space<vmem>>, %arg3: memref<12x32xf32, #tpu.memory_space<vmem>>, %arg4: memref<2x32x16xf32, #tpu.memory_space<vmem>>, %arg5: memref<2x80x32xf32, #tpu.memory_space<vmem>>) attributes {dimension_semantics = [#tpu.dimension_semantics<parallel>], iteration_bounds = array<i64: 1>, scalar_prefetch = 0 : i64, scratch_operands = 1 : i64, tpu.core_type = #tpu.core_type<tc>, window_params = [{transform_indices = @transform_0, window_bounds = array<i64: 2, 4, 64>}, {pipeline_mode = #tpu.pipeline_mode<synchronous>, transform_indices = @transform_1, window_bounds = array<i64: 960, 32>}, {pipeline_mode = #tpu.pipeline_mode<synchronous>, transform_indices = @transform_2, window_bounds = array<i64: 12, 32>}, {transform_indices = @transform_3, window_bounds = array<i64: 2, 32, 16>}]} {
    %c0 = arith.constant 0 : index
    %c0_0 = arith.constant 0 : index
    %c0_1 = arith.constant 0 : index
    %0 = vector.load %arg1[%c0, %c0_0, %c0_1] : memref<2x4x64xf32, #tpu.memory_space<vmem>>, vector<2x4x64xf32>
    %cst = arith.constant 0.000000e+00 : f32
    %1 = vector.broadcast %cst : f32 to vector<2x28x64xf32>
    %2 = tpu.concatenate %0, %1 in 1 : vector<2x4x64xf32>, vector<2x28x64xf32> -> vector<2x32x64xf32>
    %3 = tpu.transpose %2, [0, 2, 1] : vector<2x32x64xf32> -> vector<2x64x32xf32>
    %cst_2 = arith.constant 0.000000e+00 : f32
    %4 = vector.broadcast %cst_2 : f32 to vector<2x80x32xf32>
    %c0_3 = arith.constant 0 : index
    %c0_4 = arith.constant 0 : index
    %c0_5 = arith.constant 0 : index
    %5 = vector.load %arg5[%c0_3, %c0_4, %c0_5] : memref<2x80x32xf32, #tpu.memory_space<vmem>>, vector<2x80x32xf32>
    tpu.vector_store %arg5[%c0_3, %c0_4, %c0_5], %4 {strides = array<i32>} : memref<2x80x32xf32, #tpu.memory_space<vmem>>, vector<2x80x32xf32>,
    %c0_6 = arith.constant 0 : index
    %c8 = arith.constant 8 : index
    %c0_7 = arith.constant 0 : index
    %6 = vector.load %arg5[%c0_6, %c8, %c0_7] : memref<2x80x32xf32, #tpu.memory_space<vmem>>, vector<2x64x32xf32>
    tpu.vector_store %arg5[%c0_6, %c8, %c0_7], %3 {strides = array<i32>} : memref<2x80x32xf32, #tpu.memory_space<vmem>>, vector<2x64x32xf32>,
    %c0_8 = arith.constant 0 : index
    %c7 = arith.constant 7 : index
    %c0_9 = arith.constant 0 : index
    %7 = vector.load %arg5[%c0_8, %c7, %c0_9] : memref<2x80x32xf32, #tpu.memory_space<vmem>>, vector<2x64x32xf32>
    %c0_10 = arith.constant 0 : index
    %c8_11 = arith.constant 8 : index
    %c0_12 = arith.constant 0 : index
    %8 = vector.load %arg5[%c0_10, %c8_11, %c0_12] : memref<2x80x32xf32, #tpu.memory_space<vmem>>, vector<2x64x32xf32>
    %c0_13 = arith.constant 0 : index
    %c9 = arith.constant 9 : index
    %c0_14 = arith.constant 0 : index
    %9 = vector.load %arg5[%c0_13, %c9, %c0_14] : memref<2x80x32xf32, #tpu.memory_space<vmem>>, vector<2x64x32xf32>
    %10 = tpu.concatenate %7, %8, %9 in 2 : vector<2x64x32xf32>, vector<2x64x32xf32>, vector<2x64x32xf32> -> vector<2x64x96xf32>
    %c0_15 = arith.constant 0 : index
    %c0_16 = arith.constant 0 : index
    %11 = vector.load %arg2[%c0_15, %c0_16] : memref<960x32xbf16, #tpu.memory_space<vmem>>, vector<96x32xbf16>
    %c0_17 = arith.constant 0 : index
    %c0_18 = arith.constant 0 : index
    %12 = vector.load %arg3[%c0_17, %c0_18] : memref<12x32xf32, #tpu.memory_space<vmem>>, vector<1x32xf32>
    %13 = vector.shape_cast %10 : vector<2x64x96xf32> to vector<128x96xf32>
    %14 = arith.truncf %13 : vector<128x96xf32> to vector<128x96xbf16>
    %cst_19 = arith.constant dense<0.000000e+00> : vector<128x32xf32>
    %15 = tpu.matmul %14, %11, %cst_19 {dimension_numbers = #tpu.dot_dimension_numbers<[1], [0], [0], [1], [0, 0, 1, 1], [], []>} : vector<128x96xbf16>, vector<96x32xbf16>, vector<128x32xf32> -> vector<128x32xf32>
    %16 = vector.broadcast %12 : vector<1x32xf32> to vector<128x32xf32>
    %17 = arith.addf %15, %16 : vector<128x32xf32>
    %18 = vector.shape_cast %17 : vector<128x32xf32> to vector<2x64x32xf32>
    %cst_20 = arith.constant 0.000000e+00 : f32
    %19 = vector.broadcast %cst_20 : f32 to vector<2x64x32xf32>
    %20 = arith.maximumf %18, %19 : vector<2x64x32xf32>
    %cst_21 = arith.constant 0.000000e+00 : f32
    %21 = vector.broadcast %cst_21 : f32 to vector<2x80x32xf32>
    %c0_22 = arith.constant 0 : index
    %c0_23 = arith.constant 0 : index
    %c0_24 = arith.constant 0 : index
    %22 = vector.load %arg5[%c0_22, %c0_23, %c0_24] : memref<2x80x32xf32, #tpu.memory_space<vmem>>, vector<2x80x32xf32>
    tpu.vector_store %arg5[%c0_22, %c0_23, %c0_24], %21 {strides = array<i32>} : memref<2x80x32xf32, #tpu.memory_space<vmem>>, vector<2x80x32xf32>,
    %c0_25 = arith.constant 0 : index
    %c8_26 = arith.constant 8 : index
    %c0_27 = arith.constant 0 : index
    %23 = vector.load %arg5[%c0_25, %c8_26, %c0_27] : memref<2x80x32xf32, #tpu.memory_space<vmem>>, vector<2x64x32xf32>
    tpu.vector_store %arg5[%c0_25, %c8_26, %c0_27], %20 {strides = array<i32>} : memref<2x80x32xf32, #tpu.memory_space<vmem>>, vector<2x64x32xf32>,
    %c0_28 = arith.constant 0 : index
    %c7_29 = arith.constant 7 : index
    %c0_30 = arith.constant 0 : index
    %24 = tpu.strided_load %arg5[%c0_28, %c7_29, %c0_30] {strides = array<i32: 1, 2, 1>} : memref<2x80x32xf32, #tpu.memory_space<vmem>>, vector<2x32x32xf32>
    %c0_31 = arith.constant 0 : index
    %c8_32 = arith.constant 8 : index
    %c0_33 = arith.constant 0 : index
    %25 = tpu.strided_load %arg5[%c0_31, %c8_32, %c0_33] {strides = array<i32: 1, 2, 1>} : memref<2x80x32xf32, #tpu.memory_space<vmem>>, vector<2x32x32xf32>
    %c0_34 = arith.constant 0 : index
    %c9_35 = arith.constant 9 : index
    %c0_36 = arith.constant 0 : index
    %26 = tpu.strided_load %arg5[%c0_34, %c9_35, %c0_36] {strides = array<i32: 1, 2, 1>} : memref<2x80x32xf32, #tpu.memory_space<vmem>>, vector<2x32x32xf32>
    %c0_37 = arith.constant 0 : index
    %c10 = arith.constant 10 : index
    %c0_38 = arith.constant 0 : index
    %27 = tpu.strided_load %arg5[%c0_37, %c10, %c0_38] {strides = array<i32: 1, 2, 1>} : memref<2x80x32xf32, #tpu.memory_space<vmem>>, vector<2x32x32xf32>
    %28 = tpu.concatenate %24, %25, %26, %27 in 2 : vector<2x32x32xf32>, vector<2x32x32xf32>, vector<2x32x32xf32>, vector<2x32x32xf32> -> vector<2x32x128xf32>
    %c96 = arith.constant 96 : index
    %c0_39 = arith.constant 0 : index
    %29 = vector.load %arg2[%c96, %c0_39] : memref<960x32xbf16, #tpu.memory_space<vmem>>, vector<128x32xbf16>
    %c1 = arith.constant 1 : index
    %c0_40 = arith.constant 0 : index
    %30 = vector.load %arg3[%c1, %c0_40] : memref<12x32xf32, #tpu.memory_space<vmem>>, vector<1x32xf32>
    %31 = vector.shape_cast %28 : vector<2x32x128xf32> to vector<64x128xf32>
    %32 = arith.truncf %31 : vector<64x128xf32> to vector<64x128xbf16>
    %cst_41 = arith.constant dense<0.000000e+00> : vector<64x32xf32>
    %33 = tpu.matmul %32, %29, %cst_41 {dimension_numbers = #tpu.dot_dimension_numbers<[1], [0], [0], [1], [0, 0, 1, 1], [], []>} : vector<64x128xbf16>, vector<128x32xbf16>, vector<64x32xf32> -> vector<64x32xf32>
    %34 = vector.broadcast %30 : vector<1x32xf32> to vector<64x32xf32>
    %35 = arith.addf %33, %34 : vector<64x32xf32>
    %36 = vector.shape_cast %35 : vector<64x32xf32> to vector<2x32x32xf32>
    %cst_42 = arith.constant 0.000000e+00 : f32
    %37 = vector.broadcast %cst_42 : f32 to vector<2x32x32xf32>
    %38 = arith.maximumf %36, %37 : vector<2x32x32xf32>
    %cst_43 = arith.constant 0.000000e+00 : f32
    %39 = vector.broadcast %cst_43 : f32 to vector<2x80x32xf32>
    %c0_44 = arith.constant 0 : index
    %c0_45 = arith.constant 0 : index
    %c0_46 = arith.constant 0 : index
    %40 = vector.load %arg5[%c0_44, %c0_45, %c0_46] : memref<2x80x32xf32, #tpu.memory_space<vmem>>, vector<2x80x32xf32>
    tpu.vector_store %arg5[%c0_44, %c0_45, %c0_46], %39 {strides = array<i32>} : memref<2x80x32xf32, #tpu.memory_space<vmem>>, vector<2x80x32xf32>,
    %c0_47 = arith.constant 0 : index
    %c8_48 = arith.constant 8 : index
    %c0_49 = arith.constant 0 : index
    %41 = vector.load %arg5[%c0_47, %c8_48, %c0_49] : memref<2x80x32xf32, #tpu.memory_space<vmem>>, vector<2x32x32xf32>
    tpu.vector_store %arg5[%c0_47, %c8_48, %c0_49], %38 {strides = array<i32>} : memref<2x80x32xf32, #tpu.memory_space<vmem>>, vector<2x32x32xf32>,
    %c0_50 = arith.constant 0 : index
    %c5 = arith.constant 5 : index
    %c0_51 = arith.constant 0 : index
    %42 = vector.load %arg5[%c0_50, %c5, %c0_51] : memref<2x80x32xf32, #tpu.memory_space<vmem>>, vector<2x32x32xf32>
    %c0_52 = arith.constant 0 : index
    %c8_53 = arith.constant 8 : index
    %c0_54 = arith.constant 0 : index
    %43 = vector.load %arg5[%c0_52, %c8_53, %c0_54] : memref<2x80x32xf32, #tpu.memory_space<vmem>>, vector<2x32x32xf32>
    %c0_55 = arith.constant 0 : index
    %c11 = arith.constant 11 : index
    %c0_56 = arith.constant 0 : index
    %44 = vector.load %arg5[%c0_55, %c11, %c0_56] : memref<2x80x32xf32, #tpu.memory_space<vmem>>, vector<2x32x32xf32>
    %45 = tpu.concatenate %42, %43, %44 in 2 : vector<2x32x32xf32>, vector<2x32x32xf32>, vector<2x32x32xf32> -> vector<2x32x96xf32>
    %c224 = arith.constant 224 : index
    %c0_57 = arith.constant 0 : index
    %46 = vector.load %arg2[%c224, %c0_57] : memref<960x32xbf16, #tpu.memory_space<vmem>>, vector<96x32xbf16>
    %c2 = arith.constant 2 : index
    %c0_58 = arith.constant 0 : index
    %47 = vector.load %arg3[%c2, %c0_58] : memref<12x32xf32, #tpu.memory_space<vmem>>, vector<1x32xf32>
    %48 = vector.shape_cast %45 : vector<2x32x96xf32> to vector<64x96xf32>
    %49 = arith.truncf %48 : vector<64x96xf32> to vector<64x96xbf16>
    %cst_59 = arith.constant dense<0.000000e+00> : vector<64x32xf32>
    %50 = tpu.matmul %49, %46, %cst_59 {dimension_numbers = #tpu.dot_dimension_numbers<[1], [0], [0], [1], [0, 0, 1, 1], [], []>} : vector<64x96xbf16>, vector<96x32xbf16>, vector<64x32xf32> -> vector<64x32xf32>
    %51 = vector.broadcast %47 : vector<1x32xf32> to vector<64x32xf32>
    %52 = arith.addf %50, %51 : vector<64x32xf32>
    %53 = vector.shape_cast %52 : vector<64x32xf32> to vector<2x32x32xf32>
    %cst_60 = arith.constant 0.000000e+00 : f32
    %54 = vector.broadcast %cst_60 : f32 to vector<2x32x32xf32>
    %55 = arith.maximumf %53, %54 : vector<2x32x32xf32>
    %c320 = arith.constant 320 : index
    %c0_61 = arith.constant 0 : index
    %56 = vector.load %arg2[%c320, %c0_61] : memref<960x32xbf16, #tpu.memory_space<vmem>>, vector<32x32xbf16>
    %c3 = arith.constant 3 : index
    %c0_62 = arith.constant 0 : index
    %57 = vector.load %arg3[%c3, %c0_62] : memref<12x32xf32, #tpu.memory_space<vmem>>, vector<1x32xf32>
    %58 = vector.shape_cast %55 : vector<2x32x32xf32> to vector<64x32xf32>
    %59 = arith.truncf %58 : vector<64x32xf32> to vector<64x32xbf16>
    %cst_63 = arith.constant dense<0.000000e+00> : vector<64x32xf32>
    %60 = tpu.matmul %59, %56, %cst_63 {dimension_numbers = #tpu.dot_dimension_numbers<[1], [0], [0], [1], [0, 0, 1, 1], [], []>} : vector<64x32xbf16>, vector<32x32xbf16>, vector<64x32xf32> -> vector<64x32xf32>
    %61 = vector.broadcast %57 : vector<1x32xf32> to vector<64x32xf32>
    %62 = arith.addf %60, %61 : vector<64x32xf32>
    %63 = vector.shape_cast %62 : vector<64x32xf32> to vector<2x32x32xf32>
    %64 = arith.addf %63, %36 : vector<2x32x32xf32>
    %cst_64 = arith.constant 0.000000e+00 : f32
    %65 = vector.broadcast %cst_64 : f32 to vector<2x32x32xf32>
    %66 = arith.maximumf %64, %65 : vector<2x32x32xf32>
    %cst_65 = arith.constant 0.000000e+00 : f32
    %67 = vector.broadcast %cst_65 : f32 to vector<2x80x32xf32>
    %c0_66 = arith.constant 0 : index
    %c0_67 = arith.constant 0 : index
    %c0_68 = arith.constant 0 : index
    %68 = vector.load %arg5[%c0_66, %c0_67, %c0_68] : memref<2x80x32xf32, #tpu.memory_space<vmem>>, vector<2x80x32xf32>
    tpu.vector_store %arg5[%c0_66, %c0_67, %c0_68], %67 {strides = array<i32>} : memref<2x80x32xf32, #tpu.memory_space<vmem>>, vector<2x80x32xf32>,
    %c0_69 = arith.constant 0 : index
    %c8_70 = arith.constant 8 : index
    %c0_71 = arith.constant 0 : index
    %69 = vector.load %arg5[%c0_69, %c8_70, %c0_71] : memref<2x80x32xf32, #tpu.memory_space<vmem>>, vector<2x32x32xf32>
    tpu.vector_store %arg5[%c0_69, %c8_70, %c0_71], %66 {strides = array<i32>} : memref<2x80x32xf32, #tpu.memory_space<vmem>>, vector<2x32x32xf32>,
    %c0_72 = arith.constant 0 : index
    %c7_73 = arith.constant 7 : index
    %c0_74 = arith.constant 0 : index
    %70 = vector.load %arg5[%c0_72, %c7_73, %c0_74] : memref<2x80x32xf32, #tpu.memory_space<vmem>>, vector<2x32x32xf32>
    %c0_75 = arith.constant 0 : index
    %c8_76 = arith.constant 8 : index
    %c0_77 = arith.constant 0 : index
    %71 = vector.load %arg5[%c0_75, %c8_76, %c0_77] : memref<2x80x32xf32, #tpu.memory_space<vmem>>, vector<2x32x32xf32>
    %c0_78 = arith.constant 0 : index
    %c9_79 = arith.constant 9 : index
    %c0_80 = arith.constant 0 : index
    %72 = vector.load %arg5[%c0_78, %c9_79, %c0_80] : memref<2x80x32xf32, #tpu.memory_space<vmem>>, vector<2x32x32xf32>
    %73 = tpu.concatenate %70, %71, %72 in 2 : vector<2x32x32xf32>, vector<2x32x32xf32>, vector<2x32x32xf32> -> vector<2x32x96xf32>
    %c352 = arith.constant 352 : index
    %c0_81 = arith.constant 0 : index
    %74 = vector.load %arg2[%c352, %c0_81] : memref<960x32xbf16, #tpu.memory_space<vmem>>, vector<96x32xbf16>
    %c4 = arith.constant 4 : index
    %c0_82 = arith.constant 0 : index
    %75 = vector.load %arg3[%c4, %c0_82] : memref<12x32xf32, #tpu.memory_space<vmem>>, vector<1x32xf32>
    %76 = vector.shape_cast %73 : vector<2x32x96xf32> to vector<64x96xf32>
    %77 = arith.truncf %76 : vector<64x96xf32> to vector<64x96xbf16>
    %cst_83 = arith.constant dense<0.000000e+00> : vector<64x32xf32>
    %78 = tpu.matmul %77, %74, %cst_83 {dimension_numbers = #tpu.dot_dimension_numbers<[1], [0], [0], [1], [0, 0, 1, 1], [], []>} : vector<64x96xbf16>, vector<96x32xbf16>, vector<64x32xf32> -> vector<64x32xf32>
    %79 = vector.broadcast %75 : vector<1x32xf32> to vector<64x32xf32>
    %80 = arith.addf %78, %79 : vector<64x32xf32>
    %81 = vector.shape_cast %80 : vector<64x32xf32> to vector<2x32x32xf32>
    %cst_84 = arith.constant 0.000000e+00 : f32
    %82 = vector.broadcast %cst_84 : f32 to vector<2x32x32xf32>
    %83 = arith.maximumf %81, %82 : vector<2x32x32xf32>
    %c448 = arith.constant 448 : index
    %c0_85 = arith.constant 0 : index
    %84 = vector.load %arg2[%c448, %c0_85] : memref<960x32xbf16, #tpu.memory_space<vmem>>, vector<32x32xbf16>
    %c5_86 = arith.constant 5 : index
    %c0_87 = arith.constant 0 : index
    %85 = vector.load %arg3[%c5_86, %c0_87] : memref<12x32xf32, #tpu.memory_space<vmem>>, vector<1x32xf32>
    %86 = vector.shape_cast %83 : vector<2x32x32xf32> to vector<64x32xf32>
    %87 = arith.truncf %86 : vector<64x32xf32> to vector<64x32xbf16>
    %cst_88 = arith.constant dense<0.000000e+00> : vector<64x32xf32>
    %88 = tpu.matmul %87, %84, %cst_88 {dimension_numbers = #tpu.dot_dimension_numbers<[1], [0], [0], [1], [0, 0, 1, 1], [], []>} : vector<64x32xbf16>, vector<32x32xbf16>, vector<64x32xf32> -> vector<64x32xf32>
    %89 = vector.broadcast %85 : vector<1x32xf32> to vector<64x32xf32>
    %90 = arith.addf %88, %89 : vector<64x32xf32>
    %91 = vector.shape_cast %90 : vector<64x32xf32> to vector<2x32x32xf32>
    %92 = arith.addf %91, %64 : vector<2x32x32xf32>
    %cst_89 = arith.constant 0.000000e+00 : f32
    %93 = vector.broadcast %cst_89 : f32 to vector<2x80x32xf32>
    %c0_90 = arith.constant 0 : index
    %c0_91 = arith.constant 0 : index
    %c0_92 = arith.constant 0 : index
    %94 = vector.load %arg5[%c0_90, %c0_91, %c0_92] : memref<2x80x32xf32, #tpu.memory_space<vmem>>, vector<2x80x32xf32>
    tpu.vector_store %arg5[%c0_90, %c0_91, %c0_92], %93 {strides = array<i32>} : memref<2x80x32xf32, #tpu.memory_space<vmem>>, vector<2x80x32xf32>,
    %c0_93 = arith.constant 0 : index
    %c8_94 = arith.constant 8 : index
    %c0_95 = arith.constant 0 : index
    %95 = vector.load %arg5[%c0_93, %c8_94, %c0_95] : memref<2x80x32xf32, #tpu.memory_space<vmem>>, vector<2x32x32xf32>
    tpu.vector_store %arg5[%c0_93, %c8_94, %c0_95], %92 {strides = array<i32>} : memref<2x80x32xf32, #tpu.memory_space<vmem>>, vector<2x32x32xf32>,
    %c0_96 = arith.constant 0 : index
    %c7_97 = arith.constant 7 : index
    %c0_98 = arith.constant 0 : index
    %96 = tpu.strided_load %arg5[%c0_96, %c7_97, %c0_98] {strides = array<i32: 1, 2, 1>} : memref<2x80x32xf32, #tpu.memory_space<vmem>>, vector<2x16x32xf32>
    %c0_99 = arith.constant 0 : index
    %c8_100 = arith.constant 8 : index
    %c0_101 = arith.constant 0 : index
    %97 = tpu.strided_load %arg5[%c0_99, %c8_100, %c0_101] {strides = array<i32: 1, 2, 1>} : memref<2x80x32xf32, #tpu.memory_space<vmem>>, vector<2x16x32xf32>
    %c0_102 = arith.constant 0 : index
    %c9_103 = arith.constant 9 : index
    %c0_104 = arith.constant 0 : index
    %98 = tpu.strided_load %arg5[%c0_102, %c9_103, %c0_104] {strides = array<i32: 1, 2, 1>} : memref<2x80x32xf32, #tpu.memory_space<vmem>>, vector<2x16x32xf32>
    %c0_105 = arith.constant 0 : index
    %c10_106 = arith.constant 10 : index
    %c0_107 = arith.constant 0 : index
    %99 = tpu.strided_load %arg5[%c0_105, %c10_106, %c0_107] {strides = array<i32: 1, 2, 1>} : memref<2x80x32xf32, #tpu.memory_space<vmem>>, vector<2x16x32xf32>
    %100 = tpu.concatenate %96, %97, %98, %99 in 2 : vector<2x16x32xf32>, vector<2x16x32xf32>, vector<2x16x32xf32>, vector<2x16x32xf32> -> vector<2x16x128xf32>
    %c480 = arith.constant 480 : index
    %c0_108 = arith.constant 0 : index
    %101 = vector.load %arg2[%c480, %c0_108] : memref<960x32xbf16, #tpu.memory_space<vmem>>, vector<128x32xbf16>
    %c6 = arith.constant 6 : index
    %c0_109 = arith.constant 0 : index
    %102 = vector.load %arg3[%c6, %c0_109] : memref<12x32xf32, #tpu.memory_space<vmem>>, vector<1x32xf32>
    %103 = vector.shape_cast %100 : vector<2x16x128xf32> to vector<32x128xf32>
    %104 = arith.truncf %103 : vector<32x128xf32> to vector<32x128xbf16>
    %cst_110 = arith.constant dense<0.000000e+00> : vector<32x32xf32>
    %105 = tpu.matmul %104, %101, %cst_110 {dimension_numbers = #tpu.dot_dimension_numbers<[1], [0], [0], [1], [0, 0, 1, 1], [], []>} : vector<32x128xbf16>, vector<128x32xbf16>, vector<32x32xf32> -> vector<32x32xf32>
    %106 = vector.broadcast %102 : vector<1x32xf32> to vector<32x32xf32>
    %107 = arith.addf %105, %106 : vector<32x32xf32>
    %108 = vector.shape_cast %107 : vector<32x32xf32> to vector<2x16x32xf32>
    %cst_111 = arith.constant 0.000000e+00 : f32
    %109 = vector.broadcast %cst_111 : f32 to vector<2x16x32xf32>
    %110 = arith.maximumf %108, %109 : vector<2x16x32xf32>
    %cst_112 = arith.constant 0.000000e+00 : f32
    %111 = vector.broadcast %cst_112 : f32 to vector<2x80x32xf32>
    %c0_113 = arith.constant 0 : index
    %c0_114 = arith.constant 0 : index
    %c0_115 = arith.constant 0 : index
    %112 = vector.load %arg5[%c0_113, %c0_114, %c0_115] : memref<2x80x32xf32, #tpu.memory_space<vmem>>, vector<2x80x32xf32>
    tpu.vector_store %arg5[%c0_113, %c0_114, %c0_115], %111 {strides = array<i32>} : memref<2x80x32xf32, #tpu.memory_space<vmem>>, vector<2x80x32xf32>,
    %c0_116 = arith.constant 0 : index
    %c8_117 = arith.constant 8 : index
    %c0_118 = arith.constant 0 : index
    %113 = vector.load %arg5[%c0_116, %c8_117, %c0_118] : memref<2x80x32xf32, #tpu.memory_space<vmem>>, vector<2x16x32xf32>
    tpu.vector_store %arg5[%c0_116, %c8_117, %c0_118], %110 {strides = array<i32>} : memref<2x80x32xf32, #tpu.memory_space<vmem>>, vector<2x16x32xf32>,
    %c0_119 = arith.constant 0 : index
    %c5_120 = arith.constant 5 : index
    %c0_121 = arith.constant 0 : index
    %114 = vector.load %arg5[%c0_119, %c5_120, %c0_121] : memref<2x80x32xf32, #tpu.memory_space<vmem>>, vector<2x16x32xf32>
    %c0_122 = arith.constant 0 : index
    %c8_123 = arith.constant 8 : index
    %c0_124 = arith.constant 0 : index
    %115 = vector.load %arg5[%c0_122, %c8_123, %c0_124] : memref<2x80x32xf32, #tpu.memory_space<vmem>>, vector<2x16x32xf32>
    %c0_125 = arith.constant 0 : index
    %c11_126 = arith.constant 11 : index
    %c0_127 = arith.constant 0 : index
    %116 = vector.load %arg5[%c0_125, %c11_126, %c0_127] : memref<2x80x32xf32, #tpu.memory_space<vmem>>, vector<2x16x32xf32>
    %117 = tpu.concatenate %114, %115, %116 in 2 : vector<2x16x32xf32>, vector<2x16x32xf32>, vector<2x16x32xf32> -> vector<2x16x96xf32>
    %c608 = arith.constant 608 : index
    %c0_128 = arith.constant 0 : index
    %118 = vector.load %arg2[%c608, %c0_128] : memref<960x32xbf16, #tpu.memory_space<vmem>>, vector<96x32xbf16>
    %c7_129 = arith.constant 7 : index
    %c0_130 = arith.constant 0 : index
    %119 = vector.load %arg3[%c7_129, %c0_130] : memref<12x32xf32, #tpu.memory_space<vmem>>, vector<1x32xf32>
    %120 = vector.shape_cast %117 : vector<2x16x96xf32> to vector<32x96xf32>
    %121 = arith.truncf %120 : vector<32x96xf32> to vector<32x96xbf16>
    %cst_131 = arith.constant dense<0.000000e+00> : vector<32x32xf32>
    %122 = tpu.matmul %121, %118, %cst_131 {dimension_numbers = #tpu.dot_dimension_numbers<[1], [0], [0], [1], [0, 0, 1, 1], [], []>} : vector<32x96xbf16>, vector<96x32xbf16>, vector<32x32xf32> -> vector<32x32xf32>
    %123 = vector.broadcast %119 : vector<1x32xf32> to vector<32x32xf32>
    %124 = arith.addf %122, %123 : vector<32x32xf32>
    %125 = vector.shape_cast %124 : vector<32x32xf32> to vector<2x16x32xf32>
    %cst_132 = arith.constant 0.000000e+00 : f32
    %126 = vector.broadcast %cst_132 : f32 to vector<2x16x32xf32>
    %127 = arith.maximumf %125, %126 : vector<2x16x32xf32>
    %c704 = arith.constant 704 : index
    %c0_133 = arith.constant 0 : index
    %128 = vector.load %arg2[%c704, %c0_133] : memref<960x32xbf16, #tpu.memory_space<vmem>>, vector<32x32xbf16>
    %c8_134 = arith.constant 8 : index
    %c0_135 = arith.constant 0 : index
    %129 = vector.load %arg3[%c8_134, %c0_135] : memref<12x32xf32, #tpu.memory_space<vmem>>, vector<1x32xf32>
    %130 = vector.shape_cast %127 : vector<2x16x32xf32> to vector<32x32xf32>
    %131 = arith.truncf %130 : vector<32x32xf32> to vector<32x32xbf16>
    %cst_136 = arith.constant dense<0.000000e+00> : vector<32x32xf32>
    %132 = tpu.matmul %131, %128, %cst_136 {dimension_numbers = #tpu.dot_dimension_numbers<[1], [0], [0], [1], [0, 0, 1, 1], [], []>} : vector<32x32xbf16>, vector<32x32xbf16>, vector<32x32xf32> -> vector<32x32xf32>
    %133 = vector.broadcast %129 : vector<1x32xf32> to vector<32x32xf32>
    %134 = arith.addf %132, %133 : vector<32x32xf32>
    %135 = vector.shape_cast %134 : vector<32x32xf32> to vector<2x16x32xf32>
    %136 = arith.addf %135, %108 : vector<2x16x32xf32>
    %cst_137 = arith.constant 0.000000e+00 : f32
    %137 = vector.broadcast %cst_137 : f32 to vector<2x16x32xf32>
    %138 = arith.maximumf %136, %137 : vector<2x16x32xf32>
    %cst_138 = arith.constant 0.000000e+00 : f32
    %139 = vector.broadcast %cst_138 : f32 to vector<2x80x32xf32>
    %c0_139 = arith.constant 0 : index
    %c0_140 = arith.constant 0 : index
    %c0_141 = arith.constant 0 : index
    %140 = vector.load %arg5[%c0_139, %c0_140, %c0_141] : memref<2x80x32xf32, #tpu.memory_space<vmem>>, vector<2x80x32xf32>
    tpu.vector_store %arg5[%c0_139, %c0_140, %c0_141], %139 {strides = array<i32>} : memref<2x80x32xf32, #tpu.memory_space<vmem>>, vector<2x80x32xf32>,
    %c0_142 = arith.constant 0 : index
    %c8_143 = arith.constant 8 : index
    %c0_144 = arith.constant 0 : index
    %141 = vector.load %arg5[%c0_142, %c8_143, %c0_144] : memref<2x80x32xf32, #tpu.memory_space<vmem>>, vector<2x16x32xf32>
    tpu.vector_store %arg5[%c0_142, %c8_143, %c0_144], %138 {strides = array<i32>} : memref<2x80x32xf32, #tpu.memory_space<vmem>>, vector<2x16x32xf32>,
    %c0_145 = arith.constant 0 : index
    %c7_146 = arith.constant 7 : index
    %c0_147 = arith.constant 0 : index
    %142 = vector.load %arg5[%c0_145, %c7_146, %c0_147] : memref<2x80x32xf32, #tpu.memory_space<vmem>>, vector<2x16x32xf32>
    %c0_148 = arith.constant 0 : index
    %c8_149 = arith.constant 8 : index
    %c0_150 = arith.constant 0 : index
    %143 = vector.load %arg5[%c0_148, %c8_149, %c0_150] : memref<2x80x32xf32, #tpu.memory_space<vmem>>, vector<2x16x32xf32>
    %c0_151 = arith.constant 0 : index
    %c9_152 = arith.constant 9 : index
    %c0_153 = arith.constant 0 : index
    %144 = vector.load %arg5[%c0_151, %c9_152, %c0_153] : memref<2x80x32xf32, #tpu.memory_space<vmem>>, vector<2x16x32xf32>
    %145 = tpu.concatenate %142, %143, %144 in 2 : vector<2x16x32xf32>, vector<2x16x32xf32>, vector<2x16x32xf32> -> vector<2x16x96xf32>
    %c736 = arith.constant 736 : index
    %c0_154 = arith.constant 0 : index
    %146 = vector.load %arg2[%c736, %c0_154] : memref<960x32xbf16, #tpu.memory_space<vmem>>, vector<96x32xbf16>
    %c9_155 = arith.constant 9 : index
    %c0_156 = arith.constant 0 : index
    %147 = vector.load %arg3[%c9_155, %c0_156] : memref<12x32xf32, #tpu.memory_space<vmem>>, vector<1x32xf32>
    %148 = vector.shape_cast %145 : vector<2x16x96xf32> to vector<32x96xf32>
    %149 = arith.truncf %148 : vector<32x96xf32> to vector<32x96xbf16>
    %cst_157 = arith.constant dense<0.000000e+00> : vector<32x32xf32>
    %150 = tpu.matmul %149, %146, %cst_157 {dimension_numbers = #tpu.dot_dimension_numbers<[1], [0], [0], [1], [0, 0, 1, 1], [], []>} : vector<32x96xbf16>, vector<96x32xbf16>, vector<32x32xf32> -> vector<32x32xf32>
    %151 = vector.broadcast %147 : vector<1x32xf32> to vector<32x32xf32>
    %152 = arith.addf %150, %151 : vector<32x32xf32>
    %153 = vector.shape_cast %152 : vector<32x32xf32> to vector<2x16x32xf32>
    %cst_158 = arith.constant 0.000000e+00 : f32
    %154 = vector.broadcast %cst_158 : f32 to vector<2x16x32xf32>
    %155 = arith.maximumf %153, %154 : vector<2x16x32xf32>
    %c832 = arith.constant 832 : index
    %c0_159 = arith.constant 0 : index
    %156 = vector.load %arg2[%c832, %c0_159] : memref<960x32xbf16, #tpu.memory_space<vmem>>, vector<32x32xbf16>
    %c10_160 = arith.constant 10 : index
    %c0_161 = arith.constant 0 : index
    %157 = vector.load %arg3[%c10_160, %c0_161] : memref<12x32xf32, #tpu.memory_space<vmem>>, vector<1x32xf32>
    %158 = vector.shape_cast %155 : vector<2x16x32xf32> to vector<32x32xf32>
    %159 = arith.truncf %158 : vector<32x32xf32> to vector<32x32xbf16>
    %cst_162 = arith.constant dense<0.000000e+00> : vector<32x32xf32>
    %160 = tpu.matmul %159, %156, %cst_162 {dimension_numbers = #tpu.dot_dimension_numbers<[1], [0], [0], [1], [0, 0, 1, 1], [], []>} : vector<32x32xbf16>, vector<32x32xbf16>, vector<32x32xf32> -> vector<32x32xf32>
    %161 = vector.broadcast %157 : vector<1x32xf32> to vector<32x32xf32>
    %162 = arith.addf %160, %161 : vector<32x32xf32>
    %163 = vector.shape_cast %162 : vector<32x32xf32> to vector<2x16x32xf32>
    %164 = arith.addf %163, %136 : vector<2x16x32xf32>
    %cst_163 = arith.constant 0.000000e+00 : f32
    %165 = vector.broadcast %cst_163 : f32 to vector<2x80x32xf32>
    %c0_164 = arith.constant 0 : index
    %c0_165 = arith.constant 0 : index
    %c0_166 = arith.constant 0 : index
    %166 = vector.load %arg5[%c0_164, %c0_165, %c0_166] : memref<2x80x32xf32, #tpu.memory_space<vmem>>, vector<2x80x32xf32>
    tpu.vector_store %arg5[%c0_164, %c0_165, %c0_166], %165 {strides = array<i32>} : memref<2x80x32xf32, #tpu.memory_space<vmem>>, vector<2x80x32xf32>,
    %c0_167 = arith.constant 0 : index
    %c8_168 = arith.constant 8 : index
    %c0_169 = arith.constant 0 : index
    %167 = vector.load %arg5[%c0_167, %c8_168, %c0_169] : memref<2x80x32xf32, #tpu.memory_space<vmem>>, vector<2x16x32xf32>
    tpu.vector_store %arg5[%c0_167, %c8_168, %c0_169], %164 {strides = array<i32>} : memref<2x80x32xf32, #tpu.memory_space<vmem>>, vector<2x16x32xf32>,
    %c0_170 = arith.constant 0 : index
    %c7_171 = arith.constant 7 : index
    %c0_172 = arith.constant 0 : index
    %168 = vector.load %arg5[%c0_170, %c7_171, %c0_172] : memref<2x80x32xf32, #tpu.memory_space<vmem>>, vector<2x16x32xf32>
    %c0_173 = arith.constant 0 : index
    %c8_174 = arith.constant 8 : index
    %c0_175 = arith.constant 0 : index
    %169 = vector.load %arg5[%c0_173, %c8_174, %c0_175] : memref<2x80x32xf32, #tpu.memory_space<vmem>>, vector<2x16x32xf32>
    %c0_176 = arith.constant 0 : index
    %c9_177 = arith.constant 9 : index
    %c0_178 = arith.constant 0 : index
    %170 = vector.load %arg5[%c0_176, %c9_177, %c0_178] : memref<2x80x32xf32, #tpu.memory_space<vmem>>, vector<2x16x32xf32>
    %171 = tpu.concatenate %168, %169, %170 in 2 : vector<2x16x32xf32>, vector<2x16x32xf32>, vector<2x16x32xf32> -> vector<2x16x96xf32>
    %c864 = arith.constant 864 : index
    %c0_179 = arith.constant 0 : index
    %172 = vector.load %arg2[%c864, %c0_179] : memref<960x32xbf16, #tpu.memory_space<vmem>>, vector<96x32xbf16>
    %c11_180 = arith.constant 11 : index
    %c0_181 = arith.constant 0 : index
    %173 = vector.load %arg3[%c11_180, %c0_181] : memref<12x32xf32, #tpu.memory_space<vmem>>, vector<1x32xf32>
    %174 = vector.shape_cast %171 : vector<2x16x96xf32> to vector<32x96xf32>
    %175 = arith.truncf %174 : vector<32x96xf32> to vector<32x96xbf16>
    %cst_182 = arith.constant dense<0.000000e+00> : vector<32x32xf32>
    %176 = tpu.matmul %175, %172, %cst_182 {dimension_numbers = #tpu.dot_dimension_numbers<[1], [0], [0], [1], [0, 0, 1, 1], [], []>} : vector<32x96xbf16>, vector<96x32xbf16>, vector<32x32xf32> -> vector<32x32xf32>
    %177 = vector.broadcast %173 : vector<1x32xf32> to vector<32x32xf32>
    %178 = arith.addf %176, %177 : vector<32x32xf32>
    %179 = vector.shape_cast %178 : vector<32x32xf32> to vector<2x16x32xf32>
    %180 = tpu.transpose %179, [0, 2, 1] : vector<2x16x32xf32> -> vector<2x32x16xf32>
    %c0_183 = arith.constant 0 : index
    %c0_184 = arith.constant 0 : index
    %c0_185 = arith.constant 0 : index
    %181 = vector.load %arg4[%c0_183, %c0_184, %c0_185] : memref<2x32x16xf32, #tpu.memory_space<vmem>>, vector<2x32x16xf32>
    tpu.vector_store %arg4[%c0_183, %c0_184, %c0_185], %180 {strides = array<i32>} : memref<2x32x16xf32, #tpu.memory_space<vmem>>, vector<2x32x16xf32>,
    return
  }
  func.func @transform_0(%arg0: i32) -> (i32, i32, i32) {
    %c0_i32 = arith.constant 0 : i32
    %c0_i32_0 = arith.constant 0 : i32
    %c0_i32_1 = arith.constant 0 : i32
    return %arg0, %c0_i32, %c0_i32_0 : i32, i32, i32
  }
  func.func @transform_1(%arg0: i32) -> (i32, i32) {
    %c0_i32 = arith.constant 0 : i32
    %c0_i32_0 = arith.constant 0 : i32
    %c0_i32_1 = arith.constant 0 : i32
    return %c0_i32, %c0_i32_0 : i32, i32
  }
  func.func @transform_2(%arg0: i32) -> (i32, i32) {
    %c0_i32 = arith.constant 0 : i32
    %c0_i32_0 = arith.constant 0 : i32
    %c0_i32_1 = arith.constant 0 : i32
    return %c0_i32, %c0_i32_0 : i32, i32
  }
  func.func @transform_3(%arg0: i32) -> (i32, i32, i32) {
    %c0_i32 = arith.constant 0 : i32
    %c0_i32_0 = arith.constant 0 : i32
    %c0_i32_1 = arith.constant 0 : i32
    return %arg0, %c0_i32, %c0_i32_0 : i32, i32, i32
  }
}

</mosaic_0001>

<bundles_post_ra>
// kernel: tpu_custom_call.1
= control target key start
LH: loop header
LB: loop body
LE: loop exit
PB: predicated region body
PF: predicated region fallthrough
CT: control target
= control target key end

     0   :  { %vm17_vm0 = vcmask 1043456   ;;  %vm84_vm1 = vcmask 261120   ;;  %v3490_v1 = vmov 0.0   ;;  %s3492_s28 = smov 64   ;;  %vm313_vm2 = vcmask 523264   ;;  %s3493_s18 = smov 96   ;;  %s4658_s0 = inlined_call_operand.vmem [shape: f32[2,4,64], index: 0, kind: input, shape index: {}]   ;;  %s4659_s1 = inlined_call_operand.vmem [shape: bf16[960,32], index: 1, kind: input, shape index: {}]   ;;  %s4660_s2 = inlined_call_operand.vmem [shape: f32[12,32], index: 2, kind: input, shape index: {}]   ;;  %s4661_s3 = inlined_call_operand.vmem [shape: f32[2,32,16], index: 3, kind: output, shape index: {}]  }
   0x1   :  { %v15_v0 = vld [vmem:[%s4658_s0] sm:$0xf]  ;;  %85 = vst.msk [vmem:[#allocation2] sm:$0xff] %vm84_vm1, %v3490_v1  ;;  %86 = vst.msk [vmem:[#allocation2 + $0x8] sm:$0xff] %vm84_vm1, %v3490_v1  ;;  %v16_v3 = vld [vmem:[%s4658_s0 + $0x4] sm:$0xf] }
   0x2   :  { %87 = vst.msk [vmem:[#allocation2 + $0x10] sm:$0xff] %vm84_vm1, %v3490_v1  ;;  %88 = vst.msk [vmem:[#allocation2 + $0x18] sm:$0xff] %vm84_vm1, %v3490_v1  ;;  %v18_v2 = vsel %vm17_vm0, %v15_v0, 0.0  ;;  %v19_v4 = vsel %vm17_vm0, %v16_v3, 0.0  ;;  %v3430_v6 = vld [vmem:[%s4659_s1] sm:$0xff]   ;;  %s3491_s0 = smov 32  }
   0x3   :  { %89 = vst.msk [vmem:[#allocation2 + $0x20] sm:$0xff] %vm84_vm1, %v3490_v1  ;;  %90 = vst.msk [vmem:[#allocation2 + $0x28] sm:$0xff] %vm84_vm1, %v3490_v1  ;;  %20 = vxpose.xlu0.b32.start.end [1/1] (short) (narrow) %v18_v2, 64  ;;  %2916 = vmatprep.subr.bf16.mxu0 %v3430_v6  ;;  %v3431_v36 = vld [vmem:[%s4659_s1 + $0x8] sm:$0xff]   ;;  %v3432_v42 = vld [vmem:[%s4659_s1 + $0x10] sm:$0xff]   ;;  %vm391_vm3 = vcmask 785408  }
   0x4   :  { %91 = vst.msk [vmem:[#allocation2 + $0x30] sm:$0xff] %vm84_vm1, %v3490_v1  ;;  %92 = vst.msk [vmem:[#allocation2 + $0x38] sm:$0xff] %vm84_vm1, %v3490_v1  ;;  %2917 = vmatpush3.bf16.msra.mxu0 %v3430_v6  ;;  %v3433_v45 = vld [vmem:[%s4659_s1 + $0x18] sm:$0xff]   ;;  %v3434_v52 = vld [vmem:[%s4659_s1 + $0x20] sm:$0xff]   ;;  %vm2697_vm4 = vcmask 130048  }
   0x5   :  { %93 = vst.msk [vmem:[#allocation2 + $0x40] sm:$0xff] %vm84_vm1, %v3490_v1  ;;  %94 = vst.msk [vmem:[#allocation2 + $0x48] sm:$0xff] %vm84_vm1, %v3490_v1  ;;  %2918 = vmatprep.subr.bf16.mxu0 %v3431_v36  ;;  %v3435_v58 = vld [vmem:[%s4659_s1 + $0x28] sm:$0xff]  }
   0x6   :  { %95 = vst.msk [vmem:[#allocation2 + $0x50] sm:$0xff] %vm84_vm1, %v3490_v1  ;;  %96 = vst.msk [vmem:[#allocation2 + $0x58] sm:$0xff] %vm84_vm1, %v3490_v1 }
   0x7   :  { %97 = vst.msk [vmem:[#allocation2 + $0x60] sm:$0xff] %vm84_vm1, %v3490_v1  ;;  %98 = vst.msk [vmem:[#allocation2 + $0x68] sm:$0xff] %vm84_vm1, %v3490_v1 }
   0x8   :  { %99 = vst.msk [vmem:[#allocation2 + $0x70] sm:$0xff] %vm84_vm1, %v3490_v1  ;;  %100 = vst.msk [vmem:[#allocation2 + $0x78] sm:$0xff] %vm84_vm1, %v3490_v1  ;;  %2919 = vmatpush3.bf16.msra.mxu0 %v3431_v36 }
   0x9   :  { %101 = vst.msk [vmem:[#allocation2 + $0x80] sm:$0xff] %vm84_vm1, %v3490_v1  ;;  %102 = vst.msk [vmem:[#allocation2 + $0x88] sm:$0xff] %vm84_vm1, %v3490_v1  ;;  %2920 = vmatprep.subr.bf16.mxu0 %v3432_v42 }
   0xa   :  { %103 = vst.msk [vmem:[#allocation2 + $0x90] sm:$0xff] %vm84_vm1, %v3490_v1  ;;  %104 = vst.msk [vmem:[#allocation2 + $0x98] sm:$0xff] %vm84_vm1, %v3490_v1 }
   0xc   :  { %2921 = vmatpush3.bf16.msra.mxu0 %v3432_v42 }
   0xd   :  { %2922 = vmatprep.subr.bf16.mxu0 %v3433_v45 }
  0x10   :  { %2923 = vmatpush3.bf16.msra.mxu0 %v3433_v45 }
  0x11   :  { %2924 = vmatprep.subr.bf16.mxu0 %v3434_v52 }
  0x14   :  { %2925 = vmatpush3.bf16.msra.mxu0 %v3434_v52 }
  0x15   :  { %2926 = vmatprep.subr.bf16.mxu0 %v3435_v58 }
  0x18   :  { %2927 = vmatpush3.bf16.msra.mxu0 %v3435_v58 }
  0x20   :  { %52 = vxpose.xlu0.b32.start.end [1/1] (short) (narrow) %v19_v4, 64 }
  0x83   :  { %v36_v5 = vpop.trf.xlu0 }
  0x84   :  { %105 = vst.msk [vmem:[#allocation2 + $0x8] sm:$0xff] %vm84_vm1, %v36_v5 }
  0x87   :  { %v37_v7 = vpop.trf.xlu0 }
  0x88   :  { %106 = vst.msk [vmem:[#allocation2 + $0x10] sm:$0xff] %vm84_vm1, %v37_v7 }
  0x8b   :  { %v3567_v8 = vld [vmem:[#allocation2 + $0x7] sm:$0xff]  ;;  %v38_v9 = vpop.trf.xlu0 }
  0x8c   :  { %529 = vst.msk [vmem:[#allocation2] sm:$0xff] %vm84_vm1, %v3490_v1  ;;  %107 = vst.msk [vmem:[#allocation2 + $0x18] sm:$0xff] %vm84_vm1, %v38_v9  ;;  %v137_v10 = vld [vmem:[#allocation2 + $0x8] sm:$0xff] }
  0x8f   :  { %v3572_v11 = vld [vmem:[#allocation2 + $0xf] sm:$0xff]  ;;  %v39_v13 = vpop.trf.xlu0 }
  0x90   :  { %v3574_v12 = vld [vmem:[#allocation2 + $0x9] sm:$0xff]  ;;  %108 = vst.msk [vmem:[#allocation2 + $0x20] sm:$0xff] %vm84_vm1, %v39_v13 }
  0x91   :  { %v138_v14 = vld [vmem:[#allocation2 + $0x10] sm:$0xff]  ;;  %530 = vst.msk [vmem:[#allocation2 + $0x8] sm:$0xff] %vm84_vm1, %v3490_v1 }
  0x92   :  { %v3120_v15 = vpack.i.bf16 %v138_v14, %v137_v10 }
  0x93   :  { %v3580_v16 = vld [vmem:[#allocation2 + $0x17] sm:$0xff]  ;;  %v40_v18 = vpop.trf.xlu0 }
  0x94   :  { %3121 = vrot.lane.b32.xlu1 %v3120_v15, %s3491_s0  ;;  %v3582_v17 = vld [vmem:[#allocation2 + $0x11] sm:$0xff]  ;;  %109 = vst.msk [vmem:[#allocation2 + $0x28] sm:$0xff] %vm84_vm1, %v40_v18 }
  0x95   :  { %531 = vst.msk [vmem:[#allocation2 + $0x10] sm:$0xff] %vm84_vm1, %v3490_v1  ;;  %v3591_v22 = vld [vmem:[#allocation2 + $0x18] sm:$0xff]  ;;  %v3130_v57 = vpack.i.bf16 %v3582_v17, %v3574_v12 }
  0x97   :  { %v3587_v19 = vld [vmem:[#allocation2 + $0x1f] sm:$0xff]  ;;  %v41_v21 = vpop.trf.xlu0 }
  0x98   :  { %v3589_v20 = vld [vmem:[#allocation2 + $0x19] sm:$0xff]  ;;  %110 = vst.msk [vmem:[#allocation2 + $0x30] sm:$0xff] %vm84_vm1, %v41_v21 }
  0x99   :  { %532 = vst.msk [vmem:[#allocation2 + $0x18] sm:$0xff] %vm84_vm1, %v3490_v1  ;;  %v3600_v26 = vld [vmem:[#allocation2 + $0x20] sm:$0xff] }
  0x9a   :  { %v3135_v63 = vpack.i.bf16 %v3600_v26, %v3591_v22 }
  0x9b   :  { %v3596_v23 = vld [vmem:[#allocation2 + $0x27] sm:$0xff]  ;;  %v42_v25 = vpop.trf.xlu0 }
  0x9c   :  { %v3598_v24 = vld [vmem:[#allocation2 + $0x21] sm:$0xff]  ;;  %111 = vst.msk [vmem:[#allocation2 + $0x38] sm:$0xff] %vm84_vm1, %v42_v25 }
  0x9d   :  { %533 = vst.msk [vmem:[#allocation2 + $0x20] sm:$0xff] %vm84_vm1, %v3490_v1  ;;  %v3609_v30 = vld [vmem:[#allocation2 + $0x28] sm:$0xff]  ;;  %v3150_v12 = vpack.i.bf16 %v3598_v24, %v3589_v20 }
  0x9f   :  { %v3605_v27 = vld [vmem:[#allocation2 + $0x2f] sm:$0xff]  ;;  %v43_v29 = vpop.trf.xlu0 }
  0xa0   :  { %v3607_v28 = vld [vmem:[#allocation2 + $0x29] sm:$0xff]  ;;  %112 = vst.msk [vmem:[#allocation2 + $0x40] sm:$0xff] %vm84_vm1, %v43_v29 }
  0xa1   :  { %534 = vst.msk [vmem:[#allocation2 + $0x28] sm:$0xff] %vm84_vm1, %v3490_v1  ;;  %v3618_v34 = vld [vmem:[#allocation2 + $0x30] sm:$0xff] }
  0xa2   :  { %v3160_v24 = vpack.i.bf16 %v3618_v34, %v3609_v30 }
  0xa3   :  { %v3614_v31 = vld [vmem:[#allocation2 + $0x37] sm:$0xff]  ;;  %v68_v33 = vpop.trf.xlu0 }
  0xa4   :  { %v3616_v32 = vld [vmem:[#allocation2 + $0x31] sm:$0xff]  ;;  %113 = vst.msk [vmem:[#allocation2 + $0x58] sm:$0xff] %vm84_vm1, %v68_v33 }
  0xa5   :  { %535 = vst.msk [vmem:[#allocation2 + $0x30] sm:$0xff] %vm84_vm1, %v3490_v1  ;;  %v3623_v35 = vld [vmem:[#allocation2 + $0x38] sm:$0xff]  ;;  %v3165_v26 = vpack.i.bf16 %v3616_v32, %v3607_v28 }
  0xa7   :  { %v3628_v37 = vld [vmem:[#allocation2 + $0x3f] sm:$0xff]  ;;  %v69_v40 = vpop.trf.xlu0 }
  0xa8   :  { %v3630_v38 = vld [vmem:[#allocation2 + $0x39] sm:$0xff]  ;;  %v3632_v39 = vld [vmem:[#allocation2 + $0x41] sm:$0xff]  ;;  %114 = vst.msk [vmem:[#allocation2 + $0x60] sm:$0xff] %vm84_vm1, %v69_v40 }
  0xa9   :  { %538 = vst.msk [vmem:[#allocation2 + $0x48] sm:$0xff] %vm84_vm1, %v3490_v1  ;;  %v3637_v41 = vld [vmem:[#allocation2 + $0x40] sm:$0xff]  ;;  %536 = vst.msk [vmem:[#allocation2 + $0x38] sm:$0xff] %vm84_vm1, %v3490_v1  ;;  %v3175_v30 = vpack.i.bf16 %v3632_v39, %v3630_v38 }
  0xaa   :  { %537 = vst.msk [vmem:[#allocation2 + $0x40] sm:$0xff] %vm84_vm1, %v3490_v1  ;;  %v3170_v29 = vpack.i.bf16 %v3637_v41, %v3623_v35 }
  0xab   :  { %v3646_v43 = vld [vmem:[#allocation2 + $0x57] sm:$0xff]  ;;  %v70_v44 = vpop.trf.xlu0 }
  0xac   :  { %539 = vst.msk [vmem:[#allocation2 + $0x50] sm:$0xff] %vm84_vm1, %v3490_v1  ;;  %115 = vst.msk [vmem:[#allocation2 + $0x68] sm:$0xff] %vm84_vm1, %v70_v44  ;;  %v145_v46 = vld [vmem:[#allocation2 + $0x58] sm:$0xff] }
  0xaf   :  { %v3654_v47 = vld [vmem:[#allocation2 + $0x5f] sm:$0xff]  ;;  %v71_v49 = vpop.trf.xlu0 }
  0xb0   :  { %v161_v48 = vld [vmem:[#allocation2 + $0x59] sm:$0xff]  ;;  %116 = vst.msk [vmem:[#allocation2 + $0x70] sm:$0xff] %vm84_vm1, %v71_v49 }
  0xb1   :  { %v146_v50 = vld [vmem:[#allocation2 + $0x60] sm:$0xff]  ;;  %540 = vst.msk [vmem:[#allocation2 + $0x58] sm:$0xff] %vm84_vm1, %v3490_v1 }
  0xb2   :  { %v3125_v51 = vpack.i.bf16 %v146_v50, %v145_v46 }
  0xb3   :  { %v3663_v53 = vld [vmem:[#allocation2 + $0x67] sm:$0xff]  ;;  %v72_v55 = vpop.trf.xlu0 }
  0xb4   :  { %3126 = vrot.lane.b32.xlu1 %v3125_v51, %s3491_s0  ;;  %v162_v54 = vld [vmem:[#allocation2 + $0x61] sm:$0xff]  ;;  %117 = vst.msk [vmem:[#allocation2 + $0x78] sm:$0xff] %vm84_vm1, %v72_v55 }
  0xb5   :  { %v147_v56 = vld [vmem:[#allocation2 + $0x68] sm:$0xff]  ;;  %541 = vst.msk [vmem:[#allocation2 + $0x60] sm:$0xff] %vm84_vm1, %v3490_v1  ;;  %v3145_v5 = vpack.i.bf16 %v162_v54, %v161_v48 }
  0xb7   :  { %v3674_v59 = vld [vmem:[#allocation2 + $0x6f] sm:$0xff]  ;;  %v73_v61 = vpop.trf.xlu0 }
  0xb8   :  { %3131 = vrot.lane.b32.xlu1 %v3130_v57, %s3492_s28  ;;  %v163_v60 = vld [vmem:[#allocation2 + $0x69] sm:$0xff]  ;;  %118 = vst.msk [vmem:[#allocation2 + $0x80] sm:$0xff] %vm84_vm1, %v73_v61 }
  0xb9   :  { %v148_v62 = vld [vmem:[#allocation2 + $0x70] sm:$0xff]  ;;  %542 = vst.msk [vmem:[#allocation2 + $0x68] sm:$0xff] %vm84_vm1, %v3490_v1 }
  0xba   :  { %v3140_v0 = vpack.i.bf16 %v148_v62, %v147_v56 }
  0xbb   :  { %v3683_v2 = vld [vmem:[#allocation2 + $0x77] sm:$0xff]  ;;  %v74_v4 = vpop.trf.xlu0 }
  0xbc   :  { %3136 = vrot.lane.b32.xlu1 %v3135_v63, %s3491_s0  ;;  %3141 = vrot.lane.b32.xlu0 %v3140_v0, %s3491_s0  ;;  %v164_v3 = vld [vmem:[#allocation2 + $0x71] sm:$0xff]  ;;  %119 = vst.msk [vmem:[#allocation2 + $0x88] sm:$0xff] %vm84_vm1, %v74_v4 }
  0xbd   :  { %543 = vst.msk [vmem:[#allocation2 + $0x70] sm:$0xff] %vm84_vm1, %v3490_v1  ;;  %v149_v10 = vld [vmem:[#allocation2 + $0x78] sm:$0xff]  ;;  %v3155_v17 = vpack.i.bf16 %v164_v3, %v163_v60 }
  0xbf   :  { %v3689_v6 = vld [vmem:[#allocation2 + $0x7f] sm:$0xff]  ;;  %v75_v9 = vpop.trf.xlu0 }
  0xc0   :  { %3146 = vrot.lane.b32.xlu1 %v3145_v5, %s3492_s28  ;;  %v165_v7 = vld [vmem:[#allocation2 + $0x79] sm:$0xff]  ;;  %120 = vst.msk [vmem:[#allocation2 + $0x90] sm:$0xff] %vm84_vm1, %v75_v9 }
  0xc1   :  { %544 = vst.msk [vmem:[#allocation2 + $0x78] sm:$0xff] %vm84_vm1, %v3490_v1  ;;  %v150_v15 = vld [vmem:[#allocation2 + $0x80] sm:$0xff] }
  0xc2   :  { %v3180_v33 = vpack.i.bf16 %v150_v15, %v149_v10 }
  0xc3   :  { %v3697_v13 = vld [vmem:[#allocation2 + $0x87] sm:$0xff] }
  0xc4   :  { %3151 = vrot.lane.b32.xlu1 %v3150_v12, %s3492_s28  ;;  %v166_v14 = vld [vmem:[#allocation2 + $0x81] sm:$0xff] }
  0xc5   :  { %545 = vst.msk [vmem:[#allocation2 + $0x80] sm:$0xff] %vm84_vm1, %v3490_v1  ;;  %v151_v18 = vld [vmem:[#allocation2 + $0x88] sm:$0xff]  ;;  %v3185_v34 = vpack.i.bf16 %v166_v14, %v165_v7 }
  0xc7   :  { %v3702_v21 = vld [vmem:[#allocation2 + $0x8f] sm:$0xff] }
  0xc8   :  { %3156 = vrot.lane.b32.xlu1 %v3155_v17, %s3492_s28  ;;  %v167_v20 = vld [vmem:[#allocation2 + $0x89] sm:$0xff]  ;;  %v168_v22 = vld [vmem:[#allocation2 + $0x91] sm:$0xff] }
  0xc9   :  { %548 = vst.msk [vmem:[#allocation2 + $0x98] sm:$0xff] %vm84_vm1, %v3490_v1  ;;  %v152_v25 = vld [vmem:[#allocation2 + $0x90] sm:$0xff]  ;;  %546 = vst.msk [vmem:[#allocation2 + $0x88] sm:$0xff] %vm84_vm1, %v3490_v1  ;;  %v3195_v28 = vpack.i.bf16 %v168_v22, %v167_v20 }
  0xca   :  { %547 = vst.msk [vmem:[#allocation2 + $0x90] sm:$0xff] %vm84_vm1, %v3490_v1  ;;  %v3190_v36 = vpack.i.bf16 %v152_v25, %v151_v18 }
  0xcc   :  { %3161 = vrot.lane.b32.xlu1 %v3160_v24, %s3491_s0 }
  0xd0   :  { %3166 = vrot.lane.b32.xlu1 %v3165_v26, %s3492_s28 }
  0xd4   :  { %3171 = vrot.lane.b32.xlu1 %v3170_v29, %s3491_s0 }
  0xd8   :  { %3176 = vrot.lane.b32.xlu1 %v3175_v30, %s3492_s28 }
  0xdc   :  { %3181 = vrot.lane.b32.xlu1 %v3180_v33, %s3491_s0 }
  0xe0   :  { %3186 = vrot.lane.b32.xlu1 %v3185_v34, %s3492_s28 }
  0xe4   :  { %3191 = vrot.lane.b32.xlu1 %v3190_v36, %s3491_s0 }
  0xe8   :  { %3196 = vrot.lane.b32.xlu1 %v3195_v28, %s3492_s28 }
 0x106   :  { %v3122_v32 = vpop.permute.xlu1 %3121 }
 0x107   :  { %v3124_v40 = vunpack.i.h.bf16 %v3122_v32  ;;  %v3123_v41 = vunpack.i.l.bf16 %v3122_v32 }
 0x109   :  { %v297_v44 = vsel %vm84_vm1, %v3567_v8, %v3123_v41  ;;  %v298_v45 = vsel %vm84_vm1, %v3572_v11, %v3124_v40 }
 0x126   :  { %v3127_v35 = vpop.permute.xlu1 %3126 }
 0x127   :  { %v3129_v15 = vunpack.i.h.bf16 %v3127_v35  ;;  %v3128_v17 = vunpack.i.l.bf16 %v3127_v35 }
 0x12a   :  { %v3132_v42 = vpop.permute.xlu1 %3131 }
 0x12b   :  { %v3134_v38 = vunpack.i.h.bf16 %v3132_v42  ;;  %v3133_v39 = vunpack.i.l.bf16 %v3132_v42 }
 0x12d   :  { %v314_v46 = vsel %vm313_vm2, %v297_v44, %v3133_v39  ;;  %v315_v48 = vsel %vm313_vm2, %v298_v45, %v3134_v38 }
 0x12e   :  { %v3137_v49 = vpop.permute.xlu1 %3136  ;;  %v343_v50 = vpack.c.bf16 %v315_v48, %v314_v46  ;;  %v3142_v26 = vpop.permute.xlu0 %3141 }
 0x12f   :  { %v3139_v52 = vunpack.i.h.bf16 %v3137_v49  ;;  %v3138_v54 = vunpack.i.l.bf16 %v3137_v49  ;;  %v3144_v35 = vunpack.i.h.bf16 %v3142_v26  ;;  %v3143_v40 = vunpack.i.l.bf16 %v3142_v26 }
 0x130   :  { %2928 = vmatprep.mubr.msk.bf16.mxu0 %vm391_vm3, %v343_v50 }
 0x131   :  { %v300_v8 = vsel %vm84_vm1, %v3587_v19, %v3139_v52  ;;  %v299_v11 = vsel %vm84_vm1, %v3580_v16, %v3138_v54 }
 0x132   :  { %v3147_v51 = vpop.permute.xlu1 %3146 }
 0x133   :  { %v3149_v18 = vunpack.i.h.bf16 %v3147_v51  ;;  %v3148_v20 = vunpack.i.l.bf16 %v3147_v51 }
 0x136   :  { %v3152_v55 = vpop.permute.xlu1 %3151 }
 0x137   :  { %v3154_v56 = vunpack.i.h.bf16 %v3152_v55  ;;  %v3153_v57 = vunpack.i.l.bf16 %v3152_v55 }
 0x139   :  { %v317_v58 = vsel %vm313_vm2, %v300_v8, %v3154_v56  ;;  %v316_v60 = vsel %vm313_vm2, %v299_v11, %v3153_v57 }
 0x13a   :  { %v344_v61 = vpack.c.bf16 %v317_v58, %v316_v60  ;;  %v3157_v62 = vpop.permute.xlu1 %3156 }
 0x13b   :  { %v3159_v38 = vunpack.i.h.bf16 %v3157_v62  ;;  %v3158_v39 = vunpack.i.l.bf16 %v3157_v62 }
 0x13c   :  { %2929 = vmatmul.mubr.msk.bf16.vlgmr.msra.gmra.mrb[0].mxu0 %vm391_vm3, %v344_v61 }
 0x13e   :  { %v3162_v63 = vpop.permute.xlu1 %3161 }
 0x13f   :  { %v3164_v0 = vunpack.i.h.bf16 %v3162_v63  ;;  %v3163_v3 = vunpack.i.l.bf16 %v3162_v63 }
 0x141   :  { %v302_v19 = vsel %vm84_vm1, %v3605_v27, %v3164_v0  ;;  %v301_v16 = vsel %vm84_vm1, %v3596_v23, %v3163_v3  ;;  %v305_v27 = vsel %vm84_vm1, %v3646_v43, %v3128_v17  ;;  %v306_v23 = vsel %vm84_vm1, %v3654_v47, %v3129_v15  ;;  %v3785_v3 = vld [vmem:[%s4660_s2] ss:$0 sm:$0xff]  ;;  %v3436_v15 = vld [vmem:[%s4659_s1 + $0x30] sm:$0xff]  }
 0x142   :  { %v3167_v4 = vpop.permute.xlu1 %3166  ;;  %v323_v33 = vsel %vm313_vm2, %v306_v23, %v3149_v18  ;;  %v322_v34 = vsel %vm313_vm2, %v305_v27, %v3148_v20  ;;  %2944 = vmatprep.subr.bf16.mxu1 %v3436_v15  ;;  %v3437_v18 = vld [vmem:[%s4659_s1 + $0x38] sm:$0xff]   ;;  %v3438_v20 = vld [vmem:[%s4659_s1 + $0x40] sm:$0xff]  }
 0x143   :  { %v3169_v5 = vunpack.i.h.bf16 %v3167_v4  ;;  %v3168_v7 = vunpack.i.l.bf16 %v3167_v4  ;;  %v347_v42 = vpack.c.bf16 %v323_v33, %v322_v34  ;;  %2945 = vmatpush3.bf16.msra.mxu1 %v3436_v15 }
 0x144   :  { %2946 = vmatprep.subr.bf16.mxu1 %v3437_v18 }
 0x145   :  { %v318_v9 = vsel %vm313_vm2, %v301_v16, %v3168_v7  ;;  %v319_v10 = vsel %vm313_vm2, %v302_v19, %v3169_v5 }
 0x146   :  { %v345_v12 = vpack.c.bf16 %v319_v10, %v318_v9  ;;  %v3172_v14 = vpop.permute.xlu1 %3171 }
 0x147   :  { %v3174_v22 = vunpack.i.h.bf16 %v3172_v14  ;;  %v3173_v24 = vunpack.i.l.bf16 %v3172_v14  ;;  %2947 = vmatpush3.bf16.msra.mxu1 %v3437_v18 }
 0x148   :  { %2932 = vmatprep.mubr.msk.bf16.mxu0 %vm391_vm3, %v345_v12  ;;  %2948 = vmatprep.subr.bf16.mxu1 %v3438_v20 }
 0x149   :  { %v304_v36 = vsel %vm84_vm1, %v3628_v37, %v3174_v22  ;;  %v303_v28 = vsel %vm84_vm1, %v3614_v31, %v3173_v24  ;;  %v308_v31 = vsel %vm84_vm1, %v3674_v59, %v3144_v35  ;;  %v307_v37 = vsel %vm84_vm1, %v3663_v53, %v3143_v40  ;;  %v3439_v22 = vld [vmem:[%s4659_s1 + $0x48] sm:$0xff]  }
 0x14a   :  { %v3177_v25 = vpop.permute.xlu1 %3176  ;;  %v324_v48 = vsel %vm313_vm2, %v307_v37, %v3158_v39  ;;  %v325_v49 = vsel %vm313_vm2, %v308_v31, %v3159_v38  ;;  %v3441_v37 = vld [vmem:[%s4659_s1 + $0x58] sm:$0xff]  }
 0x14b   :  { %v3179_v29 = vunpack.i.h.bf16 %v3177_v25  ;;  %v3178_v30 = vunpack.i.l.bf16 %v3177_v25  ;;  %v348_v56 = vpack.c.bf16 %v325_v49, %v324_v48  ;;  %2949 = vmatpush3.bf16.msra.mxu1 %v3438_v20 }
 0x14c   :  { %2950 = vmatprep.subr.bf16.mxu1 %v3439_v22 }
 0x14d   :  { %v320_v32 = vsel %vm313_vm2, %v303_v28, %v3178_v30  ;;  %v321_v43 = vsel %vm313_vm2, %v304_v36, %v3179_v29 }
 0x14e   :  { %v346_v47 = vpack.c.bf16 %v321_v43, %v320_v32  ;;  %v3182_v41 = vpop.permute.xlu1 %3181 }
 0x14f   :  { %v3184_v44 = vunpack.i.h.bf16 %v3182_v41  ;;  %v3183_v45 = vunpack.i.l.bf16 %v3182_v41  ;;  %2951 = vmatpush3.bf16.msra.mxu1 %v3439_v22 }
 0x150   :  { %2933 = vmatmul.mubr.msk.bf16.gmra.mrb[4].mxu0 %vm391_vm3, %v346_v47 }
 0x151   :  { %2936 = vmatprep.mubr.msk.bf16.mxu0 %vm391_vm3, %v347_v42  ;;  %v309_v52 = vsel %vm84_vm1, %v3683_v2, %v3183_v45  ;;  %v310_v54 = vsel %vm84_vm1, %v3689_v6, %v3184_v44  ;;  %v3440_v42 = vld [vmem:[%s4659_s1 + $0x50] sm:$0xff]  }
 0x152   :  { %v3187_v46 = vpop.permute.xlu1 %3186  ;;  %2952 = vmatprep.subr.bf16.mxu1 %v3440_v42 }
 0x153   :  { %v3189_v50 = vunpack.i.h.bf16 %v3187_v46  ;;  %v3188_v51 = vunpack.i.l.bf16 %v3187_v46  ;;  %2953 = vmatpush3.bf16.msra.mxu1 %v3440_v42 }
 0x154   :  { %2954 = vmatprep.subr.bf16.mxu1 %v3441_v37 }
 0x155   :  { %v327_v55 = vsel %vm313_vm2, %v310_v54, %v3189_v50  ;;  %v326_v59 = vsel %vm313_vm2, %v309_v52, %v3188_v51 }
 0x156   :  { %v349_v57 = vpack.c.bf16 %v327_v55, %v326_v59  ;;  %v3192_v53 = vpop.permute.xlu1 %3191 }
 0x157   :  { %v3194_v8 = vunpack.i.h.bf16 %v3192_v53  ;;  %v3193_v11 = vunpack.i.l.bf16 %v3192_v53  ;;  %2955 = vmatpush3.bf16.msra.mxu1 %v3441_v37 }
 0x158   :  { %2937 = vmatmul.mubr.msk.bf16.gmra.mrb[8].mxu0 %vm391_vm3, %v348_v56  ;;  %v3442_v56 = vld [vmem:[%s4659_s1 + $0x60] sm:$0xff]  }
 0x159   :  { %2940 = vmatprep.mubr.msk.bf16.mxu0 %vm391_vm3, %v349_v57  ;;  %v311_v2 = vsel %vm84_vm1, %v3697_v13, %v3193_v11  ;;  %v312_v6 = vsel %vm84_vm1, %v3702_v21, %v3194_v8  ;;  %2956 = vmatprep.subr.bf16.mxu1 %v3442_v56 }
 0x15a   :  { %v3197_v58 = vpop.permute.xlu1 %3196 }
 0x15b   :  { %v3199_v60 = vunpack.i.h.bf16 %v3197_v58  ;;  %v3198_v61 = vunpack.i.l.bf16 %v3197_v58  ;;  %2957 = vmatpush3.bf16.msra.mxu1 %v3442_v56 }
 0x15d   :  { %v328_v62 = vsel %vm313_vm2, %v311_v2, %v3198_v61  ;;  %v329_v63 = vsel %vm313_vm2, %v312_v6, %v3199_v60 }
 0x15e   :  { %v350_v0 = vpack.c.bf16 %v329_v63, %v328_v62 }
 0x160   :  { %2941 = vmatmul.mubr.msk.bf16.gmra.mrb[12].mxu0 %vm391_vm3, %v350_v0  ;;  %v3443_v0 = vld [vmem:[%s4659_s1 + $0x68] sm:$0xff]  }
 0x161   :  { %2958 = vmatprep.subr.bf16.mxu1 %v3443_v0 }
 0x162   :  { %2959 = vmatpush3.bf16.msra.mxu1 %v3443_v0 }
 0x20f   :  { %v2930_v4 = vpop.f32.mrb[0].mxu0 }
 0x210   :  { %v459_v5 = vadd.f32 %v2930_v4, %v3785_v3  ;;  %v450_v7 = vpop.f32.mrb[1].mxu0 }
 0x211   :  { %v451_v13 = vadd.f32 %v3785_v3, %v450_v7  ;;  %v2931_v19 = vpop.f32.mrb[2].mxu0 }
 0x212   :  { %v515_v21 = vmax.f32 %v459_v5, 0.0  ;;  %v462_v16 = vadd.f32 %v2931_v19, %v3785_v3  ;;  %v453_v9 = vpop.f32.mrb[3].mxu0 }
 0x213   :  { %v513_v10 = vmax.f32 %v451_v13, 0.0  ;;  %v454_v12 = vadd.f32 %v3785_v3, %v453_v9 }
 0x214   :  { %551 = vst.msk [vmem:[#allocation2 + $0x18] sm:$0xff] %vm84_vm1, %v515_v21  ;;  %v516_v14 = vmax.f32 %v462_v16, 0.0 }
 0x215   :  { %549 = vst.msk [vmem:[#allocation2 + $0x8] sm:$0xff] %vm84_vm1, %v513_v10  ;;  %v514_v17 = vmax.f32 %v454_v12, 0.0 }
 0x216   :  { %552 = vst.msk [vmem:[#allocation2 + $0x20] sm:$0xff] %vm84_vm1, %v516_v14 }
 0x217   :  { %550 = vst.msk [vmem:[#allocation2 + $0x10] sm:$0xff] %vm84_vm1, %v514_v17 }
 0x21d   :  { %v584_v24 = vld [vmem:[#allocation2 + $0x18] ss:$2 sm:$0xff]  ;;  %v600_v33 = vld [vmem:[#allocation2 + $0x19] ss:$2 sm:$0xff] }
 0x21e   :  { %v3807_v25 = vld [vmem:[#allocation2 + $0x7] ss:$2 sm:$0xff]  ;;  %v582_v27 = vld [vmem:[#allocation2 + $0x8] ss:$2 sm:$0xff]  ;;  %v3809_v23 = vld [vmem:[#allocation2 + $0x17] ss:$2 sm:$0xff] }
 0x21f   :  { %v598_v26 = vld [vmem:[#allocation2 + $0x9] ss:$2 sm:$0xff]  ;;  %v3811_v29 = vld [vmem:[#allocation2 + $0xa] ss:$2 sm:$0xff]  ;;  %895 = vst.msk [vmem:[#allocation2] sm:$0xff] %vm84_vm1, %v3490_v1  ;;  %v3200_v30 = vpack.i.bf16 %v584_v24, %v582_v27 }
 0x220   :  { %897 = vst.msk [vmem:[#allocation2 + $0x10] sm:$0xff] %vm84_vm1, %v3490_v1  ;;  %896 = vst.msk [vmem:[#allocation2 + $0x8] sm:$0xff] %vm84_vm1, %v3490_v1  ;;  %v3205_v36 = vpack.i.bf16 %v600_v33, %v598_v26 }
 0x221   :  { %3201 = vrot.lane.b32.xlu1 %v3200_v30, %s3491_s0 }
 0x223   :  { %v2934_v34 = vpop.f32.mrb[4].mxu0 }
 0x224   :  { %v475_v28 = vadd.f32 %v2934_v34, %v3785_v3  ;;  %v466_v32 = vpop.f32.mrb[5].mxu0 }
 0x225   :  { %v467_v43 = vadd.f32 %v3785_v3, %v466_v32  ;;  %v2935_v35 = vpop.f32.mrb[6].mxu0  ;;  %3206 = vrot.lane.b32.xlu1 %v3205_v36, %s3492_s28 }
 0x226   :  { %v519_v40 = vmax.f32 %v475_v28, 0.0  ;;  %v478_v47 = vadd.f32 %v2935_v35, %v3785_v3  ;;  %v469_v41 = vpop.f32.mrb[7].mxu0 }
 0x227   :  { %v517_v38 = vmax.f32 %v467_v43, 0.0  ;;  %v470_v39 = vadd.f32 %v3785_v3, %v469_v41 }
 0x228   :  { %555 = vst.msk [vmem:[#allocation2 + $0x38] sm:$0xff] %vm84_vm1, %v519_v40  ;;  %v520_v44 = vmax.f32 %v478_v47, 0.0 }
 0x229   :  { %553 = vst.msk [vmem:[#allocation2 + $0x28] sm:$0xff] %vm84_vm1, %v517_v38  ;;  %v518_v45 = vmax.f32 %v470_v39, 0.0 }
 0x22a   :  { %556 = vst.msk [vmem:[#allocation2 + $0x40] sm:$0xff] %vm84_vm1, %v520_v44 }
 0x22b   :  { %554 = vst.msk [vmem:[#allocation2 + $0x30] sm:$0xff] %vm84_vm1, %v518_v45  ;;  %v2938_v31 = vpop.f32.mrb[8].mxu0 }
 0x22c   :  { %v491_v46 = vadd.f32 %v2938_v31, %v3785_v3  ;;  %v482_v48 = vpop.f32.mrb[9].mxu0 }
 0x22d   :  { %v483_v49 = vadd.f32 %v3785_v3, %v482_v48  ;;  %v2939_v50 = vpop.f32.mrb[10].mxu0 }
 0x22e   :  { %v523_v51 = vmax.f32 %v491_v46, 0.0  ;;  %v494_v52 = vadd.f32 %v2939_v50, %v3785_v3  ;;  %v485_v54 = vpop.f32.mrb[11].mxu0 }
 0x22f   :  { %v521_v55 = vmax.f32 %v483_v49, 0.0  ;;  %v486_v59 = vadd.f32 %v3785_v3, %v485_v54 }
 0x230   :  { %v616_v57 = vld [vmem:[#allocation2 + $0x1a] ss:$2 sm:$0xff]  ;;  %559 = vst.msk [vmem:[#allocation2 + $0x68] sm:$0xff] %vm84_vm1, %v523_v51  ;;  %v524_v53 = vmax.f32 %v494_v52, 0.0 }
 0x231   :  { %898 = vst.msk [vmem:[#allocation2 + $0x18] sm:$0xff] %vm84_vm1, %v3490_v1  ;;  %v3845_v8 = vld [vmem:[#allocation2 + $0x3a] ss:$2 sm:$0xff]  ;;  %557 = vst.msk [vmem:[#allocation2 + $0x58] sm:$0xff] %vm84_vm1, %v521_v55  ;;  %v522_v11 = vmax.f32 %v486_v59, 0.0  ;;  %v3210_v58 = vpack.i.bf16 %v616_v57, %v3811_v29 }
 0x232   :  { %904 = vst.msk [vmem:[#allocation2 + $0x48] sm:$0xff] %vm84_vm1, %v3490_v1  ;;  %v3851_v60 = vld [vmem:[#allocation2 + $0x27] ss:$2 sm:$0xff]  ;;  %560 = vst.msk [vmem:[#allocation2 + $0x70] sm:$0xff] %vm84_vm1, %v524_v53  ;;  %v586_v61 = vld [vmem:[#allocation2 + $0x28] ss:$2 sm:$0xff] }
 0x233   :  { %v588_v2 = vld [vmem:[#allocation2 + $0x38] ss:$2 sm:$0xff]  ;;  %1296 = vst.msk [vmem:[#allocation2 + $0x48] sm:$0xff] %vm84_vm1, %v3490_v1  ;;  %v3856_v6 = vld [vmem:[#allocation2 + $0x37] ss:$2 sm:$0xff]  ;;  %899 = vst.msk [vmem:[#allocation2 + $0x20] sm:$0xff] %vm84_vm1, %v3490_v1  ;;  %3211 = vrot.lane.b32.xlu1 %v3210_v58, %s3493_s18 }
 0x234   :  { %558 = vst.msk [vmem:[#allocation2 + $0x60] sm:$0xff] %vm84_vm1, %v522_v11  ;;  %v2942_v62 = vpop.f32.mrb[12].mxu0  ;;  %v604_v63 = vld [vmem:[#allocation2 + $0x39] ss:$2 sm:$0xff]  ;;  %1680 = vst.msk [vmem:[#allocation2 + $0x48] sm:$0xff] %vm84_vm1, %v3490_v1  ;;  %v3215_v16 = vpack.i.bf16 %v588_v2, %v586_v61 }
 0x235   :  { %v507_v4 = vadd.f32 %v2942_v62, %v3785_v3  ;;  %v498_v5 = vpop.f32.mrb[13].mxu0  ;;  %v602_v7 = vld [vmem:[#allocation2 + $0x29] ss:$2 sm:$0xff]  ;;  %903 = vst.msk [vmem:[#allocation2 + $0x40] sm:$0xff] %vm84_vm1, %v3490_v1  ;;  %v618_v13 = vld [vmem:[#allocation2 + $0x2a] ss:$2 sm:$0xff] }
 0x236   :  { %1908 = vst.msk [vmem:[#allocation2 + $0x48] sm:$0xff] %vm84_vm1, %v3490_v1  ;;  %v499_v19 = vadd.f32 %v3785_v3, %v498_v5  ;;  %v2943_v21 = vpop.f32.mrb[14].mxu0  ;;  %1295 = vst.msk [vmem:[#allocation2 + $0x40] sm:$0xff] %vm84_vm1, %v3490_v1  ;;  %v3220_v18 = vpack.i.bf16 %v604_v63, %v602_v7  ;;  %v3225_v29 = vpack.i.bf16 %v3845_v8, %v618_v13 }
 0x237   :  { %901 = vst.msk [vmem:[#allocation2 + $0x30] sm:$0xff] %vm84_vm1, %v3490_v1  ;;  %902 = vst.msk [vmem:[#allocation2 + $0x38] sm:$0xff] %vm84_vm1, %v3490_v1  ;;  %v527_v9 = vmax.f32 %v507_v4, 0.0  ;;  %v510_v10 = vadd.f32 %v2943_v21, %v3785_v3  ;;  %v501_v12 = vpop.f32.mrb[15].mxu0  ;;  %3216 = vrot.lane.b32.xlu1 %v3215_v16, %s3491_s0 }
 0x238   :  { %900 = vst.msk [vmem:[#allocation2 + $0x28] sm:$0xff] %vm84_vm1, %v3490_v1  ;;  %2184 = vst.msk [vmem:[#allocation2 + $0x48] sm:$0xff] %vm84_vm1, %v3490_v1  ;;  %v525_v14 = vmax.f32 %v499_v19, 0.0  ;;  %v502_v15 = vadd.f32 %v3785_v3, %v501_v12 }
 0x239   :  { %1679 = vst.msk [vmem:[#allocation2 + $0x40] sm:$0xff] %vm84_vm1, %v3490_v1  ;;  %1293 = vst.msk [vmem:[#allocation2 + $0x30] sm:$0xff] %vm84_vm1, %v3490_v1  ;;  %v528_v17 = vmax.f32 %v510_v10, 0.0  ;;  %v592_v30 = vld [vmem:[#allocation2 + $0x68] ss:$2 sm:$0xff] }
 0x23a   :  { %1294 = vst.msk [vmem:[#allocation2 + $0x38] sm:$0xff] %vm84_vm1, %v3490_v1  ;;  %2456 = vst.msk [vmem:[#allocation2 + $0x48] sm:$0xff] %vm84_vm1, %v3490_v1  ;;  %v526_v3 = vmax.f32 %v502_v15, 0.0  ;;  %v608_v33 = vld [vmem:[#allocation2 + $0x69] ss:$2 sm:$0xff] }
 0x23b   :  { %1907 = vst.msk [vmem:[#allocation2 + $0x40] sm:$0xff] %vm84_vm1, %v3490_v1  ;;  %1677 = vst.msk [vmem:[#allocation2 + $0x30] sm:$0xff] %vm84_vm1, %v3490_v1  ;;  %v3914_v20 = vld [vmem:[#allocation2 + $0x57] ss:$2 sm:$0xff]  ;;  %v3916_v22 = vld [vmem:[#allocation2 + $0x67] ss:$2 sm:$0xff]  ;;  %3221 = vrot.lane.b32.xlu1 %v3220_v18, %s3492_s28 }
 0x23c   :  { %1678 = vst.msk [vmem:[#allocation2 + $0x38] sm:$0xff] %vm84_vm1, %v3490_v1  ;;  %563 = vst.msk [vmem:[#allocation2 + $0x88] sm:$0xff] %vm84_vm1, %v527_v9  ;;  %v590_v24 = vld [vmem:[#allocation2 + $0x58] ss:$2 sm:$0xff]  ;;  %v606_v27 = vld [vmem:[#allocation2 + $0x59] ss:$2 sm:$0xff] }
 0x23d   :  { %2183 = vst.msk [vmem:[#allocation2 + $0x40] sm:$0xff] %vm84_vm1, %v3490_v1  ;;  %1905 = vst.msk [vmem:[#allocation2 + $0x30] sm:$0xff] %vm84_vm1, %v3490_v1  ;;  %v622_v26 = vld [vmem:[#allocation2 + $0x5a] ss:$2 sm:$0xff]  ;;  %v3230_v28 = vpack.i.bf16 %v592_v30, %v590_v24  ;;  %v3235_v39 = vpack.i.bf16 %v608_v33, %v606_v27 }
 0x23e   :  { %1906 = vst.msk [vmem:[#allocation2 + $0x38] sm:$0xff] %vm84_vm1, %v3490_v1  ;;  %561 = vst.msk [vmem:[#allocation2 + $0x78] sm:$0xff] %vm84_vm1, %v525_v14 }
 0x23f   :  { %2455 = vst.msk [vmem:[#allocation2 + $0x40] sm:$0xff] %vm84_vm1, %v3490_v1  ;;  %2181 = vst.msk [vmem:[#allocation2 + $0x30] sm:$0xff] %vm84_vm1, %v3490_v1  ;;  %3226 = vrot.lane.b32.xlu1 %v3225_v29, %s3493_s18 }
 0x240   :  { %2182 = vst.msk [vmem:[#allocation2 + $0x38] sm:$0xff] %vm84_vm1, %v3490_v1  ;;  %564 = vst.msk [vmem:[#allocation2 + $0x90] sm:$0xff] %vm84_vm1, %v528_v17 }
 0x241   :  { %2453 = vst.msk [vmem:[#allocation2 + $0x30] sm:$0xff] %vm84_vm1, %v3490_v1  ;;  %2454 = vst.msk [vmem:[#allocation2 + $0x38] sm:$0xff] %vm84_vm1, %v3490_v1 }
 0x242   :  { %905 = vst.msk [vmem:[#allocation2 + $0x50] sm:$0xff] %vm84_vm1, %v3490_v1  ;;  %562 = vst.msk [vmem:[#allocation2 + $0x80] sm:$0xff] %vm84_vm1, %v526_v3 }
 0x243   :  { %907 = vst.msk [vmem:[#allocation2 + $0x60] sm:$0xff] %vm84_vm1, %v3490_v1  ;;  %906 = vst.msk [vmem:[#allocation2 + $0x58] sm:$0xff] %vm84_vm1, %v3490_v1  ;;  %3231 = vrot.lane.b32.xlu1 %v3230_v28, %s3491_s0 }
 0x245   :  { %v624_v34 = vld [vmem:[#allocation2 + $0x6a] ss:$2 sm:$0xff] }
 0x246   :  { %908 = vst.msk [vmem:[#allocation2 + $0x68] sm:$0xff] %vm84_vm1, %v3490_v1  ;;  %v3250_v31 = vpack.i.bf16 %v624_v34, %v622_v26 }
 0x247   :  { %v628_v36 = vld [vmem:[#allocation2 + $0x8a] ss:$2 sm:$0xff]  ;;  %v612_v43 = vld [vmem:[#allocation2 + $0x89] ss:$2 sm:$0xff]  ;;  %3236 = vrot.lane.b32.xlu1 %v3235_v39, %s3492_s28 }
 0x248   :  { %v596_v32 = vld [vmem:[#allocation2 + $0x88] ss:$2 sm:$0xff]  ;;  %914 = vst.msk [vmem:[#allocation2 + $0x98] sm:$0xff] %vm84_vm1, %v3490_v1 }
 0x249   :  { %v3937_v35 = vld [vmem:[#allocation2 + $0x77] ss:$2 sm:$0xff]  ;;  %v3939_v40 = vld [vmem:[#allocation2 + $0x87] ss:$2 sm:$0xff]  ;;  %v626_v47 = vld [vmem:[#allocation2 + $0x7a] ss:$2 sm:$0xff] }
 0x24a   :  { %1306 = vst.msk [vmem:[#allocation2 + $0x98] sm:$0xff] %vm84_vm1, %v3490_v1  ;;  %909 = vst.msk [vmem:[#allocation2 + $0x70] sm:$0xff] %vm84_vm1, %v3490_v1  ;;  %v3255_v41 = vpack.i.bf16 %v628_v36, %v626_v47  ;;  %v594_v42 = vld [vmem:[#allocation2 + $0x78] ss:$2 sm:$0xff]  ;;  %v610_v38 = vld [vmem:[#allocation2 + $0x79] ss:$2 sm:$0xff] }
 0x24b   :  { %912 = vst.msk [vmem:[#allocation2 + $0x88] sm:$0xff] %vm84_vm1, %v3490_v1  ;;  %913 = vst.msk [vmem:[#allocation2 + $0x90] sm:$0xff] %vm84_vm1, %v3490_v1  ;;  %v3240_v44 = vpack.i.bf16 %v596_v32, %v594_v42  ;;  %v3245_v45 = vpack.i.bf16 %v612_v43, %v610_v38 }
 0x24c   :  { %1690 = vst.msk [vmem:[#allocation2 + $0x98] sm:$0xff] %vm84_vm1, %v3490_v1  ;;  %1304 = vst.msk [vmem:[#allocation2 + $0x88] sm:$0xff] %vm84_vm1, %v3490_v1  ;;  %3256 = vrot.lane.b32.xlu0 %v3255_v41, %s3493_s18 }
 0x24d   :  { %1305 = vst.msk [vmem:[#allocation2 + $0x90] sm:$0xff] %vm84_vm1, %v3490_v1  ;;  %911 = vst.msk [vmem:[#allocation2 + $0x80] sm:$0xff] %vm84_vm1, %v3490_v1  ;;  %3241 = vrot.lane.b32.xlu1 %v3240_v44, %s3491_s0 }
 0x24e   :  { %910 = vst.msk [vmem:[#allocation2 + $0x78] sm:$0xff] %vm84_vm1, %v3490_v1  ;;  %1918 = vst.msk [vmem:[#allocation2 + $0x98] sm:$0xff] %vm84_vm1, %v3490_v1 }
 0x24f   :  { %1688 = vst.msk [vmem:[#allocation2 + $0x88] sm:$0xff] %vm84_vm1, %v3490_v1  ;;  %1689 = vst.msk [vmem:[#allocation2 + $0x90] sm:$0xff] %vm84_vm1, %v3490_v1 }
 0x250   :  { %1303 = vst.msk [vmem:[#allocation2 + $0x80] sm:$0xff] %vm84_vm1, %v3490_v1  ;;  %2194 = vst.msk [vmem:[#allocation2 + $0x98] sm:$0xff] %vm84_vm1, %v3490_v1 }
 0x251   :  { %1916 = vst.msk [vmem:[#allocation2 + $0x88] sm:$0xff] %vm84_vm1, %v3490_v1  ;;  %1917 = vst.msk [vmem:[#allocation2 + $0x90] sm:$0xff] %vm84_vm1, %v3490_v1  ;;  %3246 = vrot.lane.b32.xlu1 %v3245_v45, %s3492_s28 }
 0x252   :  { %1687 = vst.msk [vmem:[#allocation2 + $0x80] sm:$0xff] %vm84_vm1, %v3490_v1  ;;  %2466 = vst.msk [vmem:[#allocation2 + $0x98] sm:$0xff] %vm84_vm1, %v3490_v1 }
 0x253   :  { %2192 = vst.msk [vmem:[#allocation2 + $0x88] sm:$0xff] %vm84_vm1, %v3490_v1  ;;  %2193 = vst.msk [vmem:[#allocation2 + $0x90] sm:$0xff] %vm84_vm1, %v3490_v1 }
 0x254   :  { %1915 = vst.msk [vmem:[#allocation2 + $0x80] sm:$0xff] %vm84_vm1, %v3490_v1  ;;  %2464 = vst.msk [vmem:[#allocation2 + $0x88] sm:$0xff] %vm84_vm1, %v3490_v1 }
 0x255   :  { %2465 = vst.msk [vmem:[#allocation2 + $0x90] sm:$0xff] %vm84_vm1, %v3490_v1  ;;  %2191 = vst.msk [vmem:[#allocation2 + $0x80] sm:$0xff] %vm84_vm1, %v3490_v1  ;;  %3251 = vrot.lane.b32.xlu1 %v3250_v31, %s3493_s18 }
 0x256   :  { %2463 = vst.msk [vmem:[#allocation2 + $0x80] sm:$0xff] %vm84_vm1, %v3490_v1 }
 0x293   :  { %v3202_v37 = vpop.permute.xlu1 %3201 }
 0x294   :  { %v3204_v48 = vunpack.i.h.bf16 %v3202_v37  ;;  %v3203_v49 = vunpack.i.l.bf16 %v3202_v37 }
 0x296   :  { %v725_v59 = vsel %vm84_vm1, %v3807_v25, %v3203_v49  ;;  %v726_v56 = vsel %vm84_vm1, %v3809_v23, %v3204_v48  ;;  %v3446_v49 = vld [vmem:[%s4659_s1 + $0x80] sm:$0xff]  }
 0x297   :  { %v3207_v46 = vpop.permute.xlu1 %3206 }
 0x298   :  { %v3209_v50 = vunpack.i.h.bf16 %v3207_v46  ;;  %v3208_v51 = vunpack.i.l.bf16 %v3207_v46 }
 0x29a   :  { %v733_v57 = vsel %vm313_vm2, %v725_v59, %v3208_v51  ;;  %v734_v53 = vsel %vm313_vm2, %v726_v56, %v3209_v50  ;;  %v3447_v50 = vld [vmem:[%s4659_s1 + $0x88] sm:$0xff]   ;;  %v2725_v51 = vld [vmem:[%s4660_s2 + $0x1] ss:$0 sm:$0xff] }
 0x2a5   :  { %v3212_v52 = vpop.permute.xlu1 %3211 }
 0x2a6   :  { %v3214_v54 = vunpack.i.h.bf16 %v3212_v52  ;;  %v3213_v55 = vunpack.i.l.bf16 %v3212_v52 }
 0x2a8   :  { %v741_v8 = vsel %vm391_vm3, %v733_v57, %v3213_v55  ;;  %v742_v11 = vsel %vm391_vm3, %v734_v53, %v3214_v54 }
 0x2a9   :  { %v3217_v58 = vpop.permute.xlu1 %3216  ;;  %v766_v61 = vpack.c.bf16 %v742_v11, %v741_v8 }
 0x2aa   :  { %v3219_v62 = vunpack.i.h.bf16 %v3217_v58  ;;  %v3218_v63 = vunpack.i.l.bf16 %v3217_v58 }
 0x2ab   :  { %2960 = vmatprep.mubr.bf16.mxu1 %v766_v61 }
 0x2ac   :  { %v728_v23 = vsel %vm84_vm1, %v3856_v6, %v3219_v62  ;;  %v727_v5 = vsel %vm84_vm1, %v3851_v60, %v3218_v63  ;;  %v3448_v62 = vld [vmem:[%s4659_s1 + $0x90] sm:$0xff]   ;;  %v3449_v63 = vld [vmem:[%s4659_s1 + $0x98] sm:$0xff]  }
 0x2ad   :  { %v3222_v2 = vpop.permute.xlu1 %3221 }
 0x2ae   :  { %v3224_v0 = vunpack.i.h.bf16 %v3222_v2  ;;  %v3223_v4 = vunpack.i.l.bf16 %v3222_v2 }
 0x2b0   :  { %v735_v19 = vsel %vm313_vm2, %v727_v5, %v3223_v4  ;;  %v736_v21 = vsel %vm313_vm2, %v728_v23, %v3224_v0 }
 0x2b1   :  { %v3227_v25 = vpop.permute.xlu1 %3226 }
 0x2b2   :  { %v3229_v7 = vunpack.i.h.bf16 %v3227_v25  ;;  %v3228_v13 = vunpack.i.l.bf16 %v3227_v25 }
 0x2b4   :  { %v743_v16 = vsel %vm391_vm3, %v735_v19, %v3228_v13  ;;  %v744_v9 = vsel %vm391_vm3, %v736_v21, %v3229_v7 }
 0x2b5   :  { %v3232_v10 = vpop.permute.xlu1 %3231  ;;  %v767_v12 = vpack.c.bf16 %v744_v9, %v743_v16 }
 0x2b6   :  { %v3234_v18 = vunpack.i.h.bf16 %v3232_v10  ;;  %v3233_v60 = vunpack.i.l.bf16 %v3232_v10 }
 0x2b7   :  { %2961 = vmatmul.mubr.bf16.vlgmr.msra.gmra.mrb[0].mxu1 %v767_v12 }
 0x2b8   :  { %v730_v41 = vsel %vm84_vm1, %v3916_v22, %v3234_v18  ;;  %v729_v42 = vsel %vm84_vm1, %v3914_v20, %v3233_v60  ;;  %v3444_v20 = vld [vmem:[%s4659_s1 + $0x70] sm:$0xff]   ;;  %v3445_v22 = vld [vmem:[%s4659_s1 + $0x78] sm:$0xff]  }
 0x2b9   :  { %v3237_v14 = vpop.permute.xlu1 %3236  ;;  %2968 = vmatprep.subr.bf16.mxu0 %v3444_v20 }
 0x2ba   :  { %v3239_v29 = vunpack.i.h.bf16 %v3237_v14  ;;  %v3238_v30 = vunpack.i.l.bf16 %v3237_v14  ;;  %2969 = vmatpush3.bf16.msra.mxu0 %v3444_v20 }
 0x2bb   :  { %2970 = vmatprep.subr.bf16.mxu0 %v3445_v22 }
 0x2bc   :  { %v738_v44 = vsel %vm313_vm2, %v730_v41, %v3239_v29 }
 0x2be   :  { %v3257_v24 = vpop.permute.xlu0 %3256  ;;  %2971 = vmatpush3.bf16.msra.mxu0 %v3445_v22 }
 0x2bf   :  { %v3242_v15 = vpop.permute.xlu1 %3241  ;;  %v3259_v32 = vunpack.i.h.bf16 %v3257_v24  ;;  %v3258_v43 = vunpack.i.l.bf16 %v3257_v24  ;;  %2972 = vmatprep.subr.bf16.mxu0 %v3446_v49 }
 0x2c0   :  { %v3244_v17 = vunpack.i.h.bf16 %v3242_v15  ;;  %v3243_v6 = vunpack.i.l.bf16 %v3242_v15 }
 0x2c2   :  { %v732_v33 = vsel %vm84_vm1, %v3939_v40, %v3244_v17  ;;  %v731_v34 = vsel %vm84_vm1, %v3937_v35, %v3243_v6  ;;  %v737_v40 = vsel %vm313_vm2, %v729_v42, %v3238_v30  ;;  %2973 = vmatpush3.bf16.msra.mxu0 %v3446_v49 }
 0x2c3   :  { %v3247_v3 = vpop.permute.xlu1 %3246  ;;  %2974 = vmatprep.subr.bf16.mxu0 %v3447_v50 }
 0x2c4   :  { %v3249_v27 = vunpack.i.h.bf16 %v3247_v3  ;;  %v3248_v26 = vunpack.i.l.bf16 %v3247_v3 }
 0x2c6   :  { %v739_v36 = vsel %vm313_vm2, %v731_v34, %v3248_v26  ;;  %v740_v28 = vsel %vm313_vm2, %v732_v33, %v3249_v27  ;;  %2975 = vmatpush3.bf16.msra.mxu0 %v3447_v50 }
 0x2c7   :  { %v3252_v47 = vpop.permute.xlu1 %3251  ;;  %v747_v35 = vsel %vm391_vm3, %v739_v36, %v3258_v43  ;;  %v748_v45 = vsel %vm391_vm3, %v740_v28, %v3259_v32  ;;  %2976 = vmatprep.subr.bf16.mxu0 %v3448_v62 }
 0x2c8   :  { %v3254_v38 = vunpack.i.h.bf16 %v3252_v47  ;;  %v3253_v39 = vunpack.i.l.bf16 %v3252_v47  ;;  %v769_v48 = vpack.c.bf16 %v748_v45, %v747_v35 }
 0x2ca   :  { %v745_v31 = vsel %vm391_vm3, %v737_v40, %v3253_v39  ;;  %v746_v37 = vsel %vm391_vm3, %v738_v44, %v3254_v38  ;;  %2977 = vmatpush3.bf16.msra.mxu0 %v3448_v62 }
 0x2cb   :  { %v768_v46 = vpack.c.bf16 %v746_v37, %v745_v31  ;;  %2978 = vmatprep.subr.bf16.mxu0 %v3449_v63 }
 0x2cd   :  { %2964 = vmatprep.mubr.bf16.mxu1 %v768_v46 }
 0x2ce   :  { %2965 = vmatmul.mubr.bf16.gmra.mrb[4].mxu1 %v769_v48  ;;  %2979 = vmatpush3.bf16.msra.mxu0 %v3449_v63 }
 0x38a   :  { %v2962_v52 = vpop.f32.mrb[0].mxu1 }
 0x38b   :  { %v4044_v54 = vadd.f32 %v2962_v52, %v2725_v51  ;;  %v856_v55 = vpop.f32.mrb[1].mxu1 }
 0x38c   :  { %v4046_v59 = vadd.f32 %v2725_v51, %v856_v55  ;;  %v2963_v56 = vpop.f32.mrb[2].mxu1 }
 0x38d   :  { %v889_v57 = vmax.f32 %v4044_v54, 0.0  ;;  %v4049_v53 = vadd.f32 %v2963_v56, %v2725_v51  ;;  %v859_v8 = vpop.f32.mrb[3].mxu1 }
 0x38e   :  { %v887_v11 = vmax.f32 %v4046_v59, 0.0  ;;  %v4052_v58 = vadd.f32 %v2725_v51, %v859_v8 }
 0x38f   :  { %917 = vst.msk [vmem:[#allocation2 + $0x18] sm:$0xff] %vm84_vm1, %v889_v57  ;;  %v890_v61 = vmax.f32 %v4049_v53, 0.0 }
 0x390   :  { %915 = vst.msk [vmem:[#allocation2 + $0x8] sm:$0xff] %vm84_vm1, %v887_v11  ;;  %v888_v2 = vmax.f32 %v4052_v58, 0.0 }
 0x391   :  { %918 = vst.msk [vmem:[#allocation2 + $0x20] sm:$0xff] %vm84_vm1, %v890_v61 }
 0x392   :  { %916 = vst.msk [vmem:[#allocation2 + $0x10] sm:$0xff] %vm84_vm1, %v888_v2 }
 0x396   :  { %v933_v0 = vld [vmem:[#allocation2 + $0x18] sm:$0xff] }
 0x397   :  { %v931_v4 = vld [vmem:[#allocation2 + $0x8] sm:$0xff] }
 0x398   :  { %v4066_v25 = vld [vmem:[#allocation2 + $0x5] sm:$0xff]  ;;  %v941_v5 = vld [vmem:[#allocation2 + $0x1b] sm:$0xff] }
 0x399   :  { %v934_v23 = vld [vmem:[#allocation2 + $0x20] sm:$0xff]  ;;  %1287 = vst.msk [vmem:[#allocation2] sm:$0xff] %vm84_vm1, %v3490_v1  ;;  %v4070_v19 = vld [vmem:[#allocation2 + $0x15] sm:$0xff]  ;;  %v939_v16 = vld [vmem:[#allocation2 + $0xb] sm:$0xff] }
 0x39a   :  { %v942_v7 = vld [vmem:[#allocation2 + $0x23] sm:$0xff]  ;;  %v3260_v13 = vpack.i.bf16 %v934_v23, %v933_v0  ;;  %v932_v21 = vld [vmem:[#allocation2 + $0x10] sm:$0xff] }
 0x39b   :  { %1292 = vst.msk [vmem:[#allocation2 + $0x28] sm:$0xff] %vm84_vm1, %v3490_v1  ;;  %v940_v9 = vld [vmem:[#allocation2 + $0x13] sm:$0xff]  ;;  %v3270_v10 = vpack.i.bf16 %v932_v21, %v931_v4  ;;  %v4076_v14 = vld [vmem:[#allocation2 + $0x1d] sm:$0xff]  ;;  %v3265_v15 = vpack.i.bf16 %v942_v7, %v941_v5 }
 0x39c   :  { %v4074_v12 = vld [vmem:[#allocation2 + $0xd] sm:$0xff]  ;;  %3261 = vrot.lane.b32.xlu0 %v3260_v13, %s3491_s0  ;;  %1290 = vst.msk [vmem:[#allocation2 + $0x18] sm:$0xff] %vm84_vm1, %v3490_v1  ;;  %1291 = vst.msk [vmem:[#allocation2 + $0x20] sm:$0xff] %vm84_vm1, %v3490_v1  ;;  %v3275_v17 = vpack.i.bf16 %v940_v9, %v939_v16 }
 0x39d   :  { %1288 = vst.msk [vmem:[#allocation2 + $0x8] sm:$0xff] %vm84_vm1, %v3490_v1  ;;  %1289 = vst.msk [vmem:[#allocation2 + $0x10] sm:$0xff] %vm84_vm1, %v3490_v1  ;;  %3271 = vrot.lane.b32.xlu1 %v3270_v10, %s3491_s0 }
 0x3a0   :  { %3266 = vrot.lane.b32.xlu0 %v3265_v15, %s3492_s28 }
 0x3a1   :  { %v2966_v6 = vpop.f32.mrb[4].mxu1  ;;  %3276 = vrot.lane.b32.xlu1 %v3275_v17, %s3492_s28 }
 0x3a2   :  { %v4089_v3 = vadd.f32 %v2966_v6, %v2725_v51  ;;  %v872_v18 = vpop.f32.mrb[5].mxu1 }
 0x3a3   :  { %v4092_v60 = vadd.f32 %v2725_v51, %v872_v18  ;;  %v2967_v24 = vpop.f32.mrb[6].mxu1 }
 0x3a4   :  { %v893_v27 = vmax.f32 %v4089_v3, 0.0  ;;  %v4095_v26 = vadd.f32 %v2967_v24, %v2725_v51  ;;  %v875_v29 = vpop.f32.mrb[7].mxu1 }
 0x3a5   :  { %v891_v30 = vmax.f32 %v4092_v60, 0.0  ;;  %v4098_v33 = vadd.f32 %v2725_v51, %v875_v29 }
 0x3a6   :  { %921 = vst.msk [vmem:[#allocation2 + $0x68] sm:$0xff] %vm84_vm1, %v893_v27  ;;  %v894_v34 = vmax.f32 %v4095_v26, 0.0 }
 0x3a7   :  { %919 = vst.msk [vmem:[#allocation2 + $0x58] sm:$0xff] %vm84_vm1, %v891_v30  ;;  %v892_v36 = vmax.f32 %v4098_v33, 0.0 }
 0x3a8   :  { %922 = vst.msk [vmem:[#allocation2 + $0x70] sm:$0xff] %vm84_vm1, %v894_v34 }
 0x3a9   :  { %920 = vst.msk [vmem:[#allocation2 + $0x60] sm:$0xff] %vm84_vm1, %v892_v36 }
 0x3ad   :  { %v937_v28 = vld [vmem:[#allocation2 + $0x68] sm:$0xff] }
 0x3ae   :  { %v935_v32 = vld [vmem:[#allocation2 + $0x58] sm:$0xff] }
 0x3af   :  { %v4106_v43 = vld [vmem:[#allocation2 + $0x55] sm:$0xff]  ;;  %v945_v41 = vld [vmem:[#allocation2 + $0x6b] sm:$0xff] }
 0x3b0   :  { %v938_v47 = vld [vmem:[#allocation2 + $0x70] sm:$0xff]  ;;  %1297 = vst.msk [vmem:[#allocation2 + $0x50] sm:$0xff] %vm84_vm1, %v3490_v1  ;;  %v929_v39 = vld [vmem:[#allocation2 + $0x65] sm:$0xff]  ;;  %v943_v44 = vld [vmem:[#allocation2 + $0x5b] sm:$0xff] }
 0x3b1   :  { %v946_v42 = vld [vmem:[#allocation2 + $0x73] sm:$0xff]  ;;  %v3280_v38 = vpack.i.bf16 %v938_v47, %v937_v28  ;;  %v936_v40 = vld [vmem:[#allocation2 + $0x60] sm:$0xff] }
 0x3b2   :  { %1302 = vst.msk [vmem:[#allocation2 + $0x78] sm:$0xff] %vm84_vm1, %v3490_v1  ;;  %v944_v35 = vld [vmem:[#allocation2 + $0x63] sm:$0xff]  ;;  %v3285_v45 = vpack.i.bf16 %v936_v40, %v935_v32  ;;  %v930_v37 = vld [vmem:[#allocation2 + $0x6d] sm:$0xff]  ;;  %v3295_v46 = vpack.i.bf16 %v946_v42, %v945_v41 }
 0x3b3   :  { %v928_v31 = vld [vmem:[#allocation2 + $0x5d] sm:$0xff]  ;;  %3281 = vrot.lane.b32.xlu0 %v3280_v38, %s3491_s0  ;;  %1300 = vst.msk [vmem:[#allocation2 + $0x68] sm:$0xff] %vm84_vm1, %v3490_v1  ;;  %1301 = vst.msk [vmem:[#allocation2 + $0x70] sm:$0xff] %vm84_vm1, %v3490_v1  ;;  %v3290_v48 = vpack.i.bf16 %v944_v35, %v943_v44  ;;  %v3451_v38 = vld [vmem:[%s4659_s1 + $0xa8] sm:$0xff]  }
 0x3b4   :  { %1298 = vst.msk [vmem:[#allocation2 + $0x58] sm:$0xff] %vm84_vm1, %v3490_v1  ;;  %1299 = vst.msk [vmem:[#allocation2 + $0x60] sm:$0xff] %vm84_vm1, %v3490_v1  ;;  %3286 = vrot.lane.b32.xlu1 %v3285_v45, %s3491_s0 }
 0x3b7   :  { %3296 = vrot.lane.b32.xlu0 %v3295_v46, %s3492_s28 }
 0x3b8   :  { %3291 = vrot.lane.b32.xlu1 %v3290_v48, %s3492_s28 }
 0x40e   :  { %v3262_v20 = vpop.permute.xlu0 %3261 }
 0x40f   :  { %v3272_v22 = vpop.permute.xlu1 %3271  ;;  %v3264_v49 = vunpack.i.h.bf16 %v3262_v20  ;;  %v3263_v50 = vunpack.i.l.bf16 %v3262_v20 }
 0x410   :  { %v3274_v51 = vunpack.i.h.bf16 %v3272_v22  ;;  %v3273_v52 = vunpack.i.l.bf16 %v3272_v22 }
 0x411   :  { %v1014_v11 = vsel %vm84_vm1, %v4076_v14, %v3264_v49  ;;  %v1013_v61 = vsel %vm84_vm1, %v4070_v19, %v3263_v50 }
 0x412   :  { %v3267_v55 = vpop.permute.xlu0 %3266  ;;  %v1012_v63 = vsel %vm84_vm1, %v4074_v12, %v3274_v51  ;;  %v1011_v0 = vsel %vm84_vm1, %v4066_v25, %v3273_v52 }
 0x413   :  { %v3269_v56 = vunpack.i.h.bf16 %v3267_v55  ;;  %v3268_v57 = vunpack.i.l.bf16 %v3267_v55  ;;  %v3277_v8 = vpop.permute.xlu1 %3276 }
 0x414   :  { %v3279_v2 = vunpack.i.h.bf16 %v3277_v8  ;;  %v3278_v62 = vunpack.i.l.bf16 %v3277_v8 }
 0x415   :  { %v1021_v4 = vsel %vm313_vm2, %v1013_v61, %v3268_v57  ;;  %v1022_v23 = vsel %vm313_vm2, %v1014_v11, %v3269_v56 }
 0x416   :  { %v1019_v5 = vsel %vm313_vm2, %v1011_v0, %v3278_v62  ;;  %v1020_v7 = vsel %vm313_vm2, %v1012_v63, %v3279_v2  ;;  %v1041_v21 = vpack.c.bf16 %v1022_v23, %v1021_v4 }
 0x417   :  { %v1040_v13 = vpack.c.bf16 %v1020_v7, %v1019_v5 }
 0x419   :  { %2980 = vmatprep.mubr.msk.bf16.mxu0 %vm391_vm3, %v1040_v13  ;;  %v3452_v13 = vld [vmem:[%s4659_s1 + $0xb0] sm:$0xff]  }
 0x41a   :  { %2981 = vmatmul.mubr.msk.bf16.vlgmr.msra.gmra.mrb[16].mxu0 %vm391_vm3, %v1041_v21  ;;  %v3453_v21 = vld [vmem:[%s4659_s1 + $0xb8] sm:$0xff]  }
 0x425   :  { %v3282_v19 = vpop.permute.xlu0 %3281 }
 0x426   :  { %v3287_v16 = vpop.permute.xlu1 %3286  ;;  %v3284_v9 = vunpack.i.h.bf16 %v3282_v19  ;;  %v3283_v10 = vunpack.i.l.bf16 %v3282_v19  ;;  %v3454_v19 = vld [vmem:[%s4659_s1 + $0xc0] sm:$0xff]  }
 0x427   :  { %v3289_v12 = vunpack.i.h.bf16 %v3287_v16  ;;  %v3288_v25 = vunpack.i.l.bf16 %v3287_v16  ;;  %v3455_v16 = vld [vmem:[%s4659_s1 + $0xc8] sm:$0xff]  }
 0x428   :  { %v1017_v18 = vsel %vm84_vm1, %v929_v39, %v3283_v10  ;;  %v1018_v24 = vsel %vm84_vm1, %v930_v37, %v3284_v9  ;;  %v2734_v39 = vld [vmem:[%s4660_s2 + $0x2] ss:$0 sm:$0xff]  ;;  %v2745_v9 = vld [vmem:[%s4660_s2 + $0x3] ss:$0 sm:$0xff] }
 0x429   :  { %v3297_v14 = vpop.permute.xlu0 %3296  ;;  %v1015_v30 = vsel %vm84_vm1, %v4106_v43, %v3288_v25  ;;  %v1016_v34 = vsel %vm84_vm1, %v928_v31, %v3289_v12  ;;  %v3450_v43 = vld [vmem:[%s4659_s1 + $0xa0] sm:$0xff]  }
 0x42a   :  { %v3299_v15 = vunpack.i.h.bf16 %v3297_v14  ;;  %v3298_v17 = vunpack.i.l.bf16 %v3297_v14  ;;  %v3292_v6 = vpop.permute.xlu1 %3291  ;;  %2988 = vmatprep.subr.bf16.mxu1 %v3450_v43 }
 0x42b   :  { %v3294_v27 = vunpack.i.h.bf16 %v3292_v6  ;;  %v3293_v29 = vunpack.i.l.bf16 %v3292_v6  ;;  %2989 = vmatpush3.bf16.msra.mxu1 %v3450_v43 }
 0x42c   :  { %v1025_v36 = vsel %vm313_vm2, %v1017_v18, %v3298_v17  ;;  %v1026_v28 = vsel %vm313_vm2, %v1018_v24, %v3299_v15  ;;  %2990 = vmatprep.subr.bf16.mxu1 %v3451_v38 }
 0x42d   :  { %v1023_v32 = vsel %vm313_vm2, %v1015_v30, %v3293_v29  ;;  %v1024_v47 = vsel %vm313_vm2, %v1016_v34, %v3294_v27  ;;  %v1043_v42 = vpack.c.bf16 %v1026_v28, %v1025_v36 }
 0x42e   :  { %v1042_v41 = vpack.c.bf16 %v1024_v47, %v1023_v32 }
 0x42f   :  { %2991 = vmatpush3.bf16.msra.mxu1 %v3451_v38 }
 0x430   :  { %2984 = vmatprep.mubr.msk.bf16.mxu0 %vm391_vm3, %v1042_v41  ;;  %3000 = vmatprep.subr.bf16.mxu1 %v3452_v13 }
 0x431   :  { %2985 = vmatmul.mubr.msk.bf16.gmra.mrb[20].mxu0 %vm391_vm3, %v1043_v42 }
 0x4ed   :  { %v2982_v40 = vpop.f32.mrb[16].mxu0 }
 0x4ee   :  { %v1139_v44 = vadd.f32 %v2982_v40, %v2734_v39  ;;  %v1130_v35 = vpop.f32.mrb[17].mxu0 }
 0x4ef   :  { %v1131_v45 = vadd.f32 %v2734_v39, %v1130_v35  ;;  %v2983_v31 = vpop.f32.mrb[18].mxu0 }
 0x4f0   :  { %v1142_v37 = vadd.f32 %v2983_v31, %v2734_v39  ;;  %v1133_v46 = vpop.f32.mrb[19].mxu0  ;;  %v1163_v20 = vmax.f32 %v1139_v44, 0.0 }
 0x4f1   :  { %v1134_v48 = vadd.f32 %v2734_v39, %v1133_v46  ;;  %v1161_v49 = vmax.f32 %v1131_v45, 0.0 }
 0x4f2   :  { %v1164_v22 = vmax.f32 %v1142_v37, 0.0 }
 0x4f3   :  { %v1162_v50 = vmax.f32 %v1134_v48, 0.0 }
 0x4f4   :  { %v1175_v51 = vpack.c.bf16 %v1164_v22, %v1163_v20 }
 0x4f5   :  { %v1174_v52 = vpack.c.bf16 %v1162_v50, %v1161_v49 }
 0x4f7   :  { %2992 = vmatprep.mubr.msk.bf16.mxu1 %vm84_vm1, %v1174_v52 }
 0x4f8   :  { %2993 = vmatmul.mubr.msk.bf16.vlgmr.msra.gmra.mrb[8].mxu1 %vm84_vm1, %v1175_v51 }
 0x4f9   :  { %3001 = vmatpush3.bf16.msra.mxu1 %v3452_v13 }
 0x4fa   :  { %3002 = vmatprep.subr.bf16.mxu1 %v3453_v21 }
 0x4fd   :  { %3003 = vmatpush3.bf16.msra.mxu1 %v3453_v21 }
 0x4fe   :  { %3004 = vmatprep.subr.bf16.mxu1 %v3454_v19 }
 0x501   :  { %3005 = vmatpush3.bf16.msra.mxu1 %v3454_v19 }
 0x502   :  { %3006 = vmatprep.subr.bf16.mxu1 %v3455_v16 }
 0x504   :  { %v2986_v55 = vpop.f32.mrb[20].mxu0 }
 0x505   :  { %v1155_v56 = vadd.f32 %v2986_v55, %v2734_v39  ;;  %v1146_v57 = vpop.f32.mrb[21].mxu0  ;;  %3007 = vmatpush3.bf16.msra.mxu1 %v3455_v16 }
 0x506   :  { %v1147_v8 = vadd.f32 %v2734_v39, %v1146_v57  ;;  %v2987_v11 = vpop.f32.mrb[22].mxu0 }
 0x507   :  { %v1158_v61 = vadd.f32 %v2987_v11, %v2734_v39  ;;  %v1149_v2 = vpop.f32.mrb[23].mxu0  ;;  %v1167_v63 = vmax.f32 %v1155_v56, 0.0 }
 0x508   :  { %v1150_v62 = vadd.f32 %v2734_v39, %v1149_v2  ;;  %v1165_v4 = vmax.f32 %v1147_v8, 0.0 }
 0x509   :  { %v1168_v0 = vmax.f32 %v1158_v61, 0.0 }
 0x50a   :  { %v1166_v23 = vmax.f32 %v1150_v62, 0.0 }
 0x50b   :  { %v1177_v5 = vpack.c.bf16 %v1168_v0, %v1167_v63 }
 0x50c   :  { %v1176_v7 = vpack.c.bf16 %v1166_v23, %v1165_v4 }
 0x50e   :  { %2996 = vmatprep.mubr.msk.bf16.mxu1 %vm84_vm1, %v1176_v7 }
 0x50f   :  { %2997 = vmatmul.mubr.msk.bf16.gmra.mrb[12].mxu1 %vm84_vm1, %v1177_v5 }
 0x5cb   :  { %v2994_v10 = vpop.f32.mrb[8].mxu1 }
 0x5cc   :  { %v1249_v12 = vadd.f32 %v2994_v10, %v2745_v9  ;;  %v1240_v25 = vpop.f32.mrb[9].mxu1 }
 0x5cd   :  { %v1241_v14 = vadd.f32 %v2745_v9, %v1240_v25  ;;  %v2995_v15 = vpop.f32.mrb[10].mxu1 }
 0x5ce   :  { %v4178_v17 = vadd.f32 %v1249_v12, %v4044_v54  ;;  %v1252_v6 = vadd.f32 %v2995_v15, %v2745_v9  ;;  %v1243_v18 = vpop.f32.mrb[11].mxu1 }
 0x5cf   :  { %v4181_v24 = vadd.f32 %v1241_v14, %v4046_v59  ;;  %v1244_v27 = vadd.f32 %v2745_v9, %v1243_v18 }
 0x5d0   :  { %v1281_v29 = vmax.f32 %v4178_v17, 0.0  ;;  %v4185_v30 = vadd.f32 %v1252_v6, %v4049_v53  ;;  %v3456_v53 = vld [vmem:[%s4659_s1 + $0xd0] sm:$0xff]  }
 0x5d1   :  { %v1279_v34 = vmax.f32 %v4181_v24, 0.0  ;;  %v4189_v36 = vadd.f32 %v1244_v27, %v4052_v58  ;;  %3008 = vmatprep.subr.bf16.mxu1 %v3456_v53  ;;  %v3457_v58 = vld [vmem:[%s4659_s1 + $0xd8] sm:$0xff]  }
 0x5d2   :  { %1309 = vst.msk [vmem:[#allocation2 + $0x18] sm:$0xff] %vm84_vm1, %v1281_v29  ;;  %v1282_v54 = vmax.f32 %v4185_v30, 0.0  ;;  %3009 = vmatpush3.bf16.msra.mxu1 %v3456_v53 }
 0x5d3   :  { %1307 = vst.msk [vmem:[#allocation2 + $0x8] sm:$0xff] %vm84_vm1, %v1279_v34  ;;  %v1280_v59 = vmax.f32 %v4189_v36, 0.0  ;;  %3010 = vmatprep.subr.bf16.mxu1 %v3457_v58 }
 0x5d4   :  { %1310 = vst.msk [vmem:[#allocation2 + $0x20] sm:$0xff] %vm84_vm1, %v1282_v54 }
 0x5d5   :  { %1308 = vst.msk [vmem:[#allocation2 + $0x10] sm:$0xff] %vm84_vm1, %v1280_v59 }
 0x5d6   :  { %3011 = vmatpush3.bf16.msra.mxu1 %v3457_v58 }
 0x5d9   :  { %v1325_v28 = vld [vmem:[#allocation2 + $0x18] sm:$0xff] }
 0x5da   :  { %v1323_v32 = vld [vmem:[#allocation2 + $0x8] sm:$0xff] }
 0x5db   :  { %v4203_v47 = vld [vmem:[#allocation2 + $0x7] sm:$0xff]  ;;  %v1333_v42 = vld [vmem:[#allocation2 + $0x19] sm:$0xff] }
 0x5dc   :  { %v1326_v41 = vld [vmem:[#allocation2 + $0x20] sm:$0xff]  ;;  %1671 = vst.msk [vmem:[#allocation2] sm:$0xff] %vm84_vm1, %v3490_v1  ;;  %v1324_v39 = vld [vmem:[#allocation2 + $0x10] sm:$0xff] }
 0x5dd   :  { %v1334_v43 = vld [vmem:[#allocation2 + $0x21] sm:$0xff]  ;;  %v3300_v38 = vpack.i.bf16 %v1326_v41, %v1325_v28  ;;  %v1331_v40 = vld [vmem:[#allocation2 + $0x9] sm:$0xff]  ;;  %v3310_v35 = vpack.i.bf16 %v1324_v39, %v1323_v32  ;;  %v1332_v45 = vld [vmem:[#allocation2 + $0x11] sm:$0xff] }
 0x5de   :  { %v4207_v44 = vld [vmem:[#allocation2 + $0xf] sm:$0xff]  ;;  %1676 = vst.msk [vmem:[#allocation2 + $0x28] sm:$0xff] %vm84_vm1, %v3490_v1  ;;  %v4211_v31 = vld [vmem:[#allocation2 + $0x17] sm:$0xff]  ;;  %v4213_v37 = vld [vmem:[#allocation2 + $0x1f] sm:$0xff]  ;;  %v3305_v48 = vpack.i.bf16 %v1334_v43, %v1333_v42  ;;  %v3315_v49 = vpack.i.bf16 %v1332_v45, %v1331_v40 }
 0x5df   :  { %1672 = vst.msk [vmem:[#allocation2 + $0x8] sm:$0xff] %vm84_vm1, %v3490_v1  ;;  %3301 = vrot.lane.b32.xlu0 %v3300_v38, %s3491_s0  ;;  %1673 = vst.msk [vmem:[#allocation2 + $0x10] sm:$0xff] %vm84_vm1, %v3490_v1  ;;  %3311 = vrot.lane.b32.xlu1 %v3310_v35, %s3491_s0 }
 0x5e0   :  { %1674 = vst.msk [vmem:[#allocation2 + $0x18] sm:$0xff] %vm84_vm1, %v3490_v1  ;;  %1675 = vst.msk [vmem:[#allocation2 + $0x20] sm:$0xff] %vm84_vm1, %v3490_v1 }
 0x5e2   :  { %v2998_v46 = vpop.f32.mrb[12].mxu1 }
 0x5e3   :  { %v1265_v20 = vadd.f32 %v2998_v46, %v2745_v9  ;;  %v1256_v22 = vpop.f32.mrb[13].mxu1  ;;  %3306 = vrot.lane.b32.xlu0 %v3305_v48, %s3492_s28  ;;  %3316 = vrot.lane.b32.xlu1 %v3315_v49, %s3492_s28 }
 0x5e4   :  { %v1257_v50 = vadd.f32 %v2745_v9, %v1256_v22  ;;  %v2999_v51 = vpop.f32.mrb[14].mxu1 }
 0x5e5   :  { %v4227_v52 = vadd.f32 %v1265_v20, %v4089_v3  ;;  %v1268_v55 = vadd.f32 %v2999_v51, %v2745_v9  ;;  %v1259_v56 = vpop.f32.mrb[15].mxu1 }
 0x5e6   :  { %v4231_v57 = vadd.f32 %v1257_v50, %v4092_v60  ;;  %v1260_v8 = vadd.f32 %v2745_v9, %v1259_v56 }
 0x5e7   :  { %v1285_v11 = vmax.f32 %v4227_v52, 0.0  ;;  %v4235_v61 = vadd.f32 %v1268_v55, %v4095_v26 }
 0x5e8   :  { %v1283_v2 = vmax.f32 %v4231_v57, 0.0  ;;  %v4239_v62 = vadd.f32 %v1260_v8, %v4098_v33 }
 0x5e9   :  { %1313 = vst.msk [vmem:[#allocation2 + $0x68] sm:$0xff] %vm84_vm1, %v1285_v11  ;;  %v1286_v3 = vmax.f32 %v4235_v61, 0.0 }
 0x5ea   :  { %1311 = vst.msk [vmem:[#allocation2 + $0x58] sm:$0xff] %vm84_vm1, %v1283_v2  ;;  %v1284_v60 = vmax.f32 %v4239_v62, 0.0 }
 0x5eb   :  { %1314 = vst.msk [vmem:[#allocation2 + $0x70] sm:$0xff] %vm84_vm1, %v1286_v3 }
 0x5ec   :  { %1312 = vst.msk [vmem:[#allocation2 + $0x60] sm:$0xff] %vm84_vm1, %v1284_v60 }
 0x5f0   :  { %v1329_v63 = vld [vmem:[#allocation2 + $0x68] sm:$0xff] }
 0x5f1   :  { %v1327_v26 = vld [vmem:[#allocation2 + $0x58] sm:$0xff] }
 0x5f2   :  { %v4247_v0 = vld [vmem:[#allocation2 + $0x57] sm:$0xff]  ;;  %v1337_v23 = vld [vmem:[#allocation2 + $0x69] sm:$0xff] }
 0x5f3   :  { %v1330_v4 = vld [vmem:[#allocation2 + $0x70] sm:$0xff]  ;;  %1681 = vst.msk [vmem:[#allocation2 + $0x50] sm:$0xff] %vm84_vm1, %v3490_v1  ;;  %v1328_v7 = vld [vmem:[#allocation2 + $0x60] sm:$0xff] }
 0x5f4   :  { %v1338_v33 = vld [vmem:[#allocation2 + $0x71] sm:$0xff]  ;;  %v3320_v5 = vpack.i.bf16 %v1330_v4, %v1329_v63  ;;  %v1335_v13 = vld [vmem:[#allocation2 + $0x59] sm:$0xff]  ;;  %v3325_v19 = vpack.i.bf16 %v1328_v7, %v1327_v26  ;;  %v1336_v16 = vld [vmem:[#allocation2 + $0x61] sm:$0xff] }
 0x5f5   :  { %v1320_v21 = vld [vmem:[#allocation2 + $0x5f] sm:$0xff]  ;;  %1686 = vst.msk [vmem:[#allocation2 + $0x78] sm:$0xff] %vm84_vm1, %v3490_v1  ;;  %v1321_v9 = vld [vmem:[#allocation2 + $0x67] sm:$0xff]  ;;  %v1322_v10 = vld [vmem:[#allocation2 + $0x6f] sm:$0xff]  ;;  %v3335_v12 = vpack.i.bf16 %v1338_v33, %v1337_v23  ;;  %v3330_v25 = vpack.i.bf16 %v1336_v16, %v1335_v13 }
 0x5f6   :  { %1682 = vst.msk [vmem:[#allocation2 + $0x58] sm:$0xff] %vm84_vm1, %v3490_v1  ;;  %3321 = vrot.lane.b32.xlu0 %v3320_v5, %s3491_s0  ;;  %1683 = vst.msk [vmem:[#allocation2 + $0x60] sm:$0xff] %vm84_vm1, %v3490_v1  ;;  %3326 = vrot.lane.b32.xlu1 %v3325_v19, %s3491_s0  ;;  %v3459_v5 = vld [vmem:[%s4659_s1 + $0xe8] sm:$0xff]   ;;  %v2752_v7 = vld [vmem:[%s4660_s2 + $0x4] ss:$0 sm:$0xff] }
 0x5f7   :  { %1684 = vst.msk [vmem:[#allocation2 + $0x68] sm:$0xff] %vm84_vm1, %v3490_v1  ;;  %1685 = vst.msk [vmem:[#allocation2 + $0x70] sm:$0xff] %vm84_vm1, %v3490_v1 }
 0x5fa   :  { %3336 = vrot.lane.b32.xlu0 %v3335_v12, %s3492_s28  ;;  %3331 = vrot.lane.b32.xlu1 %v3330_v25, %s3492_s28 }
 0x651   :  { %v3302_v14 = vpop.permute.xlu0 %3301  ;;  %v3312_v15 = vpop.permute.xlu1 %3311 }
 0x652   :  { %v3304_v6 = vunpack.i.h.bf16 %v3302_v14  ;;  %v3303_v18 = vunpack.i.l.bf16 %v3302_v14  ;;  %v3314_v27 = vunpack.i.h.bf16 %v3312_v15  ;;  %v3313_v29 = vunpack.i.l.bf16 %v3312_v15 }
 0x654   :  { %v1405_v58 = vsel %vm84_vm1, %v4211_v31, %v3303_v18  ;;  %v1406_v28 = vsel %vm84_vm1, %v4213_v37, %v3304_v6  ;;  %v1404_v42 = vsel %vm84_vm1, %v4207_v44, %v3314_v27  ;;  %v1403_v43 = vsel %vm84_vm1, %v4203_v47, %v3313_v29 }
 0x655   :  { %v3307_v34 = vpop.permute.xlu0 %3306  ;;  %v3317_v53 = vpop.permute.xlu1 %3316 }
 0x656   :  { %v3309_v54 = vunpack.i.h.bf16 %v3307_v34  ;;  %v3308_v59 = vunpack.i.l.bf16 %v3307_v34  ;;  %v3319_v32 = vunpack.i.h.bf16 %v3317_v53  ;;  %v3318_v41 = vunpack.i.l.bf16 %v3317_v53 }
 0x658   :  { %v1413_v38 = vsel %vm313_vm2, %v1405_v58, %v3308_v59  ;;  %v1414_v39 = vsel %vm313_vm2, %v1406_v28, %v3309_v54  ;;  %v1411_v40 = vsel %vm313_vm2, %v1403_v43, %v3318_v41  ;;  %v1412_v35 = vsel %vm313_vm2, %v1404_v42, %v3319_v32 }
 0x659   :  { %v1432_v45 = vpack.c.bf16 %v1412_v35, %v1411_v40  ;;  %v1433_v31 = vpack.c.bf16 %v1414_v39, %v1413_v38 }
 0x65b   :  { %3012 = vmatprep.mubr.msk.bf16.mxu1 %vm391_vm3, %v1432_v45  ;;  %v4306_v45 = vld [vmem:[%s4660_s2 + $0x5] ss:$0 sm:$0xff] }
 0x65c   :  { %3013 = vmatmul.mubr.msk.bf16.vlgmr.msra.gmra.mrb[16].mxu1 %vm391_vm3, %v1433_v31 }
 0x668   :  { %v3322_v37 = vpop.permute.xlu0 %3321  ;;  %v3327_v46 = vpop.permute.xlu1 %3326 }
 0x669   :  { %v3324_v44 = vunpack.i.h.bf16 %v3322_v37  ;;  %v3323_v48 = vunpack.i.l.bf16 %v3322_v37  ;;  %v3329_v20 = vunpack.i.h.bf16 %v3327_v46  ;;  %v3328_v47 = vunpack.i.l.bf16 %v3327_v46 }
 0x66b   :  { %v1409_v55 = vsel %vm84_vm1, %v1321_v9, %v3323_v48  ;;  %v1410_v56 = vsel %vm84_vm1, %v1322_v10, %v3324_v44  ;;  %v1407_v2 = vsel %vm84_vm1, %v4247_v0, %v3328_v47  ;;  %v1408_v3 = vsel %vm84_vm1, %v1320_v21, %v3329_v20  ;;  %v3458_v0 = vld [vmem:[%s4659_s1 + $0xe0] sm:$0xff]  }
 0x66c   :  { %v3337_v22 = vpop.permute.xlu0 %3336  ;;  %v3332_v51 = vpop.permute.xlu1 %3331  ;;  %3020 = vmatprep.subr.bf16.mxu0 %v3458_v0 }
 0x66d   :  { %v3339_v49 = vunpack.i.h.bf16 %v3337_v22  ;;  %v3338_v50 = vunpack.i.l.bf16 %v3337_v22  ;;  %v3334_v8 = vunpack.i.h.bf16 %v3332_v51  ;;  %v3333_v11 = vunpack.i.l.bf16 %v3332_v51  ;;  %3021 = vmatpush3.bf16.msra.mxu0 %v3458_v0 }
 0x66e   :  { %3022 = vmatprep.subr.bf16.mxu0 %v3459_v5 }
 0x66f   :  { %v1417_v60 = vsel %vm313_vm2, %v1409_v55, %v3338_v50  ;;  %v1418_v63 = vsel %vm313_vm2, %v1410_v56, %v3339_v49  ;;  %v1415_v26 = vsel %vm313_vm2, %v1407_v2, %v3333_v11  ;;  %v1416_v4 = vsel %vm313_vm2, %v1408_v3, %v3334_v8 }
 0x670   :  { %v1434_v23 = vpack.c.bf16 %v1416_v4, %v1415_v26  ;;  %v1435_v33 = vpack.c.bf16 %v1418_v63, %v1417_v60  ;;  %v3463_v4 = vld [vmem:[%s4659_s1 + $0x108] sm:$0xff]  }
 0x671   :  { %3023 = vmatpush3.bf16.msra.mxu0 %v3459_v5 }
 0x672   :  { %3016 = vmatprep.mubr.msk.bf16.mxu1 %vm391_vm3, %v1434_v23  ;;  %v3464_v23 = vld [vmem:[%s4659_s1 + $0x110] sm:$0xff]  }
 0x673   :  { %3017 = vmatmul.mubr.msk.bf16.gmra.mrb[20].mxu1 %vm391_vm3, %v1435_v33 }
 0x72f   :  { %v3014_v13 = vpop.f32.mrb[16].mxu1 }
 0x730   :  { %v1531_v21 = vadd.f32 %v3014_v13, %v2752_v7  ;;  %v1522_v19 = vpop.f32.mrb[17].mxu1 }
 0x731   :  { %v1523_v16 = vadd.f32 %v2752_v7, %v1522_v19  ;;  %v3015_v9 = vpop.f32.mrb[18].mxu1 }
 0x732   :  { %v1534_v10 = vadd.f32 %v3015_v9, %v2752_v7  ;;  %v1525_v12 = vpop.f32.mrb[19].mxu1  ;;  %v1555_v14 = vmax.f32 %v1531_v21, 0.0 }
 0x733   :  { %v1526_v25 = vadd.f32 %v2752_v7, %v1525_v12  ;;  %v1553_v6 = vmax.f32 %v1523_v16, 0.0 }
 0x734   :  { %v1556_v15 = vmax.f32 %v1534_v10, 0.0 }
 0x735   :  { %v1554_v18 = vmax.f32 %v1526_v25, 0.0 }
 0x736   :  { %v1567_v27 = vpack.c.bf16 %v1556_v15, %v1555_v14 }
 0x737   :  { %v1566_v29 = vpack.c.bf16 %v1554_v18, %v1553_v6 }
 0x739   :  { %3024 = vmatprep.mubr.msk.bf16.mxu0 %vm84_vm1, %v1566_v29 }
 0x73a   :  { %3025 = vmatmul.mubr.msk.bf16.vlgmr.msra.gmra.mrb[24].mxu0 %vm84_vm1, %v1567_v27 }
 0x746   :  { %v3018_v34 = vpop.f32.mrb[20].mxu1 }
 0x747   :  { %v1547_v54 = vadd.f32 %v3018_v34, %v2752_v7  ;;  %v1538_v59 = vpop.f32.mrb[21].mxu1 }
 0x748   :  { %v1539_v53 = vadd.f32 %v2752_v7, %v1538_v59  ;;  %v3019_v58 = vpop.f32.mrb[22].mxu1 }
 0x749   :  { %v1550_v28 = vadd.f32 %v3019_v58, %v2752_v7  ;;  %v1541_v32 = vpop.f32.mrb[23].mxu1  ;;  %v1559_v42 = vmax.f32 %v1547_v54, 0.0 }
 0x74a   :  { %v1542_v41 = vadd.f32 %v2752_v7, %v1541_v32  ;;  %v1557_v38 = vmax.f32 %v1539_v53, 0.0  ;;  %v3467_v53 = vld [vmem:[%s4659_s1 + $0x128] sm:$0xff]  }
 0x74b   :  { %v1560_v43 = vmax.f32 %v1550_v28, 0.0 }
 0x74c   :  { %v1558_v39 = vmax.f32 %v1542_v41, 0.0 }
 0x74d   :  { %v1569_v40 = vpack.c.bf16 %v1560_v43, %v1559_v42 }
 0x74e   :  { %v1568_v35 = vpack.c.bf16 %v1558_v39, %v1557_v38 }
 0x750   :  { %3028 = vmatprep.mubr.msk.bf16.mxu0 %vm84_vm1, %v1568_v35 }
 0x751   :  { %3029 = vmatmul.mubr.msk.bf16.gmra.mrb[28].mxu0 %vm84_vm1, %v1569_v40 }
 0x80d   :  { %v3026_v31 = vpop.f32.mrb[24].mxu0 }
 0x80e   :  { %v1641_v37 = vadd.f32 %v3026_v31, %v4306_v45  ;;  %v1632_v46 = vpop.f32.mrb[25].mxu0 }
 0x80f   :  { %v1633_v44 = vadd.f32 %v4306_v45, %v1632_v46  ;;  %v3027_v48 = vpop.f32.mrb[26].mxu0 }
 0x810   :  { %v1665_v20 = vadd.f32 %v1641_v37, %v4178_v17  ;;  %v1644_v47 = vadd.f32 %v3027_v48, %v4306_v45  ;;  %v1635_v22 = vpop.f32.mrb[27].mxu0  ;;  %v3460_v17 = vld [vmem:[%s4659_s1 + $0xf0] sm:$0xff]  }
 0x811   :  { %v1663_v49 = vadd.f32 %v1633_v44, %v4181_v24  ;;  %v1636_v50 = vadd.f32 %v4306_v45, %v1635_v22  ;;  %3032 = vmatprep.subr.bf16.mxu0 %v3460_v17  ;;  %v3461_v24 = vld [vmem:[%s4659_s1 + $0xf8] sm:$0xff]  }
 0x812   :  { %1693 = vst.msk [vmem:[#allocation2 + $0x18] sm:$0xff] %vm84_vm1, %v1665_v20  ;;  %v1666_v51 = vadd.f32 %v1644_v47, %v4185_v30  ;;  %3033 = vmatpush3.bf16.msra.mxu0 %v3460_v17  ;;  %v3462_v30 = vld [vmem:[%s4659_s1 + $0x100] sm:$0xff]  }
 0x813   :  { %1691 = vst.msk [vmem:[#allocation2 + $0x8] sm:$0xff] %vm84_vm1, %v1663_v49  ;;  %v1664_v55 = vadd.f32 %v1636_v50, %v4189_v36  ;;  %3034 = vmatprep.subr.bf16.mxu0 %v3461_v24 }
 0x814   :  { %1694 = vst.msk [vmem:[#allocation2 + $0x20] sm:$0xff] %vm84_vm1, %v1666_v51 }
 0x815   :  { %1692 = vst.msk [vmem:[#allocation2 + $0x10] sm:$0xff] %vm84_vm1, %v1664_v55 }
 0x816   :  { %3035 = vmatpush3.bf16.msra.mxu0 %v3461_v24 }
 0x817   :  { %3036 = vmatprep.subr.bf16.mxu0 %v3462_v30 }
 0x81a   :  { %3037 = vmatpush3.bf16.msra.mxu0 %v3462_v30 }
 0x81b   :  { %v1704_v36 = vld [vmem:[#allocation2 + $0x18] ss:$2 sm:$0xff]  ;;  %v1708_v2 = vld [vmem:[#allocation2 + $0x19] ss:$2 sm:$0xff]  ;;  %3038 = vmatprep.subr.bf16.mxu0 %v3463_v4 }
 0x81c   :  { %v1712_v56 = vld [vmem:[#allocation2 + $0x1a] ss:$2 sm:$0xff]  ;;  %v1707_v11 = vld [vmem:[#allocation2 + $0x9] ss:$2 sm:$0xff]  ;;  %v1711_v60 = vld [vmem:[#allocation2 + $0xa] ss:$2 sm:$0xff] }
 0x81d   :  { %v1703_v8 = vld [vmem:[#allocation2 + $0x8] ss:$2 sm:$0xff]  ;;  %1904 = vst.msk [vmem:[#allocation2 + $0x28] sm:$0xff] %vm84_vm1, %v3490_v1  ;;  %v4333_v63 = vld [vmem:[#allocation2 + $0x7] ss:$2 sm:$0xff]  ;;  %v3345_v33 = vpack.i.bf16 %v1708_v2, %v1707_v11  ;;  %v3350_v10 = vpack.i.bf16 %v1712_v56, %v1711_v60 }
 0x81e   :  { %v3340_v3 = vpack.i.bf16 %v1704_v36, %v1703_v8  ;;  %2180 = vst.msk [vmem:[#allocation2 + $0x28] sm:$0xff] %vm84_vm1, %v3490_v1  ;;  %v4335_v26 = vld [vmem:[#allocation2 + $0x17] ss:$2 sm:$0xff]  ;;  %1899 = vst.msk [vmem:[#allocation2] sm:$0xff] %vm84_vm1, %v3490_v1  ;;  %3039 = vmatpush3.bf16.msra.mxu0 %v3463_v4 }
 0x81f   :  { %2452 = vst.msk [vmem:[#allocation2 + $0x28] sm:$0xff] %vm84_vm1, %v3490_v1  ;;  %1903 = vst.msk [vmem:[#allocation2 + $0x20] sm:$0xff] %vm84_vm1, %v3490_v1  ;;  %3040 = vmatprep.subr.bf16.mxu0 %v3464_v23  ;;  %v3469_v4 = vld [vmem:[%s4659_s1 + $0x138] sm:$0xff]  }
 0x820   :  { %1900 = vst.msk [vmem:[#allocation2 + $0x8] sm:$0xff] %vm84_vm1, %v3490_v1  ;;  %1901 = vst.msk [vmem:[#allocation2 + $0x10] sm:$0xff] %vm84_vm1, %v3490_v1  ;;  %3341 = vrot.lane.b32.xlu1 %v3340_v3, %s3491_s0 }
 0x821   :  { %1902 = vst.msk [vmem:[#allocation2 + $0x18] sm:$0xff] %vm84_vm1, %v3490_v1  ;;  %2179 = vst.msk [vmem:[#allocation2 + $0x20] sm:$0xff] %vm84_vm1, %v3490_v1 }
 0x822   :  { %2451 = vst.msk [vmem:[#allocation2 + $0x20] sm:$0xff] %vm84_vm1, %v3490_v1  ;;  %3041 = vmatpush3.bf16.msra.mxu0 %v3464_v23  ;;  %v3470_v23 = vld [vmem:[%s4659_s1 + $0x140] sm:$0xff]  }
 0x824   :  { %v3030_v0 = vpop.f32.mrb[28].mxu0  ;;  %3346 = vrot.lane.b32.xlu1 %v3345_v33, %s3492_s28  ;;  %v3471_v33 = vld [vmem:[%s4659_s1 + $0x148] sm:$0xff]  }
 0x825   :  { %v1657_v5 = vadd.f32 %v3030_v0, %v4306_v45  ;;  %v1648_v7 = vpop.f32.mrb[29].mxu0  ;;  %v2770_v0 = vld [vmem:[%s4660_s2 + $0x6] ss:$0 sm:$0xff] }
 0x826   :  { %v1649_v13 = vadd.f32 %v4306_v45, %v1648_v7  ;;  %v3031_v21 = vpop.f32.mrb[30].mxu0 }
 0x827   :  { %v1669_v19 = vadd.f32 %v1657_v5, %v4227_v52  ;;  %v1660_v16 = vadd.f32 %v3031_v21, %v4306_v45  ;;  %v1651_v9 = vpop.f32.mrb[31].mxu0  ;;  %v3465_v52 = vld [vmem:[%s4659_s1 + $0x118] sm:$0xff]  }
 0x828   :  { %v1667_v12 = vadd.f32 %v1649_v13, %v4231_v57  ;;  %v1652_v25 = vadd.f32 %v4306_v45, %v1651_v9  ;;  %3351 = vrot.lane.b32.xlu1 %v3350_v10, %s3493_s18  ;;  %3042 = vmatprep.subr.bf16.mxu0 %v3465_v52  ;;  %v3466_v57 = vld [vmem:[%s4659_s1 + $0x120] sm:$0xff]  }
 0x829   :  { %1697 = vst.msk [vmem:[#allocation2 + $0x68] sm:$0xff] %vm84_vm1, %v1669_v19  ;;  %v1670_v14 = vadd.f32 %v1660_v16, %v4235_v61  ;;  %3043 = vmatpush3.bf16.msra.mxu0 %v3465_v52  ;;  %v3472_v52 = vld [vmem:[%s4659_s1 + $0x150] sm:$0xff]  }
 0x82a   :  { %1695 = vst.msk [vmem:[#allocation2 + $0x58] sm:$0xff] %vm84_vm1, %v1667_v12  ;;  %v1668_v15 = vadd.f32 %v1652_v25, %v4239_v62  ;;  %3044 = vmatprep.subr.bf16.mxu0 %v3466_v57 }
 0x82b   :  { %1698 = vst.msk [vmem:[#allocation2 + $0x70] sm:$0xff] %vm84_vm1, %v1670_v14 }
 0x82c   :  { %1696 = vst.msk [vmem:[#allocation2 + $0x60] sm:$0xff] %vm84_vm1, %v1668_v15 }
 0x82d   :  { %3045 = vmatpush3.bf16.msra.mxu0 %v3466_v57  ;;  %v3473_v57 = vld [vmem:[%s4659_s1 + $0x158] sm:$0xff]  }
 0x82e   :  { %3046 = vmatprep.subr.bf16.mxu0 %v3467_v53 }
 0x831   :  { %3047 = vmatpush3.bf16.msra.mxu0 %v3467_v53 }
 0x832   :  { %v1706_v61 = vld [vmem:[#allocation2 + $0x68] ss:$2 sm:$0xff]  ;;  %v1710_v6 = vld [vmem:[#allocation2 + $0x69] ss:$2 sm:$0xff] }
 0x833   :  { %v1714_v18 = vld [vmem:[#allocation2 + $0x6a] ss:$2 sm:$0xff]  ;;  %v1709_v27 = vld [vmem:[#allocation2 + $0x59] ss:$2 sm:$0xff]  ;;  %v1713_v29 = vld [vmem:[#allocation2 + $0x5a] ss:$2 sm:$0xff] }
 0x834   :  { %v1705_v62 = vld [vmem:[#allocation2 + $0x58] ss:$2 sm:$0xff]  ;;  %1914 = vst.msk [vmem:[#allocation2 + $0x78] sm:$0xff] %vm84_vm1, %v3490_v1  ;;  %v1702_v54 = vld [vmem:[#allocation2 + $0x67] ss:$2 sm:$0xff]  ;;  %v3360_v58 = vpack.i.bf16 %v1710_v6, %v1709_v27  ;;  %v3365_v28 = vpack.i.bf16 %v1714_v18, %v1713_v29 }
 0x835   :  { %v3355_v34 = vpack.i.bf16 %v1706_v61, %v1705_v62  ;;  %2190 = vst.msk [vmem:[#allocation2 + $0x78] sm:$0xff] %vm84_vm1, %v3490_v1  ;;  %v1701_v59 = vld [vmem:[#allocation2 + $0x57] ss:$2 sm:$0xff]  ;;  %1913 = vst.msk [vmem:[#allocation2 + $0x70] sm:$0xff] %vm84_vm1, %v3490_v1 }
 0x836   :  { %2462 = vst.msk [vmem:[#allocation2 + $0x78] sm:$0xff] %vm84_vm1, %v3490_v1  ;;  %1909 = vst.msk [vmem:[#allocation2 + $0x50] sm:$0xff] %vm84_vm1, %v3490_v1 }
 0x837   :  { %1910 = vst.msk [vmem:[#allocation2 + $0x58] sm:$0xff] %vm84_vm1, %v3490_v1  ;;  %1911 = vst.msk [vmem:[#allocation2 + $0x60] sm:$0xff] %vm84_vm1, %v3490_v1  ;;  %3356 = vrot.lane.b32.xlu0 %v3355_v34, %s3491_s0 }
 0x838   :  { %1912 = vst.msk [vmem:[#allocation2 + $0x68] sm:$0xff] %vm84_vm1, %v3490_v1  ;;  %2189 = vst.msk [vmem:[#allocation2 + $0x70] sm:$0xff] %vm84_vm1, %v3490_v1 }
 0x839   :  { %2461 = vst.msk [vmem:[#allocation2 + $0x70] sm:$0xff] %vm84_vm1, %v3490_v1 }
 0x83b   :  { %3361 = vrot.lane.b32.xlu0 %v3360_v58, %s3492_s28 }
 0x83f   :  { %3366 = vrot.lane.b32.xlu0 %v3365_v28, %s3493_s18 }
 0x892   :  { %v3342_v32 = vpop.permute.xlu1 %3341 }
 0x893   :  { %v3344_v42 = vunpack.i.h.bf16 %v3342_v32  ;;  %v3343_v43 = vunpack.i.l.bf16 %v3342_v32 }
 0x895   :  { %v1764_v35 = vsel %vm84_vm1, %v4335_v26, %v3344_v42  ;;  %v1763_v45 = vsel %vm84_vm1, %v4333_v63, %v3343_v43  ;;  %v3468_v26 = vld [vmem:[%s4659_s1 + $0x130] sm:$0xff]  }
 0x896   :  { %v3347_v41 = vpop.permute.xlu1 %3346  ;;  %3052 = vmatprep.subr.bf16.mxu1 %v3468_v26 }
 0x897   :  { %v3349_v38 = vunpack.i.h.bf16 %v3347_v41  ;;  %v3348_v39 = vunpack.i.l.bf16 %v3347_v41  ;;  %3053 = vmatpush3.bf16.msra.mxu1 %v3468_v26 }
 0x898   :  { %3054 = vmatprep.subr.bf16.mxu1 %v3469_v4 }
 0x899   :  { %v1767_v46 = vsel %vm313_vm2, %v1763_v45, %v3348_v39  ;;  %v1768_v44 = vsel %vm313_vm2, %v1764_v35, %v3349_v38 }
 0x89a   :  { %v3352_v40 = vpop.permute.xlu1 %3351 }
 0x89b   :  { %v3354_v31 = vunpack.i.h.bf16 %v3352_v40  ;;  %v3353_v37 = vunpack.i.l.bf16 %v3352_v40  ;;  %3055 = vmatpush3.bf16.msra.mxu1 %v3469_v4 }
 0x89c   :  { %3056 = vmatprep.subr.bf16.mxu1 %v3470_v23 }
 0x89d   :  { %v1771_v48 = vsel %vm391_vm3, %v1767_v46, %v3353_v37  ;;  %v1772_v20 = vsel %vm391_vm3, %v1768_v44, %v3354_v31 }
 0x89e   :  { %v1792_v47 = vpack.c.bf16 %v1772_v20, %v1771_v48 }
 0x89f   :  { %3057 = vmatpush3.bf16.msra.mxu1 %v3470_v23 }
 0x8a0   :  { %3048 = vmatprep.mubr.bf16.mxu0 %v1792_v47  ;;  %3058 = vmatprep.subr.bf16.mxu1 %v3471_v33 }
 0x8a3   :  { %3059 = vmatpush3.bf16.msra.mxu1 %v3471_v33 }
 0x8a4   :  { %3060 = vmatprep.subr.bf16.mxu1 %v3472_v52 }
 0x8a7   :  { %3061 = vmatpush3.bf16.msra.mxu1 %v3472_v52  ;;  %v3478_v52 = vld [vmem:[%s4659_s1 + $0x180] sm:$0xff]  }
 0x8a8   :  { %3062 = vmatprep.subr.bf16.mxu1 %v3473_v57 }
 0x8a9   :  { %v3357_v22 = vpop.permute.xlu0 %3356 }
 0x8aa   :  { %v3359_v50 = vunpack.i.h.bf16 %v3357_v22  ;;  %v3358_v51 = vunpack.i.l.bf16 %v3357_v22 }
 0x8ab   :  { %3063 = vmatpush3.bf16.msra.mxu1 %v3473_v57  ;;  %v3479_v57 = vld [vmem:[%s4659_s1 + $0x188] sm:$0xff]  }
 0x8ac   :  { %v1766_v30 = vsel %vm84_vm1, %v1702_v54, %v3359_v50  ;;  %v1765_v36 = vsel %vm84_vm1, %v1701_v59, %v3358_v51 }
 0x8ad   :  { %v3362_v49 = vpop.permute.xlu0 %3361 }
 0x8ae   :  { %v3364_v55 = vunpack.i.h.bf16 %v3362_v49  ;;  %v3363_v17 = vunpack.i.l.bf16 %v3362_v49 }
 0x8b0   :  { %v1769_v11 = vsel %vm313_vm2, %v1765_v36, %v3363_v17  ;;  %v1770_v2 = vsel %vm313_vm2, %v1766_v30, %v3364_v55 }
 0x8b1   :  { %v3367_v24 = vpop.permute.xlu0 %3366 }
 0x8b2   :  { %v3369_v56 = vunpack.i.h.bf16 %v3367_v24  ;;  %v3368_v8 = vunpack.i.l.bf16 %v3367_v24 }
 0x8b4   :  { %v1773_v3 = vsel %vm391_vm3, %v1769_v11, %v3368_v8  ;;  %v1774_v60 = vsel %vm391_vm3, %v1770_v2, %v3369_v56  ;;  %v3474_v8 = vld [vmem:[%s4659_s1 + $0x160] sm:$0xff]   ;;  %v3475_v11 = vld [vmem:[%s4659_s1 + $0x168] sm:$0xff]  }
 0x8b5   :  { %v1793_v63 = vpack.c.bf16 %v1774_v60, %v1773_v3  ;;  %3068 = vmatprep.subr.bf16.mxu1 %v3474_v8  ;;  %v2779_v2 = vld [vmem:[%s4660_s2 + $0x7] ss:$0 sm:$0xff] }
 0x8b7   :  { %3049 = vmatmul.mubr.bf16.vlgmr.msra.gmra.mrb[32].mxu0 %v1793_v63 }
 0x98a   :  { %v3050_v5 = vpop.f32.mrb[32].mxu0 }
 0x98b   :  { %v4435_v7 = vadd.f32 %v3050_v5, %v2770_v0  ;;  %v1880_v13 = vpop.f32.mrb[33].mxu0 }
 0x98c   :  { %v4437_v21 = vadd.f32 %v2770_v0, %v1880_v13  ;;  %v3051_v19 = vpop.f32.mrb[34].mxu0 }
 0x98d   :  { %v1897_v16 = vmax.f32 %v4435_v7, 0.0  ;;  %v4440_v9 = vadd.f32 %v3051_v19, %v2770_v0  ;;  %v1883_v10 = vpop.f32.mrb[35].mxu0 }
 0x98e   :  { %v1895_v12 = vmax.f32 %v4437_v21, 0.0  ;;  %v4443_v25 = vadd.f32 %v2770_v0, %v1883_v10 }
 0x98f   :  { %1921 = vst.msk [vmem:[#allocation2 + $0x58] sm:$0xff] %vm84_vm1, %v1897_v16  ;;  %v1898_v14 = vmax.f32 %v4440_v9, 0.0 }
 0x990   :  { %1919 = vst.msk [vmem:[#allocation2 + $0x8] sm:$0xff] %vm84_vm1, %v1895_v12  ;;  %v1896_v15 = vmax.f32 %v4443_v25, 0.0 }
 0x991   :  { %1922 = vst.msk [vmem:[#allocation2 + $0x60] sm:$0xff] %vm84_vm1, %v1898_v14  ;;  %v3476_v14 = vld [vmem:[%s4659_s1 + $0x170] sm:$0xff]  }
 0x992   :  { %1920 = vst.msk [vmem:[#allocation2 + $0x10] sm:$0xff] %vm84_vm1, %v1896_v15  ;;  %v3477_v15 = vld [vmem:[%s4659_s1 + $0x178] sm:$0xff]   ;;  %3076 = vmatprep.subr.bf16.mxu0 %v3476_v14 }
 0x993   :  { %3077 = vmatpush3.bf16.msra.mxu0 %v3476_v14 }
 0x994   :  { %3078 = vmatprep.subr.bf16.mxu0 %v3477_v15 }
 0x996   :  { %v1925_v61 = vld [vmem:[#allocation2 + $0x55] sm:$0xff] }
 0x997   :  { %v1929_v6 = vld [vmem:[#allocation2 + $0x58] sm:$0xff]  ;;  %2185 = vst.msk [vmem:[#allocation2 + $0x50] sm:$0xff] %vm84_vm1, %v3490_v1  ;;  %v1923_v18 = vld [vmem:[#allocation2 + $0x5] sm:$0xff]  ;;  %3079 = vmatpush3.bf16.msra.mxu0 %v3477_v15 }
 0x998   :  { %v1930_v62 = vld [vmem:[#allocation2 + $0x60] sm:$0xff]  ;;  %v1927_v27 = vld [vmem:[#allocation2 + $0x8] sm:$0xff]  ;;  %2175 = vst.msk [vmem:[#allocation2] sm:$0xff] %vm84_vm1, %v3490_v1  ;;  %3080 = vmatprep.subr.bf16.mxu0 %v3478_v52 }
 0x999   :  { %v1934_v29 = vld [vmem:[#allocation2 + $0x63] sm:$0xff]  ;;  %v3370_v34 = vpack.i.bf16 %v1930_v62, %v1929_v6  ;;  %v1928_v54 = vld [vmem:[#allocation2 + $0x10] sm:$0xff]  ;;  %v1933_v59 = vld [vmem:[#allocation2 + $0x5b] sm:$0xff] }
 0x99a   :  { %2188 = vst.msk [vmem:[#allocation2 + $0x68] sm:$0xff] %vm84_vm1, %v3490_v1  ;;  %v1932_v53 = vld [vmem:[#allocation2 + $0x13] sm:$0xff]  ;;  %v3375_v58 = vpack.i.bf16 %v1928_v54, %v1927_v27  ;;  %v1931_v28 = vld [vmem:[#allocation2 + $0xb] sm:$0xff]  ;;  %v1926_v32 = vld [vmem:[#allocation2 + $0x5d] sm:$0xff]  ;;  %v3385_v42 = vpack.i.bf16 %v1934_v29, %v1933_v59 }
 0x99b   :  { %2178 = vst.msk [vmem:[#allocation2 + $0x18] sm:$0xff] %vm84_vm1, %v3490_v1  ;;  %v1924_v41 = vld [vmem:[#allocation2 + $0xd] sm:$0xff]  ;;  %3371 = vrot.lane.b32.xlu0 %v3370_v34, %s3491_s0  ;;  %2186 = vst.msk [vmem:[#allocation2 + $0x58] sm:$0xff] %vm84_vm1, %v3490_v1  ;;  %v3380_v43 = vpack.i.bf16 %v1932_v53, %v1931_v28  ;;  %3081 = vmatpush3.bf16.msra.mxu0 %v3478_v52 }
 0x99c   :  { %2187 = vst.msk [vmem:[#allocation2 + $0x60] sm:$0xff] %vm84_vm1, %v3490_v1  ;;  %2176 = vst.msk [vmem:[#allocation2 + $0x8] sm:$0xff] %vm84_vm1, %v3490_v1  ;;  %3376 = vrot.lane.b32.xlu1 %v3375_v58, %s3491_s0  ;;  %3082 = vmatprep.subr.bf16.mxu0 %v3479_v57 }
 0x99d   :  { %2177 = vst.msk [vmem:[#allocation2 + $0x10] sm:$0xff] %vm84_vm1, %v3490_v1 }
 0x99f   :  { %3386 = vrot.lane.b32.xlu0 %v3385_v42, %s3492_s28  ;;  %3083 = vmatpush3.bf16.msra.mxu0 %v3479_v57 }
 0x9a0   :  { %3381 = vrot.lane.b32.xlu1 %v3380_v43, %s3492_s28 }
 0xa0d   :  { %v3372_v38 = vpop.permute.xlu0 %3371 }
 0xa0e   :  { %v3377_v39 = vpop.permute.xlu1 %3376  ;;  %v3374_v40 = vunpack.i.h.bf16 %v3372_v38  ;;  %v3373_v35 = vunpack.i.l.bf16 %v3372_v38 }
 0xa0f   :  { %v3379_v45 = vunpack.i.h.bf16 %v3377_v39  ;;  %v3378_v31 = vunpack.i.l.bf16 %v3377_v39 }
 0xa10   :  { %v1969_v20 = vsel %vm84_vm1, %v1925_v61, %v3373_v35  ;;  %v1970_v47 = vsel %vm84_vm1, %v1926_v32, %v3374_v40  ;;  %v2788_v61 = vld [vmem:[%s4660_s2 + $0x8] ss:$0 sm:$0xff] }
 0xa11   :  { %v3387_v37 = vpop.permute.xlu0 %3386  ;;  %v1967_v50 = vsel %vm84_vm1, %v1923_v18, %v3378_v31  ;;  %v1968_v51 = vsel %vm84_vm1, %v1924_v41, %v3379_v45 }
 0xa12   :  { %v3389_v46 = vunpack.i.h.bf16 %v3387_v37  ;;  %v3388_v44 = vunpack.i.l.bf16 %v3387_v37  ;;  %v3382_v48 = vpop.permute.xlu1 %3381 }
 0xa13   :  { %v3384_v22 = vunpack.i.h.bf16 %v3382_v48  ;;  %v3383_v49 = vunpack.i.l.bf16 %v3382_v48 }
 0xa14   :  { %v1973_v55 = vsel %vm313_vm2, %v1969_v20, %v3388_v44  ;;  %v1974_v17 = vsel %vm313_vm2, %v1970_v47, %v3389_v46 }
 0xa15   :  { %v1971_v24 = vsel %vm313_vm2, %v1967_v50, %v3383_v49  ;;  %v1972_v30 = vsel %vm313_vm2, %v1968_v51, %v3384_v22  ;;  %v1989_v56 = vpack.c.bf16 %v1974_v17, %v1973_v55 }
 0xa16   :  { %v1988_v36 = vpack.c.bf16 %v1972_v30, %v1971_v24 }
 0xa18   :  { %3064 = vmatprep.mubr.msk.bf16.mxu1 %vm391_vm3, %v1988_v36 }
 0xa19   :  { %3065 = vmatmul.mubr.msk.bf16.vlgmr.msra.gmra.mrb[24].mxu1 %vm391_vm3, %v1989_v56 }
 0xa1a   :  { %3069 = vmatpush3.bf16.msra.mxu1 %v3474_v8 }
 0xa1b   :  { %3070 = vmatprep.subr.bf16.mxu1 %v3475_v11 }
 0xa1e   :  { %3071 = vmatpush3.bf16.msra.mxu1 %v3475_v11 }
 0xaec   :  { %v3066_v3 = vpop.f32.mrb[24].mxu1 }
 0xaed   :  { %v2079_v60 = vadd.f32 %v3066_v3, %v2779_v2  ;;  %v2070_v63 = vpop.f32.mrb[25].mxu1 }
 0xaee   :  { %v2071_v26 = vadd.f32 %v2779_v2, %v2070_v63  ;;  %v3067_v4 = vpop.f32.mrb[26].mxu1 }
 0xaef   :  { %v2082_v23 = vadd.f32 %v3067_v4, %v2779_v2  ;;  %v2073_v33 = vpop.f32.mrb[27].mxu1  ;;  %v2087_v5 = vmax.f32 %v2079_v60, 0.0 }
 0xaf0   :  { %v2074_v0 = vadd.f32 %v2779_v2, %v2073_v33  ;;  %v2085_v19 = vmax.f32 %v2071_v26, 0.0 }
 0xaf1   :  { %v2088_v13 = vmax.f32 %v2082_v23, 0.0 }
 0xaf2   :  { %v2086_v16 = vmax.f32 %v2074_v0, 0.0 }
 0xaf3   :  { %v2095_v10 = vpack.c.bf16 %v2088_v13, %v2087_v5 }
 0xaf4   :  { %v2094_v12 = vpack.c.bf16 %v2086_v16, %v2085_v19  ;;  %v3482_v16 = vld [vmem:[%s4659_s1 + $0x1a0] sm:$0xff]  }
 0xaf5   :  { %3092 = vmatprep.subr.bf16.mxu1 %v3482_v16 }
 0xaf6   :  { %3072 = vmatprep.mubr.msk.bf16.mxu1 %vm84_vm1, %v2094_v12  ;;  %v2793_v12 = vld [vmem:[%s4660_s2 + $0x9] ss:$0 sm:$0xff] }
 0xaf7   :  { %3073 = vmatmul.mubr.msk.bf16.vlgmr.msra.gmra.mrb[28].mxu1 %vm84_vm1, %v2095_v10  ;;  %v3483_v10 = vld [vmem:[%s4659_s1 + $0x1a8] sm:$0xff]  }
 0xaf8   :  { %3093 = vmatpush3.bf16.msra.mxu1 %v3482_v16 }
 0xaf9   :  { %3094 = vmatprep.subr.bf16.mxu1 %v3483_v10 }
 0xafc   :  { %3095 = vmatpush3.bf16.msra.mxu1 %v3483_v10 }
 0xbca   :  { %v3074_v6 = vpop.f32.mrb[28].mxu1 }
 0xbcb   :  { %v2161_v18 = vadd.f32 %v3074_v6, %v2788_v61  ;;  %v2152_v62 = vpop.f32.mrb[29].mxu1 }
 0xbcc   :  { %v2153_v27 = vadd.f32 %v2788_v61, %v2152_v62  ;;  %v3075_v29 = vpop.f32.mrb[30].mxu1 }
 0xbcd   :  { %v4514_v34 = vadd.f32 %v2161_v18, %v4435_v7  ;;  %v2164_v54 = vadd.f32 %v3075_v29, %v2788_v61  ;;  %v2155_v59 = vpop.f32.mrb[31].mxu1 }
 0xbce   :  { %v4517_v53 = vadd.f32 %v2153_v27, %v4437_v21  ;;  %v2156_v58 = vadd.f32 %v2788_v61, %v2155_v59 }
 0xbcf   :  { %v2173_v28 = vmax.f32 %v4514_v34, 0.0  ;;  %v4521_v32 = vadd.f32 %v2164_v54, %v4440_v9  ;;  %v3480_v9 = vld [vmem:[%s4659_s1 + $0x190] sm:$0xff]  }
 0xbd0   :  { %v2171_v41 = vmax.f32 %v4517_v53, 0.0  ;;  %v4525_v42 = vadd.f32 %v2156_v58, %v4443_v25  ;;  %3084 = vmatprep.subr.bf16.mxu0 %v3480_v9  ;;  %v3481_v25 = vld [vmem:[%s4659_s1 + $0x198] sm:$0xff]  }
 0xbd1   :  { %2197 = vst.msk [vmem:[#allocation2 + $0x58] sm:$0xff] %vm84_vm1, %v2173_v28  ;;  %v2174_v7 = vmax.f32 %v4521_v32, 0.0  ;;  %3085 = vmatpush3.bf16.msra.mxu0 %v3480_v9  ;;  %v3487_v9 = vld [vmem:[%s4659_s1 + $0x1c8] sm:$0xff]  }
 0xbd2   :  { %2195 = vst.msk [vmem:[#allocation2 + $0x8] sm:$0xff] %vm84_vm1, %v2171_v41  ;;  %v2172_v21 = vmax.f32 %v4525_v42, 0.0  ;;  %3086 = vmatprep.subr.bf16.mxu0 %v3481_v25  ;;  %v3484_v41 = vld [vmem:[%s4659_s1 + $0x1b0] sm:$0xff]  }
 0xbd3   :  { %2198 = vst.msk [vmem:[#allocation2 + $0x60] sm:$0xff] %vm84_vm1, %v2174_v7  ;;  %v3485_v7 = vld [vmem:[%s4659_s1 + $0x1b8] sm:$0xff]   ;;  %3100 = vmatprep.subr.bf16.mxu1 %v3484_v41 }
 0xbd4   :  { %2196 = vst.msk [vmem:[#allocation2 + $0x10] sm:$0xff] %vm84_vm1, %v2172_v21  ;;  %v3486_v21 = vld [vmem:[%s4659_s1 + $0x1c0] sm:$0xff]  }
 0xbd5   :  { %3087 = vmatpush3.bf16.msra.mxu0 %v3481_v25  ;;  %v2802_v25 = vld [vmem:[%s4660_s2 + $0xa] ss:$0 sm:$0xff] }
 0xbd8   :  { %v2201_v43 = vld [vmem:[#allocation2 + $0x57] sm:$0xff] }
 0xbd9   :  { %v2205_v38 = vld [vmem:[#allocation2 + $0x58] sm:$0xff]  ;;  %2457 = vst.msk [vmem:[#allocation2 + $0x50] sm:$0xff] %vm84_vm1, %v3490_v1  ;;  %v2199_v39 = vld [vmem:[#allocation2 + $0x7] sm:$0xff] }
 0xbda   :  { %v2206_v40 = vld [vmem:[#allocation2 + $0x60] sm:$0xff]  ;;  %v2203_v35 = vld [vmem:[#allocation2 + $0x8] sm:$0xff]  ;;  %2447 = vst.msk [vmem:[#allocation2] sm:$0xff] %vm84_vm1, %v3490_v1 }
 0xbdb   :  { %v2210_v45 = vld [vmem:[#allocation2 + $0x61] sm:$0xff]  ;;  %v3390_v31 = vpack.i.bf16 %v2206_v40, %v2205_v38  ;;  %v2204_v37 = vld [vmem:[#allocation2 + $0x10] sm:$0xff]  ;;  %v2209_v46 = vld [vmem:[#allocation2 + $0x59] sm:$0xff] }
 0xbdc   :  { %2460 = vst.msk [vmem:[#allocation2 + $0x68] sm:$0xff] %vm84_vm1, %v3490_v1  ;;  %v2208_v44 = vld [vmem:[#allocation2 + $0x11] sm:$0xff]  ;;  %v3395_v48 = vpack.i.bf16 %v2204_v37, %v2203_v35  ;;  %v2207_v20 = vld [vmem:[#allocation2 + $0x9] sm:$0xff]  ;;  %v2202_v47 = vld [vmem:[#allocation2 + $0x5f] sm:$0xff]  ;;  %v3405_v49 = vpack.i.bf16 %v2210_v45, %v2209_v46 }
 0xbdd   :  { %2450 = vst.msk [vmem:[#allocation2 + $0x18] sm:$0xff] %vm84_vm1, %v3490_v1  ;;  %v2200_v22 = vld [vmem:[#allocation2 + $0xf] sm:$0xff]  ;;  %3391 = vrot.lane.b32.xlu0 %v3390_v31, %s3491_s0  ;;  %2458 = vst.msk [vmem:[#allocation2 + $0x58] sm:$0xff] %vm84_vm1, %v3490_v1  ;;  %v3400_v50 = vpack.i.bf16 %v2208_v44, %v2207_v20 }
 0xbde   :  { %2459 = vst.msk [vmem:[#allocation2 + $0x60] sm:$0xff] %vm84_vm1, %v3490_v1  ;;  %2448 = vst.msk [vmem:[#allocation2 + $0x8] sm:$0xff] %vm84_vm1, %v3490_v1  ;;  %3396 = vrot.lane.b32.xlu1 %v3395_v48, %s3491_s0 }
 0xbdf   :  { %2449 = vst.msk [vmem:[#allocation2 + $0x10] sm:$0xff] %vm84_vm1, %v3490_v1 }
 0xbe1   :  { %3406 = vrot.lane.b32.xlu0 %v3405_v49, %s3492_s28 }
 0xbe2   :  { %3401 = vrot.lane.b32.xlu1 %v3400_v50, %s3492_s28 }
 0xc4f   :  { %v3392_v51 = vpop.permute.xlu0 %3391 }
 0xc50   :  { %v3397_v55 = vpop.permute.xlu1 %3396  ;;  %v3394_v17 = vunpack.i.h.bf16 %v3392_v51  ;;  %v3393_v24 = vunpack.i.l.bf16 %v3392_v51 }
 0xc51   :  { %v3399_v30 = vunpack.i.h.bf16 %v3397_v55  ;;  %v3398_v36 = vunpack.i.l.bf16 %v3397_v55 }
 0xc52   :  { %v2245_v1 = vsel %vm84_vm1, %v2201_v43, %v3393_v24  ;;  %v2246_v3 = vsel %vm84_vm1, %v2202_v47, %v3394_v17  ;;  %v3488_v47 = vld [vmem:[%s4659_s1 + $0x1d0] sm:$0xff]  }
 0xc53   :  { %v3407_v56 = vpop.permute.xlu0 %3406  ;;  %v2243_v26 = vsel %vm84_vm1, %v2199_v39, %v3398_v36  ;;  %v2244_v4 = vsel %vm84_vm1, %v2200_v22, %v3399_v30 }
 0xc54   :  { %v3409_v8 = vunpack.i.h.bf16 %v3407_v56  ;;  %v3408_v11 = vunpack.i.l.bf16 %v3407_v56  ;;  %v3402_v2 = vpop.permute.xlu1 %3401 }
 0xc55   :  { %v3404_v60 = vunpack.i.h.bf16 %v3402_v2  ;;  %v3403_v63 = vunpack.i.l.bf16 %v3402_v2 }
 0xc56   :  { %v2249_v23 = vsel %vm313_vm2, %v2245_v1, %v3408_v11  ;;  %v2250_v33 = vsel %vm313_vm2, %v2246_v3, %v3409_v8 }
 0xc57   :  { %v2247_v0 = vsel %vm313_vm2, %v2243_v26, %v3403_v63  ;;  %v2248_v5 = vsel %vm313_vm2, %v2244_v4, %v3404_v60  ;;  %v2265_v19 = vpack.c.bf16 %v2250_v33, %v2249_v23 }
 0xc58   :  { %v2264_v13 = vpack.c.bf16 %v2248_v5, %v2247_v0 }
 0xc5a   :  { %3088 = vmatprep.mubr.msk.bf16.mxu0 %vm391_vm3, %v2264_v13 }
 0xc5b   :  { %3089 = vmatmul.mubr.msk.bf16.vlgmr.msra.gmra.mrb[36].mxu0 %vm391_vm3, %v2265_v19 }
 0xd2e   :  { %v3090_v14 = vpop.f32.mrb[36].mxu0 }
 0xd2f   :  { %v2355_v15 = vadd.f32 %v3090_v14, %v2793_v12  ;;  %v2346_v52 = vpop.f32.mrb[37].mxu0 }
 0xd30   :  { %v2347_v57 = vadd.f32 %v2793_v12, %v2346_v52  ;;  %v3091_v61 = vpop.f32.mrb[38].mxu0 }
 0xd31   :  { %v2358_v6 = vadd.f32 %v3091_v61, %v2793_v12  ;;  %v2349_v18 = vpop.f32.mrb[39].mxu0  ;;  %v2363_v27 = vmax.f32 %v2355_v15, 0.0 }
 0xd32   :  { %v2350_v62 = vadd.f32 %v2793_v12, %v2349_v18  ;;  %v2361_v54 = vmax.f32 %v2347_v57, 0.0 }
 0xd33   :  { %v2364_v29 = vmax.f32 %v2358_v6, 0.0 }
 0xd34   :  { %v2362_v59 = vmax.f32 %v2350_v62, 0.0  ;;  %v2807_v62 = vld [vmem:[%s4660_s2 + $0xb] ss:$0 sm:$0xff] }
 0xd35   :  { %v2371_v58 = vpack.c.bf16 %v2364_v29, %v2363_v27 }
 0xd36   :  { %v2370_v28 = vpack.c.bf16 %v2362_v59, %v2361_v54 }
 0xd38   :  { %3096 = vmatprep.mubr.msk.bf16.mxu1 %vm84_vm1, %v2370_v28 }
 0xd39   :  { %3097 = vmatmul.mubr.msk.bf16.vlgmr.msra.gmra.mrb[32].mxu1 %vm84_vm1, %v2371_v58 }
 0xd3a   :  { %3101 = vmatpush3.bf16.msra.mxu1 %v3484_v41 }
 0xd3b   :  { %3102 = vmatprep.subr.bf16.mxu1 %v3485_v7 }
 0xd3e   :  { %3103 = vmatpush3.bf16.msra.mxu1 %v3485_v7 }
 0xd3f   :  { %3104 = vmatprep.subr.bf16.mxu1 %v3486_v21 }
 0xd42   :  { %3105 = vmatpush3.bf16.msra.mxu1 %v3486_v21 }
 0xd43   :  { %3106 = vmatprep.subr.bf16.mxu1 %v3487_v9 }
 0xd46   :  { %3107 = vmatpush3.bf16.msra.mxu1 %v3487_v9 }
 0xd47   :  { %3108 = vmatprep.subr.bf16.mxu1 %v3488_v47 }
 0xd4a   :  { %3109 = vmatpush3.bf16.msra.mxu1 %v3488_v47 }
 0xe0c   :  { %v3098_v43 = vpop.f32.mrb[32].mxu1 }
 0xe0d   :  { %v2437_v38 = vadd.f32 %v3098_v43, %v2802_v25  ;;  %v2428_v39 = vpop.f32.mrb[33].mxu1 }
 0xe0e   :  { %v2429_v40 = vadd.f32 %v2802_v25, %v2428_v39  ;;  %v3099_v35 = vpop.f32.mrb[34].mxu1 }
 0xe0f   :  { %v2445_v45 = vadd.f32 %v2437_v38, %v4514_v34  ;;  %v2440_v31 = vadd.f32 %v3099_v35, %v2802_v25  ;;  %v2431_v37 = vpop.f32.mrb[35].mxu1  ;;  %v3489_v34 = vld [vmem:[%s4659_s1 + $0x1d8] sm:$0xff]  }
 0xe10   :  { %v2443_v46 = vadd.f32 %v2429_v40, %v4517_v53  ;;  %v2432_v44 = vadd.f32 %v2802_v25, %v2431_v37  ;;  %3110 = vmatprep.subr.bf16.mxu1 %v3489_v34 }
 0xe11   :  { %2469 = vst.msk [vmem:[#allocation2 + $0x58] sm:$0xff] %vm84_vm1, %v2445_v45  ;;  %v2446_v48 = vadd.f32 %v2440_v31, %v4521_v32  ;;  %3111 = vmatpush3.bf16.msra.mxu1 %v3489_v34 }
 0xe12   :  { %2467 = vst.msk [vmem:[#allocation2 + $0x8] sm:$0xff] %vm84_vm1, %v2443_v46  ;;  %v2444_v20 = vadd.f32 %v2432_v44, %v4525_v42 }
 0xe13   :  { %2470 = vst.msk [vmem:[#allocation2 + $0x60] sm:$0xff] %vm84_vm1, %v2446_v48 }
 0xe14   :  { %2468 = vst.msk [vmem:[#allocation2 + $0x10] sm:$0xff] %vm84_vm1, %v2444_v20 }
 0xe18   :  { %v2477_v53 = vld [vmem:[#allocation2 + $0x58] sm:$0xff] }
 0xe19   :  { %v2475_v42 = vld [vmem:[#allocation2 + $0x8] sm:$0xff]  ;;  %v2473_v63 = vld [vmem:[#allocation2 + $0x57] sm:$0xff] }
 0xe1a   :  { %v2478_v32 = vld [vmem:[#allocation2 + $0x60] sm:$0xff] }
 0xe1b   :  { %v3410_v22 = vpack.i.bf16 %v2478_v32, %v2477_v53  ;;  %v2476_v49 = vld [vmem:[#allocation2 + $0x10] sm:$0xff]  ;;  %v2481_v51 = vld [vmem:[#allocation2 + $0x59] sm:$0xff]  ;;  %v2482_v55 = vld [vmem:[#allocation2 + $0x61] sm:$0xff] }
 0xe1c   :  { %v3415_v50 = vpack.i.bf16 %v2476_v49, %v2475_v42  ;;  %v2479_v17 = vld [vmem:[#allocation2 + $0x9] sm:$0xff]  ;;  %v2480_v24 = vld [vmem:[#allocation2 + $0x11] sm:$0xff]  ;;  %v3425_v30 = vpack.i.bf16 %v2482_v55, %v2481_v51  ;;  %v2474_v26 = vld [vmem:[#allocation2 + $0x5f] sm:$0xff] }
 0xe1d   :  { %3411 = vrot.lane.b32.xlu0 %v3410_v22, %s3491_s0  ;;  %v3420_v36 = vpack.i.bf16 %v2480_v24, %v2479_v17  ;;  %v2471_v13 = vld [vmem:[#allocation2 + $0x7] sm:$0xff]  ;;  %v2472_v19 = vld [vmem:[#allocation2 + $0xf] sm:$0xff] }
 0xe1e   :  { %3416 = vrot.lane.b32.xlu1 %v3415_v50, %s3491_s0 }
 0xe21   :  { %3426 = vrot.lane.b32.xlu0 %v3425_v30, %s3492_s28 }
 0xe22   :  { %3421 = vrot.lane.b32.xlu1 %v3420_v36, %s3492_s28 }
 0xe8f   :  { %v3412_v56 = vpop.permute.xlu0 %3411 }
 0xe90   :  { %v3417_v8 = vpop.permute.xlu1 %3416  ;;  %v3414_v11 = vunpack.i.h.bf16 %v3412_v56  ;;  %v3413_v2 = vunpack.i.l.bf16 %v3412_v56 }
 0xe91   :  { %v3419_v1 = vunpack.i.h.bf16 %v3417_v8  ;;  %v3418_v3 = vunpack.i.l.bf16 %v3417_v8 }
 0xe92   :  { %v2517_v0 = vsel %vm84_vm1, %v2473_v63, %v3413_v2  ;;  %v2518_v5 = vsel %vm84_vm1, %v2474_v26, %v3414_v11 }
 0xe93   :  { %v3427_v60 = vpop.permute.xlu0 %3426  ;;  %v2515_v12 = vsel %vm84_vm1, %v2471_v13, %v3418_v3  ;;  %v2516_v14 = vsel %vm84_vm1, %v2472_v19, %v3419_v1 }
 0xe94   :  { %v3429_v4 = vunpack.i.h.bf16 %v3427_v60  ;;  %v3428_v23 = vunpack.i.l.bf16 %v3427_v60  ;;  %v3422_v33 = vpop.permute.xlu1 %3421 }
 0xe95   :  { %v3424_v16 = vunpack.i.h.bf16 %v3422_v33  ;;  %v3423_v10 = vunpack.i.l.bf16 %v3422_v33 }
 0xe96   :  { %v2521_v15 = vsel %vm313_vm2, %v2517_v0, %v3428_v23  ;;  %v2522_v52 = vsel %vm313_vm2, %v2518_v5, %v3429_v4 }
 0xe97   :  { %v2519_v57 = vsel %vm313_vm2, %v2515_v12, %v3423_v10  ;;  %v2520_v61 = vsel %vm313_vm2, %v2516_v14, %v3424_v16  ;;  %v2537_v18 = vpack.c.bf16 %v2522_v52, %v2521_v15 }
 0xe98   :  { %v2536_v6 = vpack.c.bf16 %v2520_v61, %v2519_v57 }
 0xe9a   :  { %3112 = vmatprep.mubr.msk.bf16.mxu1 %vm391_vm3, %v2536_v6 }
 0xe9b   :  { %3113 = vmatmul.mubr.msk.bf16.vlgmr.msra.gmra.mrb[36].mxu1 %vm391_vm3, %v2537_v18 }
 0xf6e   :  { %v3114_v27 = vpop.f32.mrb[36].mxu1 }
 0xf6f   :  { %v2627_v29 = vadd.f32 %v3114_v27, %v2807_v62  ;;  %v2618_v54 = vpop.f32.mrb[37].mxu1 }
 0xf70   :  { %v2619_v59 = vadd.f32 %v2807_v62, %v2618_v54  ;;  %v3115_v58 = vpop.f32.mrb[38].mxu1 }
 0xf71   :  { %2665 = vxpose.xlu0.b32.start [1/2] (short) (narrow) %v2627_v29, 32  ;;  %v2621_v28 = vpop.f32.mrb[39].mxu1  ;;  %v2630_v41 = vadd.f32 %v3115_v58, %v2807_v62 }
 0xf72   :  { %2633 = vxpose.xlu1.b32.start [1/2] (short) (narrow) %v2619_v59, 32  ;;  %v2622_v7 = vadd.f32 %v2807_v62, %v2621_v28 }
 0xf75   :  { %2666 = vxpose.xlu0.b32.end [2/2] (short) (narrow) %v2630_v41, 32 }
 0xf76   :  { %2634 = vxpose.xlu1.b32.end [2/2] (short) (narrow) %v2622_v7, 32 }
 0xff1   :  { %v2681_v21 = vpop.trf.xlu0 }
 0xff2   :  { %2702 = vst.msk [vmem:[%s4661_s3 + $0x20] sm:$0xff] %vm2697_vm4, %v2681_v21  ;;  %v2649_v9 = vpop.trf.xlu1 }
 0xff3   :  { %2698 = vst.msk [vmem:[%s4661_s3] sm:$0xff] %vm2697_vm4, %v2649_v9 }
 0xff5   :  { %v2682_v25 = vpop.trf.xlu0 }
 0xff6   :  { %2703 = vst.msk [vmem:[%s4661_s3 + $0x28] sm:$0xff] %vm2697_vm4, %v2682_v25  ;;  %v2650_v43 = vpop.trf.xlu1 }
 0xff7   :  { %2699 = vst.msk [vmem:[%s4661_s3 + $0x8] sm:$0xff] %vm2697_vm4, %v2650_v43 }
 0xff9   :  { %v2683_v38 = vpop.trf.xlu0 }
 0xffa   :  { %2704 = vst.msk [vmem:[%s4661_s3 + $0x30] sm:$0xff] %vm2697_vm4, %v2683_v38  ;;  %v2651_v39 = vpop.trf.xlu1 }
 0xffb   :  { %2700 = vst.msk [vmem:[%s4661_s3 + $0x10] sm:$0xff] %vm2697_vm4, %v2651_v39 }
 0xffd   :  { %v2684_v40 = vpop.trf.xlu0 }
 0xffe   :  { %2705 = vst.msk [vmem:[%s4661_s3 + $0x38] sm:$0xff] %vm2697_vm4, %v2684_v40  ;;  %v2652_v35 = vpop.trf.xlu1 }
 0xfff   :  { %2701 = vst.msk [vmem:[%s4661_s3 + $0x18] sm:$0xff] %vm2697_vm4, %v2652_v35 }

</bundles_post_ra>
